<compile_context>
chip_gen: v7x
topology: tpu7x:2x2x1
jax: 0.10.0
libtpu: 0.0.40
codegen_flags: <defaults>
</compile_context>

<pallas_src>
import functools

import numpy as np
import jax
import jax.numpy as jnp
from jax.experimental import pallas as pl
from jax.experimental.pallas import tpu as pltpu


# ------------------------------- constants ---------------------------------

F1, D_MULT, F2 = 8, 2, 16
CH = F1 * D_MULT          # 16
NF = 40
KT, PAD_T = 64, 32        # EEGNet temporal conv
KD, PAD_D = 16, 8         # EEGNet separable depthwise conv
KS = 25                   # Shallow temporal conv
POOL1, POOL2 = 4, 8       # EEGNet avg pools
SPOOL, SSTRIDE = 75, 15   # Shallow avg pool


def eegnet_dims(T):
    W1 = T + 2 * PAD_T - KT + 1          # temporal conv out = T + 1
    W2 = (W1 - POOL1) // POOL1 + 1       # pool_1
    LP = W2 + 2 * PAD_D                  # padded length entering depthwise conv
    W3 = LP - KD + 1                     # depthwise conv out = W2 + 1
    W4 = (W3 - POOL2) // POOL2 + 1       # pool_2
    return W1, W2, LP, W3, W4


def shallow_dims(T):
    Tt = T - KS + 1
    Pt = (Tt - SPOOL) // SSTRIDE + 1
    return Tt, Pt


# ------------------------------ fused kernel -------------------------------

def _branch_kernel(xce_ref, xcs_ref, p1_ref, p2_ref, sp_ref,
                   e_ref, s_ref, c_ref, out_ref,
                   *, B, T, C, n_class):
    """One grid step == one branch pair (EEGNetv4 + ShallowFBCSPNet), all batches."""
    W1, W2, LP, W3, W4 = eegnet_dims(T)
    Tt, Pt = shallow_dims(T)

    # static row offsets inside the packed per-branch slabs
    R_WEFF = 0
    R_WDEP = KT * C                 # 256
    R_WPT = KT * C + KD             # 272
    R_B1 = KT * C + KD + CH         # 288
    R_B2 = R_B1 + 1                 # 289
    R_SW, R_SB = 0, KS * C          # 0, 100
    R_EWC = 0
    R_SWC = W4 * F2                 # 64
    R_EBC = W4 * F2 + Pt * NF       # 224
    R_SBC = R_EBC + 1               # 225

    # ------------------------------ EEGNetv4 ------------------------------
    # conv_temporal + bnorm_temporal + conv_spatial + bnorm_1 folded into one
    # effective conv; im2col slab built in the wrapper -> one big matmul.
    h = jnp.dot(xce_ref[...], e_ref[R_WEFF:R_WEFF + KT * C, :],
                preferred_element_type=jnp.float32)                 # (B*W1, CH)
    h = h + e_ref[R_B1:R_B1 + 1, :]
    h = jnp.where(h > 0.0, h, jnp.exp(jnp.minimum(h, 0.0)) - 1.0)   # ELU (safe)

    # pool_1 (avg 4/4) + zero padding for the depthwise conv, block-diagonal
    # over batches, as one matmul.
    hp = jnp.dot(p1_ref[...], h, preferred_element_type=jnp.float32)  # (B*LP+KD-1, CH)

    # conv_separable_depth: per-channel temporal filter, small unrolled tap loop (VPU).
    wdep = e_ref[R_WDEP:R_WDEP + KD, :]                              # (KD, CH)
    hd = jnp.zeros((B * LP, CH), jnp.float32)
    for k in range(KD):
        hd = hd + hp[k:k + B * LP, :] * wdep[k:k + 1, :]

    # conv_separable_point + bnorm_2 (folded) + ELU
    h2 = jnp.dot(hd, e_ref[R_WPT:R_WPT + CH, :],
                 preferred_element_type=jnp.float32)
    h2 = h2 + e_ref[R_B2:R_B2 + 1, :]
    h2 = jnp.where(h2 > 0.0, h2, jnp.exp(jnp.minimum(h2, 0.0)) - 1.0)

    # pool_2 (avg 8/8), block-diagonal, w4-major / batch-minor ordering.
    hp2 = jnp.dot(p2_ref[...], h2, preferred_element_type=jnp.float32)  # (W4*B, F2)

    # conv_classifier (+ bias): W4 contiguous (B, F2) x (F2, n_class) dots.
    eeg = jnp.zeros((B, n_class), jnp.float32) + c_ref[R_EBC:R_EBC + 1, :]
    for w4 in range(W4):
        eeg = eeg + jnp.dot(hp2[w4 * B:(w4 + 1) * B, :],
                            c_ref[R_EWC + w4 * F2:R_EWC + (w4 + 1) * F2, :],
                            preferred_element_type=jnp.float32)
    eeg = eeg - jnp.max(eeg, axis=-1, keepdims=True)
    eeg = eeg - jnp.log(jnp.sum(jnp.exp(eeg), axis=-1, keepdims=True))   # log-softmax

    # --------------------------- ShallowFBCSPNet ---------------------------
    # conv_time + conv_spat + bnorm folded into one effective conv; im2col matmul.
    g = jnp.dot(xcs_ref[...], s_ref[R_SW:R_SW + KS * C, :],
                preferred_element_type=jnp.float32)                  # (B*Tt, NF)
    g = g + s_ref[R_SB:R_SB + 1, :]
    g = g * g                                                        # square
    gp = jnp.dot(sp_ref[...], g, preferred_element_type=jnp.float32)  # (Pt*B, NF)
    gl = jnp.log(jnp.maximum(gp, 1e-6))                              # safe log

    sh = jnp.zeros((B, n_class), jnp.float32) + c_ref[R_SBC:R_SBC + 1, :]
    for pt in range(Pt):
        sh = sh + jnp.dot(gl[pt * B:(pt + 1) * B, :],
                          c_ref[R_SWC + pt * NF:R_SWC + (pt + 1) * NF, :],
                          preferred_element_type=jnp.float32)
    sh = sh - jnp.max(sh, axis=-1, keepdims=True)
    sh = sh - jnp.log(jnp.sum(jnp.exp(sh), axis=-1, keepdims=True))

    # merged lane-dense-ish output: [eeg logp | shallow logp] in one store.
    out_ref[...] = jnp.concatenate([eeg, sh], axis=-1)


def make_branch_forward(n_branch, B, C, T, n_class):
    W1, W2, LP, W3, W4 = eegnet_dims(T)
    Tt, Pt = shallow_dims(T)
    E_ROWS = KT * C + KD + CH + 2
    S_ROWS = KS * C + 1
    C_ROWS = W4 * F2 + Pt * NF + 2

    kern = functools.partial(_branch_kernel, B=B, T=T, C=C, n_class=n_class)

    def shared(shape):                      # shared across branches (fetched once)
        nd = len(shape)
        return pl.BlockSpec(tuple(shape), lambda i, nd=nd: (0,) * nd)

    def per_branch(rows, cols):             # leading branch axis squeezed
        return pl.BlockSpec((None, rows, cols), lambda i: (i, 0, 0))

    grid_spec = pltpu.PrefetchScalarGridSpec(
        num_scalar_prefetch=0,
        grid=(n_branch,),
        in_specs=[
            shared((B * W1, KT * C)),              # x_col_eeg
            shared((B * Tt, KS * C)),              # x_col_sh
            shared((B * LP + KD - 1, B * W1)),     # pool_1 + pad (block-diagonal)
            shared((W4 * B, B * LP)),              # pool_2 (block-diagonal, w4-major)
            shared((Pt * B, B * Tt)),              # shallow pool (block-diag, pt-major)
            per_branch(E_ROWS, CH),                # packed EEGNet slab
            per_branch(S_ROWS, NF),                # packed Shallow slab
            per_branch(C_ROWS, n_class),           # packed classifier slab
        ],
        out_specs=pl.BlockSpec((None, B, 2 * n_class), lambda i: (i, 0, 0)),
    )

    call = pl.pallas_call(
        kern,
        out_shape=jax.ShapeDtypeStruct((n_branch, B, 2 * n_class), jnp.float32),
        grid_spec=grid_spec,
        compiler_params=pltpu.CompilerParams(
            dimension_semantics=("parallel",)),
    )

    # static im2col gather indices (built once)
    idx_e = np.arange(W1)[:, None] + np.arange(KT)[None, :]    # (W1, KT)
    idx_s = np.arange(Tt)[:, None] + np.arange(KS)[None, :]    # (Tt, KS)

    @jax.jit
    def forward(x, params):
        # (B, C, T) -> time-major; im2col slabs shared by all branches.
        xt = jnp.transpose(x, (0, 2, 1)).astype(jnp.float32)          # (B, T, C)
        xp = jnp.pad(xt, ((0, 0), (PAD_T, PAD_T), (0, 0)))            # (B, T+64, C)
        xc_e = xp[:, idx_e, :].reshape(B * W1, KT * C)                # (B*W1, KT*C)
        xc_s = xt[:, idx_s, :].reshape(B * Tt, KS * C)                # (B*Tt, KS*C)
        packed = call(xc_e, xc_s,
                      params["p1"], params["p2"], params["sp"],
                      params["e_slab"], params["s_slab"], params["c_slab"])
        outs = []
        for i in range(n_branch):           # original Branch.forward ordering
            outs.append(packed[i, :, :n_class])          # EEGNetv4 head
            outs.append(packed[i, :, n_class:])          # ShallowFBCSPNet head
        return outs

    return forward


# --------------------------- parameter preparation --------------------------

def _rn(key, shape, scale=0.1):
    return scale * jax.random.normal(key, shape, dtype=jnp.float32)


def _bn_params(kg, kb, km, kv, n):
    gamma = 1.0 + _rn(kg, (n,))
    beta = _rn(kb, (n,))
    mean = _rn(km, (n,))
    var = jnp.abs(1.0 + _rn(kv, (n,)))
    return gamma, beta, mean, var


def _bn_fold(bn, eps):
    gamma, beta, mean, var = bn
    scale = gamma / jnp.sqrt(var + eps)
    return scale, beta - mean * scale


def init_eegnet_raw(key, C, n_class, T):
    """Raw (unfolded) EEGNetv4 parameters in PyTorch-equivalent layouts."""
    W1, W2, LP, W3, W4 = eegnet_dims(T)
    k = jax.random.split(key, 18)
    w_t = _rn(k[0], (F1, KT))                       # Conv2d(1,F1,(1,64)) weight[f,0,0,k]
    bn_t = _bn_params(k[1], k[2], k[3], k[4], F1)
    w_sp = _rn(k[5], (CH, C))                       # Conv2dWithConstraint weight[ch,0,c,0]
    nrm = jnp.sqrt(jnp.sum(w_sp ** 2, axis=-1, keepdims=True))
    w_sp = w_sp * jnp.minimum(1.0, 1.0 / jnp.maximum(nrm, 1e-12))   # max_norm=1
    bn_1 = _bn_params(k[6], k[7], k[8], k[9], CH)
    w_dep = _rn(k[10], (CH, KD))                    # depthwise weight[ch,0,0,k]
    w_pt = _rn(k[11], (F2, CH))                     # pointwise weight[f2,ch,0,0]
    bn_2 = _bn_params(k[12], k[13], k[14], k[15], F2)
    w_cls = _rn(k[16], (n_class, F2, W4))           # classifier weight[n,f2,0,w4]
    b_cls = _rn(k[17], (n_class,))
    return dict(w_t=w_t, bn_t=bn_t, w_sp=w_sp, bn_1=bn_1, w_dep=w_dep,
                w_pt=w_pt, bn_2=bn_2, w_cls=w_cls, b_cls=b_cls)


def init_shallow_raw(key, C, n_class, T):
    """Raw (unfolded) ShallowFBCSPNet parameters in PyTorch-equivalent layouts."""
    Tt, Pt = shallow_dims(T)
    k = jax.random.split(key, 9)
    w_time = _rn(k[0], (NF, KS))                    # conv_time weight[nf,0,k,0]
    b_time = _rn(k[1], (NF,))
    w_spat = _rn(k[2], (NF, NF, C))                 # conv_spat weight[m,n,0,c] (no bias)
    bn = _bn_params(k[3], k[4], k[5], k[6], NF)
    w_cls = _rn(k[7], (n_class, NF, Pt))            # classifier weight[n,m,pt,0]
    b_cls = _rn(k[8], (n_class,))
    return dict(w_time=w_time, b_time=b_time, w_spat=w_spat, bn=bn,
                w_cls=w_cls, b_cls=b_cls)


def fold_eegnet(p, C, T, n_class):
    """Fold eval-mode BNs into the convs; return packed slabs for the kernel."""
    W1, W2, LP, W3, W4 = eegnet_dims(T)
    sc_t, sh_t = _bn_fold(p["bn_t"], 1e-3)
    sc1, sh1 = _bn_fold(p["bn_1"], 1e-3)
    sc2, sh2 = _bn_fold(p["bn_2"], 1e-3)
    f_of_ch = jnp.arange(CH) // D_MULT
    wt_ch = p["w_t"][f_of_ch, :]                               # (CH, KT)
    coef = sc1 * sc_t[f_of_ch]                                 # (CH,)
    # weff[k, c, ch] = sc1*sc_t * w_t[f(ch),k] * w_sp[ch,c]
    weff = (coef[None, None, :]
            * jnp.transpose(wt_ch)[:, None, :]
            * jnp.transpose(p["w_sp"])[None, :, :])            # (KT, C, CH)
    bias1 = sc1 * sh_t[f_of_ch] * jnp.sum(p["w_sp"], axis=1) + sh1        # (CH,)
    wdep = jnp.transpose(p["w_dep"])                           # (KD, CH)
    wpt = jnp.transpose(sc2[:, None] * p["w_pt"])              # (CH, F2)  (bn_2 scale folded)
    bias2 = sh2                                                # (F2,)
    e_slab = jnp.concatenate([weff.reshape(KT * C, CH), wdep, wpt,
                              bias1.reshape(1, CH), bias2.reshape(1, F2)], axis=0)
    wc = jnp.transpose(p["w_cls"], (2, 1, 0)).reshape(W4 * F2, n_class)
    bc = p["b_cls"].reshape(1, n_class)
    return e_slab, wc, bc


def fold_shallow(p, C, T, n_class):
    Tt, Pt = shallow_dims(T)
    sc, sh = _bn_fold(p["bn"], 1e-5)
    # weff[k, c, m] = sc[m] * sum_n w_time[n,k] * w_spat[m,n,c]
    weff = jnp.einsum("nk,mnc->kcm", p["w_time"], p["w_spat"]) * sc[None, None, :]
    beff = jnp.einsum("n,mnc->m", p["b_time"], p["w_spat"])
    bias = sc * beff + sh                                      # (NF,)
    s_slab = jnp.concatenate([weff.reshape(KS * C, NF), bias.reshape(1, NF)], axis=0)
    wc = jnp.transpose(p["w_cls"], (2, 1, 0)).reshape(Pt * NF, n_class)
    bc = p["b_cls"].reshape(1, n_class)
    return s_slab, wc, bc


def make_pool_mats(B, T):
    """Block-diagonal pooling / padding matrices (batch-stacked)."""
    W1, W2, LP, W3, W4 = eegnet_dims(T)
    Tt, Pt = shallow_dims(T)
    p1 = np.zeros((B * LP + KD - 1, B * W1), np.float32)       # pool_1 + zero-pad rows
    for b in range(B):
        for o in range(W2):
            p1[b * LP + PAD_D + o,
               b * W1 + o * POOL1: b * W1 + o * POOL1 + POOL1] = 1.0 / POOL1
    p2 = np.zeros((W4 * B, B * LP), np.float32)                # pool_2, w4-major order
    for b in range(B):
        for o in range(W4):
            p2[o * B + b,
               b * LP + o * POOL2: b * LP + o * POOL2 + POOL2] = 1.0 / POOL2
    sp = np.zeros((Pt * B, B * Tt), np.float32)                # shallow pool, pt-major
    for b in range(B):
        for o in range(Pt):
            sp[o * B + b,
               b * Tt + o * SSTRIDE: b * Tt + o * SSTRIDE + SPOOL] = 1.0 / SPOOL
    return jnp.asarray(p1), jnp.asarray(p2), jnp.asarray(sp)


# --------------- unfolded layer-by-layer references (validation) -------------

def _bn_apply(x, bn, eps, axis):
    gamma, beta, mean, var = bn
    shape = [1] * x.ndim
    shape[axis] = -1
    return ((x - mean.reshape(shape)) / jnp.sqrt(var.reshape(shape) + eps)
            * gamma.reshape(shape) + beta.reshape(shape))


def reference_eegnet(x, p, n_class):
    """EEGNetv4 forward (eval mode), layer by layer, from UNFOLDED params."""
    B, C, T = x.shape
    W1, W2, LP, W3, W4 = eegnet_dims(T)
    xp = jnp.pad(x, ((0, 0), (0, 0), (PAD_T, PAD_T)))               # (B,C,T+64)
    idx = np.arange(W1)[:, None] + np.arange(KT)[None, :]
    xw = xp[:, :, idx]                                              # (B,C,W1,KT)
    y = jnp.einsum("bcwk,fk->bfcw", xw, p["w_t"])                   # conv_temporal
    y = _bn_apply(y, p["bn_t"], 1e-3, 1)                            # bnorm_temporal
    f_of_ch = np.arange(CH) // D_MULT
    y = jnp.einsum("bhcw,hc->bhw", y[:, f_of_ch, :, :], p["w_sp"])  # conv_spatial (grouped)
    y = _bn_apply(y, p["bn_1"], 1e-3, 1)                            # bnorm_1
    y = jnp.where(y > 0, y, jnp.exp(jnp.minimum(y, 0.0)) - 1.0)     # ELU
    y = y[:, :, :W2 * POOL1].reshape(B, CH, W2, POOL1).mean(-1)     # pool_1
    yp = jnp.pad(y, ((0, 0), (0, 0), (PAD_D, PAD_D)))
    idx2 = np.arange(W3)[:, None] + np.arange(KD)[None, :]
    yw = yp[:, :, idx2]                                             # (B,CH,W3,KD)
    y = jnp.einsum("bhtk,hk->bht", yw, p["w_dep"])                  # separable depth
    y = jnp.einsum("bht,fh->bft", y, p["w_pt"])                     # separable point
    y = _bn_apply(y, p["bn_2"], 1e-3, 1)                            # bnorm_2
    y = jnp.where(y > 0, y, jnp.exp(jnp.minimum(y, 0.0)) - 1.0)     # ELU
    y = y[:, :, :W4 * POOL2].reshape(B, F2, W4, POOL2).mean(-1)     # pool_2
    logits = jnp.einsum("bfw,nfw->bn", y, p["w_cls"]) + p["b_cls"][None, :]
    return jax.nn.log_softmax(logits, axis=-1)


def reference_shallow(x, p, n_class):
    """ShallowFBCSPNet forward (eval mode), layer by layer, from UNFOLDED params."""
    B, C, T = x.shape
    Tt, Pt = shallow_dims(T)
    idx = np.arange(Tt)[:, None] + np.arange(KS)[None, :]
    xw = x[:, :, idx]                                               # (B,C,Tt,KS)
    y = (jnp.einsum("bctk,nk->bntc", xw, p["w_time"])               # conv_time (+bias)
         + p["b_time"][None, :, None, None])
    y = jnp.einsum("bntc,mnc->bmt", y, p["w_spat"])                 # conv_spat (no bias)
    y = _bn_apply(y, p["bn"], 1e-5, 1)                              # bnorm
    y = y * y                                                       # square
    idxp = np.arange(Pt)[:, None] * SSTRIDE + np.arange(SPOOL)[None, :]
    y = y[:, :, idxp].mean(-1)                                      # avg pool (75, 15)
    y = jnp.log(jnp.maximum(y, 1e-6))                               # safe_log
    logits = jnp.einsum("bmp,nmp->bn", y, p["w_cls"]) + p["b_cls"][None, :]
    return jax.nn.log_softmax(logits, axis=-1)


# ----------------------------------- main ------------------------------------

if __name__ == "__main__":
    key = jax.random.PRNGKey(0)
    n_branch = 2
    B, C_in, T = 2, 4, 144          # small synthetic EEG: (batch, eeg_channels, time)
    n_class = 4
    final_conv_length = 4           # == pooled length Pt for these shapes

    Tt, Pt = shallow_dims(T)
    # TODO(synk): cropped decoding (final_conv_length < pooled length) not implemented.
    assert Pt == final_conv_length, (Pt, final_conv_length)

    k_x, k_p = jax.random.split(key)
    x = jax.random.normal(k_x, (B, C_in, T), dtype=jnp.float32)

    keys = jax.random.split(k_p, 2 * n_branch)
    eeg_raw = [init_eegnet_raw(keys[2 * i], C_in, n_class, T) for i in range(n_branch)]
    sh_raw = [init_shallow_raw(keys[2 * i + 1], C_in, n_class, T) for i in range(n_branch)]

    e_slabs, s_slabs, c_slabs = [], [], []
    for i in range(n_branch):
        e_slab, e_wc, e_bc = fold_eegnet(eeg_raw[i], C_in, T, n_class)
        s_slab, s_wc, s_bc = fold_shallow(sh_raw[i], C_in, T, n_class)
        e_slabs.append(e_slab)
        s_slabs.append(s_slab)
        c_slabs.append(jnp.concatenate([e_wc, s_wc, e_bc, s_bc], axis=0))

    p1, p2, sp = make_pool_mats(B, T)
    params = {
        "e_slab": jnp.stack(e_slabs, axis=0),    # (n_branch, 290, 16)
        "s_slab": jnp.stack(s_slabs, axis=0),    # (n_branch, 101, 40)
        "c_slab": jnp.stack(c_slabs, axis=0),    # (n_branch, 226, n_class)
        "p1": p1, "p2": p2, "sp": sp,
    }

    forward = make_branch_forward(n_branch, B, C_in, T, n_class)
    outs = forward(x, params)
    outs = jax.block_until_ready(outs)

    assert len(outs) == 2 * n_branch
    for o in outs:
        assert o.shape == (B, n_class)
        assert bool(jnp.all(jnp.isfinite(o)))
        # log-softmax rows sum to 1 in probability space
        assert bool(jnp.allclose(jnp.sum(jnp.exp(o), axis=-1), 1.0, atol=1e-4))

    # Non-circular validation: compare against the UNFOLDED layer-by-layer
    # references (this also checks the BN/conv folding and channel mapping).
    for i in range(n_branch):
        ref_e = reference_eegnet(x, eeg_raw[i], n_class)
        ref_s = reference_shallow(x, sh_raw[i], n_class)
        err_e = float(jnp.max(jnp.abs(outs[2 * i] - ref_e)))
        err_s = float(jnp.max(jnp.abs(outs[2 * i + 1] - ref_s)))
        assert bool(jnp.allclose(outs[2 * i], ref_e, atol=1e-3, rtol=1e-3)), err_e
        assert bool(jnp.allclose(outs[2 * i + 1], ref_s, atol=1e-3, rtol=1e-3)), err_s

    print("KERNEL_OK")
</pallas_src>

<mosaic_0001>
module attributes {stable_mosaic.version = 11 : i64} {
  func.func @_branch_kernel(%arg0: i32, %arg1: memref<290x256xf32, #tpu.memory_space<vmem>>, %arg2: memref<240x100xf32, #tpu.memory_space<vmem>>, %arg3: memref<119x290xf32, #tpu.memory_space<vmem>>, %arg4: memref<8x104xf32, #tpu.memory_space<vmem>>, %arg5: memref<8x240xf32, #tpu.memory_space<vmem>>, %arg6: memref<1x290x16xf32, #tpu.memory_space<vmem>>, %arg7: memref<1x101x40xf32, #tpu.memory_space<vmem>>, %arg8: memref<1x226x4xf32, #tpu.memory_space<vmem>>, %arg9: memref<1x2x8xf32, #tpu.memory_space<vmem>>) attributes {dimension_semantics = [#tpu.dimension_semantics<parallel>], iteration_bounds = array<i64: 2>, scalar_prefetch = 0 : i64, scratch_operands = 0 : i64, tpu.core_type = #tpu.core_type<tc>, window_params = [{pipeline_mode = #tpu.pipeline_mode<synchronous>, transform_indices = @transform_0, window_bounds = array<i64: 290, 256>}, {pipeline_mode = #tpu.pipeline_mode<synchronous>, transform_indices = @transform_1, window_bounds = array<i64: 240, 100>}, {pipeline_mode = #tpu.pipeline_mode<synchronous>, transform_indices = @transform_2, window_bounds = array<i64: 119, 290>}, {pipeline_mode = #tpu.pipeline_mode<synchronous>, transform_indices = @transform_3, window_bounds = array<i64: 8, 104>}, {pipeline_mode = #tpu.pipeline_mode<synchronous>, transform_indices = @transform_4, window_bounds = array<i64: 8, 240>}, {transform_indices = @transform_5, window_bounds = array<i64: 1, 290, 16>}, {transform_indices = @transform_6, window_bounds = array<i64: 1, 101, 40>}, {transform_indices = @transform_7, window_bounds = array<i64: 1, 226, 4>}, {transform_indices = @transform_8, window_bounds = array<i64: 1, 2, 8>}]} {
    %c0 = arith.constant 0 : index
    %c0_0 = arith.constant 0 : index
    %0 = vector.load %arg1[%c0, %c0_0] : memref<290x256xf32, #tpu.memory_space<vmem>>, vector<290x256xf32>
    %c0_1 = arith.constant 0 : index
    %c0_2 = arith.constant 0 : index
    %c0_3 = arith.constant 0 : index
    %1 = vector.load %arg6[%c0_1, %c0_2, %c0_3] : memref<1x290x16xf32, #tpu.memory_space<vmem>>, vector<1x256x16xf32>
    %2 = vector.shape_cast %1 : vector<1x256x16xf32> to vector<256x16xf32>
    %cst = arith.constant dense<0.000000e+00> : vector<290x16xf32>
    %3 = tpu.matmul %0, %2, %cst {dimension_numbers = #tpu.dot_dimension_numbers<[1], [0], [0], [1], [0, 0, 1, 1], [], []>} : vector<290x256xf32>, vector<256x16xf32>, vector<290x16xf32> -> vector<290x16xf32>
    %c0_4 = arith.constant 0 : index
    %c288 = arith.constant 288 : index
    %c0_5 = arith.constant 0 : index
    %4 = vector.load %arg6[%c0_4, %c288, %c0_5] : memref<1x290x16xf32, #tpu.memory_space<vmem>>, vector<1x1x16xf32>
    %5 = vector.shape_cast %4 : vector<1x1x16xf32> to vector<1x16xf32>
    %6 = vector.broadcast %5 : vector<1x16xf32> to vector<290x16xf32>
    %7 = arith.addf %3, %6 : vector<290x16xf32>
    %cst_6 = arith.constant 0.000000e+00 : f32
    %8 = vector.broadcast %cst_6 : f32 to vector<290x16xf32>
    %9 = arith.cmpf ogt, %7, %8 : vector<290x16xf32>
    %cst_7 = arith.constant 0.000000e+00 : f32
    %10 = vector.broadcast %cst_7 : f32 to vector<290x16xf32>
    %11 = arith.minimumf %7, %10 : vector<290x16xf32>
    %12 = math.exp %11 : vector<290x16xf32>
    %cst_8 = arith.constant 1.000000e+00 : f32
    %13 = vector.broadcast %cst_8 : f32 to vector<290x16xf32>
    %14 = arith.subf %12, %13 : vector<290x16xf32>
    %15 = arith.select %9, %7, %14 : vector<290x16xi1>, vector<290x16xf32>
    %c0_9 = arith.constant 0 : index
    %c0_10 = arith.constant 0 : index
    %16 = vector.load %arg3[%c0_9, %c0_10] : memref<119x290xf32, #tpu.memory_space<vmem>>, vector<119x290xf32>
    %cst_11 = arith.constant dense<0.000000e+00> : vector<119x16xf32>
    %17 = tpu.matmul %16, %15, %cst_11 {dimension_numbers = #tpu.dot_dimension_numbers<[1], [0], [0], [1], [0, 0, 1, 1], [], []>} : vector<119x290xf32>, vector<290x16xf32>, vector<119x16xf32> -> vector<119x16xf32>
    %c0_12 = arith.constant 0 : index
    %c256 = arith.constant 256 : index
    %c0_13 = arith.constant 0 : index
    %18 = vector.load %arg6[%c0_12, %c256, %c0_13] : memref<1x290x16xf32, #tpu.memory_space<vmem>>, vector<1x16x16xf32>
    %19 = vector.shape_cast %18 : vector<1x16x16xf32> to vector<16x16xf32>
    %cst_14 = arith.constant 0.000000e+00 : f32
    %20 = vector.broadcast %cst_14 : f32 to vector<104x16xf32>
    %21 = vector.extract_strided_slice %17 {offsets = [0, 0], sizes = [104, 16], strides = [1, 1]} : vector<119x16xf32> to vector<104x16xf32>
    %22 = vector.extract_strided_slice %19 {offsets = [0, 0], sizes = [1, 16], strides = [1, 1]} : vector<16x16xf32> to vector<1x16xf32>
    %23 = vector.broadcast %22 : vector<1x16xf32> to vector<104x16xf32>
    %24 = arith.mulf %21, %23 : vector<104x16xf32>
    %25 = arith.addf %20, %24 : vector<104x16xf32>
    %26 = vector.extract_strided_slice %17 {offsets = [1, 0], sizes = [104, 16], strides = [1, 1]} : vector<119x16xf32> to vector<104x16xf32>
    %27 = vector.extract_strided_slice %19 {offsets = [1, 0], sizes = [1, 16], strides = [1, 1]} : vector<16x16xf32> to vector<1x16xf32>
    %28 = vector.broadcast %27 : vector<1x16xf32> to vector<104x16xf32>
    %29 = arith.mulf %26, %28 : vector<104x16xf32>
    %30 = arith.addf %25, %29 : vector<104x16xf32>
    %31 = vector.extract_strided_slice %17 {offsets = [2, 0], sizes = [104, 16], strides = [1, 1]} : vector<119x16xf32> to vector<104x16xf32>
    %32 = vector.extract_strided_slice %19 {offsets = [2, 0], sizes = [1, 16], strides = [1, 1]} : vector<16x16xf32> to vector<1x16xf32>
    %33 = vector.broadcast %32 : vector<1x16xf32> to vector<104x16xf32>
    %34 = arith.mulf %31, %33 : vector<104x16xf32>
    %35 = arith.addf %30, %34 : vector<104x16xf32>
    %36 = vector.extract_strided_slice %17 {offsets = [3, 0], sizes = [104, 16], strides = [1, 1]} : vector<119x16xf32> to vector<104x16xf32>
    %37 = vector.extract_strided_slice %19 {offsets = [3, 0], sizes = [1, 16], strides = [1, 1]} : vector<16x16xf32> to vector<1x16xf32>
    %38 = vector.broadcast %37 : vector<1x16xf32> to vector<104x16xf32>
    %39 = arith.mulf %36, %38 : vector<104x16xf32>
    %40 = arith.addf %35, %39 : vector<104x16xf32>
    %41 = vector.extract_strided_slice %17 {offsets = [4, 0], sizes = [104, 16], strides = [1, 1]} : vector<119x16xf32> to vector<104x16xf32>
    %42 = vector.extract_strided_slice %19 {offsets = [4, 0], sizes = [1, 16], strides = [1, 1]} : vector<16x16xf32> to vector<1x16xf32>
    %43 = vector.broadcast %42 : vector<1x16xf32> to vector<104x16xf32>
    %44 = arith.mulf %41, %43 : vector<104x16xf32>
    %45 = arith.addf %40, %44 : vector<104x16xf32>
    %46 = vector.extract_strided_slice %17 {offsets = [5, 0], sizes = [104, 16], strides = [1, 1]} : vector<119x16xf32> to vector<104x16xf32>
    %47 = vector.extract_strided_slice %19 {offsets = [5, 0], sizes = [1, 16], strides = [1, 1]} : vector<16x16xf32> to vector<1x16xf32>
    %48 = vector.broadcast %47 : vector<1x16xf32> to vector<104x16xf32>
    %49 = arith.mulf %46, %48 : vector<104x16xf32>
    %50 = arith.addf %45, %49 : vector<104x16xf32>
    %51 = vector.extract_strided_slice %17 {offsets = [6, 0], sizes = [104, 16], strides = [1, 1]} : vector<119x16xf32> to vector<104x16xf32>
    %52 = vector.extract_strided_slice %19 {offsets = [6, 0], sizes = [1, 16], strides = [1, 1]} : vector<16x16xf32> to vector<1x16xf32>
    %53 = vector.broadcast %52 : vector<1x16xf32> to vector<104x16xf32>
    %54 = arith.mulf %51, %53 : vector<104x16xf32>
    %55 = arith.addf %50, %54 : vector<104x16xf32>
    %56 = vector.extract_strided_slice %17 {offsets = [7, 0], sizes = [104, 16], strides = [1, 1]} : vector<119x16xf32> to vector<104x16xf32>
    %57 = vector.extract_strided_slice %19 {offsets = [7, 0], sizes = [1, 16], strides = [1, 1]} : vector<16x16xf32> to vector<1x16xf32>
    %58 = vector.broadcast %57 : vector<1x16xf32> to vector<104x16xf32>
    %59 = arith.mulf %56, %58 : vector<104x16xf32>
    %60 = arith.addf %55, %59 : vector<104x16xf32>
    %61 = vector.extract_strided_slice %17 {offsets = [8, 0], sizes = [104, 16], strides = [1, 1]} : vector<119x16xf32> to vector<104x16xf32>
    %62 = vector.extract_strided_slice %19 {offsets = [8, 0], sizes = [1, 16], strides = [1, 1]} : vector<16x16xf32> to vector<1x16xf32>
    %63 = vector.broadcast %62 : vector<1x16xf32> to vector<104x16xf32>
    %64 = arith.mulf %61, %63 : vector<104x16xf32>
    %65 = arith.addf %60, %64 : vector<104x16xf32>
    %66 = vector.extract_strided_slice %17 {offsets = [9, 0], sizes = [104, 16], strides = [1, 1]} : vector<119x16xf32> to vector<104x16xf32>
    %67 = vector.extract_strided_slice %19 {offsets = [9, 0], sizes = [1, 16], strides = [1, 1]} : vector<16x16xf32> to vector<1x16xf32>
    %68 = vector.broadcast %67 : vector<1x16xf32> to vector<104x16xf32>
    %69 = arith.mulf %66, %68 : vector<104x16xf32>
    %70 = arith.addf %65, %69 : vector<104x16xf32>
    %71 = vector.extract_strided_slice %17 {offsets = [10, 0], sizes = [104, 16], strides = [1, 1]} : vector<119x16xf32> to vector<104x16xf32>
    %72 = vector.extract_strided_slice %19 {offsets = [10, 0], sizes = [1, 16], strides = [1, 1]} : vector<16x16xf32> to vector<1x16xf32>
    %73 = vector.broadcast %72 : vector<1x16xf32> to vector<104x16xf32>
    %74 = arith.mulf %71, %73 : vector<104x16xf32>
    %75 = arith.addf %70, %74 : vector<104x16xf32>
    %76 = vector.extract_strided_slice %17 {offsets = [11, 0], sizes = [104, 16], strides = [1, 1]} : vector<119x16xf32> to vector<104x16xf32>
    %77 = vector.extract_strided_slice %19 {offsets = [11, 0], sizes = [1, 16], strides = [1, 1]} : vector<16x16xf32> to vector<1x16xf32>
    %78 = vector.broadcast %77 : vector<1x16xf32> to vector<104x16xf32>
    %79 = arith.mulf %76, %78 : vector<104x16xf32>
    %80 = arith.addf %75, %79 : vector<104x16xf32>
    %81 = vector.extract_strided_slice %17 {offsets = [12, 0], sizes = [104, 16], strides = [1, 1]} : vector<119x16xf32> to vector<104x16xf32>
    %82 = vector.extract_strided_slice %19 {offsets = [12, 0], sizes = [1, 16], strides = [1, 1]} : vector<16x16xf32> to vector<1x16xf32>
    %83 = vector.broadcast %82 : vector<1x16xf32> to vector<104x16xf32>
    %84 = arith.mulf %81, %83 : vector<104x16xf32>
    %85 = arith.addf %80, %84 : vector<104x16xf32>
    %86 = vector.extract_strided_slice %17 {offsets = [13, 0], sizes = [104, 16], strides = [1, 1]} : vector<119x16xf32> to vector<104x16xf32>
    %87 = vector.extract_strided_slice %19 {offsets = [13, 0], sizes = [1, 16], strides = [1, 1]} : vector<16x16xf32> to vector<1x16xf32>
    %88 = vector.broadcast %87 : vector<1x16xf32> to vector<104x16xf32>
    %89 = arith.mulf %86, %88 : vector<104x16xf32>
    %90 = arith.addf %85, %89 : vector<104x16xf32>
    %91 = vector.extract_strided_slice %17 {offsets = [14, 0], sizes = [104, 16], strides = [1, 1]} : vector<119x16xf32> to vector<104x16xf32>
    %92 = vector.extract_strided_slice %19 {offsets = [14, 0], sizes = [1, 16], strides = [1, 1]} : vector<16x16xf32> to vector<1x16xf32>
    %93 = vector.broadcast %92 : vector<1x16xf32> to vector<104x16xf32>
    %94 = arith.mulf %91, %93 : vector<104x16xf32>
    %95 = arith.addf %90, %94 : vector<104x16xf32>
    %96 = vector.extract_strided_slice %17 {offsets = [15, 0], sizes = [104, 16], strides = [1, 1]} : vector<119x16xf32> to vector<104x16xf32>
    %97 = vector.extract_strided_slice %19 {offsets = [15, 0], sizes = [1, 16], strides = [1, 1]} : vector<16x16xf32> to vector<1x16xf32>
    %98 = vector.broadcast %97 : vector<1x16xf32> to vector<104x16xf32>
    %99 = arith.mulf %96, %98 : vector<104x16xf32>
    %100 = arith.addf %95, %99 : vector<104x16xf32>
    %c0_15 = arith.constant 0 : index
    %c272 = arith.constant 272 : index
    %c0_16 = arith.constant 0 : index
    %101 = vector.load %arg6[%c0_15, %c272, %c0_16] : memref<1x290x16xf32, #tpu.memory_space<vmem>>, vector<1x16x16xf32>
    %102 = vector.shape_cast %101 : vector<1x16x16xf32> to vector<16x16xf32>
    %cst_17 = arith.constant dense<0.000000e+00> : vector<104x16xf32>
    %103 = tpu.matmul %100, %102, %cst_17 {dimension_numbers = #tpu.dot_dimension_numbers<[1], [0], [0], [1], [0, 0, 1, 1], [], []>} : vector<104x16xf32>, vector<16x16xf32>, vector<104x16xf32> -> vector<104x16xf32>
    %c0_18 = arith.constant 0 : index
    %c289 = arith.constant 289 : index
    %c0_19 = arith.constant 0 : index
    %104 = vector.load %arg6[%c0_18, %c289, %c0_19] : memref<1x290x16xf32, #tpu.memory_space<vmem>>, vector<1x1x16xf32>
    %105 = vector.shape_cast %104 : vector<1x1x16xf32> to vector<1x16xf32>
    %106 = vector.broadcast %105 : vector<1x16xf32> to vector<104x16xf32>
    %107 = arith.addf %103, %106 : vector<104x16xf32>
    %cst_20 = arith.constant 0.000000e+00 : f32
    %108 = vector.broadcast %cst_20 : f32 to vector<104x16xf32>
    %109 = arith.cmpf ogt, %107, %108 : vector<104x16xf32>
    %cst_21 = arith.constant 0.000000e+00 : f32
    %110 = vector.broadcast %cst_21 : f32 to vector<104x16xf32>
    %111 = arith.minimumf %107, %110 : vector<104x16xf32>
    %112 = math.exp %111 : vector<104x16xf32>
    %cst_22 = arith.constant 1.000000e+00 : f32
    %113 = vector.broadcast %cst_22 : f32 to vector<104x16xf32>
    %114 = arith.subf %112, %113 : vector<104x16xf32>
    %115 = arith.select %109, %107, %114 : vector<104x16xi1>, vector<104x16xf32>
    %c0_23 = arith.constant 0 : index
    %c0_24 = arith.constant 0 : index
    %116 = vector.load %arg4[%c0_23, %c0_24] : memref<8x104xf32, #tpu.memory_space<vmem>>, vector<8x104xf32>
    %cst_25 = arith.constant dense<0.000000e+00> : vector<8x16xf32>
    %117 = tpu.matmul %116, %115, %cst_25 {dimension_numbers = #tpu.dot_dimension_numbers<[1], [0], [0], [1], [0, 0, 1, 1], [], []>} : vector<8x104xf32>, vector<104x16xf32>, vector<8x16xf32> -> vector<8x16xf32>
    %cst_26 = arith.constant 0.000000e+00 : f32
    %118 = vector.broadcast %cst_26 : f32 to vector<2x4xf32>
    %c0_27 = arith.constant 0 : index
    %c224 = arith.constant 224 : index
    %c0_28 = arith.constant 0 : index
    %119 = vector.load %arg8[%c0_27, %c224, %c0_28] : memref<1x226x4xf32, #tpu.memory_space<vmem>>, vector<1x1x4xf32>
    %120 = vector.shape_cast %119 : vector<1x1x4xf32> to vector<1x4xf32>
    %121 = vector.broadcast %120 : vector<1x4xf32> to vector<2x4xf32>
    %122 = arith.addf %118, %121 : vector<2x4xf32>
    %123 = vector.extract_strided_slice %117 {offsets = [0, 0], sizes = [2, 16], strides = [1, 1]} : vector<8x16xf32> to vector<2x16xf32>
    %c0_29 = arith.constant 0 : index
    %c0_30 = arith.constant 0 : index
    %c0_31 = arith.constant 0 : index
    %124 = vector.load %arg8[%c0_29, %c0_30, %c0_31] : memref<1x226x4xf32, #tpu.memory_space<vmem>>, vector<1x16x4xf32>
    %125 = vector.shape_cast %124 : vector<1x16x4xf32> to vector<16x4xf32>
    %cst_32 = arith.constant dense<0.000000e+00> : vector<2x4xf32>
    %126 = tpu.matmul %123, %125, %cst_32 {dimension_numbers = #tpu.dot_dimension_numbers<[1], [0], [0], [1], [0, 0, 1, 1], [], []>} : vector<2x16xf32>, vector<16x4xf32>, vector<2x4xf32> -> vector<2x4xf32>
    %127 = arith.addf %122, %126 : vector<2x4xf32>
    %128 = vector.extract_strided_slice %117 {offsets = [2, 0], sizes = [2, 16], strides = [1, 1]} : vector<8x16xf32> to vector<2x16xf32>
    %c0_33 = arith.constant 0 : index
    %c16 = arith.constant 16 : index
    %c0_34 = arith.constant 0 : index
    %129 = vector.load %arg8[%c0_33, %c16, %c0_34] : memref<1x226x4xf32, #tpu.memory_space<vmem>>, vector<1x16x4xf32>
    %130 = vector.shape_cast %129 : vector<1x16x4xf32> to vector<16x4xf32>
    %cst_35 = arith.constant dense<0.000000e+00> : vector<2x4xf32>
    %131 = tpu.matmul %128, %130, %cst_35 {dimension_numbers = #tpu.dot_dimension_numbers<[1], [0], [0], [1], [0, 0, 1, 1], [], []>} : vector<2x16xf32>, vector<16x4xf32>, vector<2x4xf32> -> vector<2x4xf32>
    %132 = arith.addf %127, %131 : vector<2x4xf32>
    %133 = vector.extract_strided_slice %117 {offsets = [4, 0], sizes = [2, 16], strides = [1, 1]} : vector<8x16xf32> to vector<2x16xf32>
    %c0_36 = arith.constant 0 : index
    %c32 = arith.constant 32 : index
    %c0_37 = arith.constant 0 : index
    %134 = vector.load %arg8[%c0_36, %c32, %c0_37] : memref<1x226x4xf32, #tpu.memory_space<vmem>>, vector<1x16x4xf32>
    %135 = vector.shape_cast %134 : vector<1x16x4xf32> to vector<16x4xf32>
    %cst_38 = arith.constant dense<0.000000e+00> : vector<2x4xf32>
    %136 = tpu.matmul %133, %135, %cst_38 {dimension_numbers = #tpu.dot_dimension_numbers<[1], [0], [0], [1], [0, 0, 1, 1], [], []>} : vector<2x16xf32>, vector<16x4xf32>, vector<2x4xf32> -> vector<2x4xf32>
    %137 = arith.addf %132, %136 : vector<2x4xf32>
    %138 = vector.extract_strided_slice %117 {offsets = [6, 0], sizes = [2, 16], strides = [1, 1]} : vector<8x16xf32> to vector<2x16xf32>
    %c0_39 = arith.constant 0 : index
    %c48 = arith.constant 48 : index
    %c0_40 = arith.constant 0 : index
    %139 = vector.load %arg8[%c0_39, %c48, %c0_40] : memref<1x226x4xf32, #tpu.memory_space<vmem>>, vector<1x16x4xf32>
    %140 = vector.shape_cast %139 : vector<1x16x4xf32> to vector<16x4xf32>
    %cst_41 = arith.constant dense<0.000000e+00> : vector<2x4xf32>
    %141 = tpu.matmul %138, %140, %cst_41 {dimension_numbers = #tpu.dot_dimension_numbers<[1], [0], [0], [1], [0, 0, 1, 1], [], []>} : vector<2x16xf32>, vector<16x4xf32>, vector<2x4xf32> -> vector<2x4xf32>
    %142 = arith.addf %137, %141 : vector<2x4xf32>
    %cst_42 = arith.constant dense<0xFF800000> : vector<2xf32>
    %143 = vector.multi_reduction <maximumf>, %142, %cst_42 [1] : vector<2x4xf32> to vector<2xf32>
    %144 = vector.shape_cast %143 : vector<2xf32> to vector<2x1xf32>
    %145 = vector.broadcast %144 : vector<2x1xf32> to vector<2x4xf32>
    %146 = arith.subf %142, %145 : vector<2x4xf32>
    %147 = math.exp %146 : vector<2x4xf32>
    %cst_43 = arith.constant dense<0.000000e+00> : vector<2xf32>
    %148 = vector.multi_reduction <add>, %147, %cst_43 [1] : vector<2x4xf32> to vector<2xf32>
    %149 = vector.shape_cast %148 : vector<2xf32> to vector<2x1xf32>
    %150 = math.log %149 : vector<2x1xf32>
    %151 = vector.broadcast %150 : vector<2x1xf32> to vector<2x4xf32>
    %152 = arith.subf %146, %151 : vector<2x4xf32>
    %c0_44 = arith.constant 0 : index
    %c0_45 = arith.constant 0 : index
    %153 = vector.load %arg2[%c0_44, %c0_45] : memref<240x100xf32, #tpu.memory_space<vmem>>, vector<240x100xf32>
    %c0_46 = arith.constant 0 : index
    %c0_47 = arith.constant 0 : index
    %c0_48 = arith.constant 0 : index
    %154 = vector.load %arg7[%c0_46, %c0_47, %c0_48] : memref<1x101x40xf32, #tpu.memory_space<vmem>>, vector<1x100x40xf32>
    %155 = vector.shape_cast %154 : vector<1x100x40xf32> to vector<100x40xf32>
    %cst_49 = arith.constant dense<0.000000e+00> : vector<240x40xf32>
    %156 = tpu.matmul %153, %155, %cst_49 {dimension_numbers = #tpu.dot_dimension_numbers<[1], [0], [0], [1], [0, 0, 1, 1], [], []>} : vector<240x100xf32>, vector<100x40xf32>, vector<240x40xf32> -> vector<240x40xf32>
    %c0_50 = arith.constant 0 : index
    %c100 = arith.constant 100 : index
    %c0_51 = arith.constant 0 : index
    %157 = vector.load %arg7[%c0_50, %c100, %c0_51] : memref<1x101x40xf32, #tpu.memory_space<vmem>>, vector<1x1x40xf32>
    %158 = vector.shape_cast %157 : vector<1x1x40xf32> to vector<1x40xf32>
    %159 = vector.broadcast %158 : vector<1x40xf32> to vector<240x40xf32>
    %160 = arith.addf %156, %159 : vector<240x40xf32>
    %161 = arith.mulf %160, %160 : vector<240x40xf32>
    %c0_52 = arith.constant 0 : index
    %c0_53 = arith.constant 0 : index
    %162 = vector.load %arg5[%c0_52, %c0_53] : memref<8x240xf32, #tpu.memory_space<vmem>>, vector<8x240xf32>
    %cst_54 = arith.constant dense<0.000000e+00> : vector<8x40xf32>
    %163 = tpu.matmul %162, %161, %cst_54 {dimension_numbers = #tpu.dot_dimension_numbers<[1], [0], [0], [1], [0, 0, 1, 1], [], []>} : vector<8x240xf32>, vector<240x40xf32>, vector<8x40xf32> -> vector<8x40xf32>
    %cst_55 = arith.constant 9.99999997E-7 : f32
    %164 = vector.broadcast %cst_55 : f32 to vector<8x40xf32>
    %165 = arith.maximumf %163, %164 : vector<8x40xf32>
    %166 = math.log %165 : vector<8x40xf32>
    %cst_56 = arith.constant 0.000000e+00 : f32
    %167 = vector.broadcast %cst_56 : f32 to vector<2x4xf32>
    %c0_57 = arith.constant 0 : index
    %c225 = arith.constant 225 : index
    %c0_58 = arith.constant 0 : index
    %168 = vector.load %arg8[%c0_57, %c225, %c0_58] : memref<1x226x4xf32, #tpu.memory_space<vmem>>, vector<1x1x4xf32>
    %169 = vector.shape_cast %168 : vector<1x1x4xf32> to vector<1x4xf32>
    %170 = vector.broadcast %169 : vector<1x4xf32> to vector<2x4xf32>
    %171 = arith.addf %167, %170 : vector<2x4xf32>
    %172 = vector.extract_strided_slice %166 {offsets = [0, 0], sizes = [2, 40], strides = [1, 1]} : vector<8x40xf32> to vector<2x40xf32>
    %c0_59 = arith.constant 0 : index
    %c64 = arith.constant 64 : index
    %c0_60 = arith.constant 0 : index
    %173 = vector.load %arg8[%c0_59, %c64, %c0_60] : memref<1x226x4xf32, #tpu.memory_space<vmem>>, vector<1x40x4xf32>
    %174 = vector.shape_cast %173 : vector<1x40x4xf32> to vector<40x4xf32>
    %cst_61 = arith.constant dense<0.000000e+00> : vector<2x4xf32>
    %175 = tpu.matmul %172, %174, %cst_61 {dimension_numbers = #tpu.dot_dimension_numbers<[1], [0], [0], [1], [0, 0, 1, 1], [], []>} : vector<2x40xf32>, vector<40x4xf32>, vector<2x4xf32> -> vector<2x4xf32>
    %176 = arith.addf %171, %175 : vector<2x4xf32>
    %177 = vector.extract_strided_slice %166 {offsets = [2, 0], sizes = [2, 40], strides = [1, 1]} : vector<8x40xf32> to vector<2x40xf32>
    %c0_62 = arith.constant 0 : index
    %c104 = arith.constant 104 : index
    %c0_63 = arith.constant 0 : index
    %178 = vector.load %arg8[%c0_62, %c104, %c0_63] : memref<1x226x4xf32, #tpu.memory_space<vmem>>, vector<1x40x4xf32>
    %179 = vector.shape_cast %178 : vector<1x40x4xf32> to vector<40x4xf32>
    %cst_64 = arith.constant dense<0.000000e+00> : vector<2x4xf32>
    %180 = tpu.matmul %177, %179, %cst_64 {dimension_numbers = #tpu.dot_dimension_numbers<[1], [0], [0], [1], [0, 0, 1, 1], [], []>} : vector<2x40xf32>, vector<40x4xf32>, vector<2x4xf32> -> vector<2x4xf32>
    %181 = arith.addf %176, %180 : vector<2x4xf32>
    %182 = vector.extract_strided_slice %166 {offsets = [4, 0], sizes = [2, 40], strides = [1, 1]} : vector<8x40xf32> to vector<2x40xf32>
    %c0_65 = arith.constant 0 : index
    %c144 = arith.constant 144 : index
    %c0_66 = arith.constant 0 : index
    %183 = vector.load %arg8[%c0_65, %c144, %c0_66] : memref<1x226x4xf32, #tpu.memory_space<vmem>>, vector<1x40x4xf32>
    %184 = vector.shape_cast %183 : vector<1x40x4xf32> to vector<40x4xf32>
    %cst_67 = arith.constant dense<0.000000e+00> : vector<2x4xf32>
    %185 = tpu.matmul %182, %184, %cst_67 {dimension_numbers = #tpu.dot_dimension_numbers<[1], [0], [0], [1], [0, 0, 1, 1], [], []>} : vector<2x40xf32>, vector<40x4xf32>, vector<2x4xf32> -> vector<2x4xf32>
    %186 = arith.addf %181, %185 : vector<2x4xf32>
    %187 = vector.extract_strided_slice %166 {offsets = [6, 0], sizes = [2, 40], strides = [1, 1]} : vector<8x40xf32> to vector<2x40xf32>
    %c0_68 = arith.constant 0 : index
    %c184 = arith.constant 184 : index
    %c0_69 = arith.constant 0 : index
    %188 = vector.load %arg8[%c0_68, %c184, %c0_69] : memref<1x226x4xf32, #tpu.memory_space<vmem>>, vector<1x40x4xf32>
    %189 = vector.shape_cast %188 : vector<1x40x4xf32> to vector<40x4xf32>
    %cst_70 = arith.constant dense<0.000000e+00> : vector<2x4xf32>
    %190 = tpu.matmul %187, %189, %cst_70 {dimension_numbers = #tpu.dot_dimension_numbers<[1], [0], [0], [1], [0, 0, 1, 1], [], []>} : vector<2x40xf32>, vector<40x4xf32>, vector<2x4xf32> -> vector<2x4xf32>
    %191 = arith.addf %186, %190 : vector<2x4xf32>
    %cst_71 = arith.constant dense<0xFF800000> : vector<2xf32>
    %192 = vector.multi_reduction <maximumf>, %191, %cst_71 [1] : vector<2x4xf32> to vector<2xf32>
    %193 = vector.shape_cast %192 : vector<2xf32> to vector<2x1xf32>
    %194 = vector.broadcast %193 : vector<2x1xf32> to vector<2x4xf32>
    %195 = arith.subf %191, %194 : vector<2x4xf32>
    %196 = math.exp %195 : vector<2x4xf32>
    %cst_72 = arith.constant dense<0.000000e+00> : vector<2xf32>
    %197 = vector.multi_reduction <add>, %196, %cst_72 [1] : vector<2x4xf32> to vector<2xf32>
    %198 = vector.shape_cast %197 : vector<2xf32> to vector<2x1xf32>
    %199 = math.log %198 : vector<2x1xf32>
    %200 = vector.broadcast %199 : vector<2x1xf32> to vector<2x4xf32>
    %201 = arith.subf %195, %200 : vector<2x4xf32>
    %202 = tpu.concatenate %152, %201 in 1 : vector<2x4xf32>, vector<2x4xf32> -> vector<2x8xf32>
    %c0_73 = arith.constant 0 : index
    %c0_74 = arith.constant 0 : index
    %c0_75 = arith.constant 0 : index
    %203 = vector.load %arg9[%c0_73, %c0_74, %c0_75] : memref<1x2x8xf32, #tpu.memory_space<vmem>>, vector<1x2x8xf32>
    %204 = vector.shape_cast %203 : vector<1x2x8xf32> to vector<2x8xf32>
    %205 = vector.shape_cast %202 : vector<2x8xf32> to vector<1x2x8xf32>
    tpu.vector_store %arg9[%c0_73, %c0_74, %c0_75], %205 {strides = array<i32>} : memref<1x2x8xf32, #tpu.memory_space<vmem>>, vector<1x2x8xf32>,
    return
  }
  func.func @transform_0(%arg0: i32) -> (i32, i32) {
    %c0_i32 = arith.constant 0 : i32
    %c0_i32_0 = arith.constant 0 : i32
    %c0_i32_1 = arith.constant 0 : i32
    return %c0_i32, %c0_i32_0 : i32, i32
  }
  func.func @transform_1(%arg0: i32) -> (i32, i32) {
    %c0_i32 = arith.constant 0 : i32
    %c0_i32_0 = arith.constant 0 : i32
    %c0_i32_1 = arith.constant 0 : i32
    return %c0_i32, %c0_i32_0 : i32, i32
  }
  func.func @transform_2(%arg0: i32) -> (i32, i32) {
    %c0_i32 = arith.constant 0 : i32
    %c0_i32_0 = arith.constant 0 : i32
    %c0_i32_1 = arith.constant 0 : i32
    return %c0_i32, %c0_i32_0 : i32, i32
  }
  func.func @transform_3(%arg0: i32) -> (i32, i32) {
    %c0_i32 = arith.constant 0 : i32
    %c0_i32_0 = arith.constant 0 : i32
    %c0_i32_1 = arith.constant 0 : i32
    return %c0_i32, %c0_i32_0 : i32, i32
  }
  func.func @transform_4(%arg0: i32) -> (i32, i32) {
    %c0_i32 = arith.constant 0 : i32
    %c0_i32_0 = arith.constant 0 : i32
    %c0_i32_1 = arith.constant 0 : i32
    return %c0_i32, %c0_i32_0 : i32, i32
  }
  func.func @transform_5(%arg0: i32) -> (i32, i32, i32) {
    %c0_i32 = arith.constant 0 : i32
    %c0_i32_0 = arith.constant 0 : i32
    %c0_i32_1 = arith.constant 0 : i32
    return %arg0, %c0_i32, %c0_i32_0 : i32, i32, i32
  }
  func.func @transform_6(%arg0: i32) -> (i32, i32, i32) {
    %c0_i32 = arith.constant 0 : i32
    %c0_i32_0 = arith.constant 0 : i32
    %c0_i32_1 = arith.constant 0 : i32
    return %arg0, %c0_i32, %c0_i32_0 : i32, i32, i32
  }
  func.func @transform_7(%arg0: i32) -> (i32, i32, i32) {
    %c0_i32 = arith.constant 0 : i32
    %c0_i32_0 = arith.constant 0 : i32
    %c0_i32_1 = arith.constant 0 : i32
    return %arg0, %c0_i32, %c0_i32_0 : i32, i32, i32
  }
  func.func @transform_8(%arg0: i32) -> (i32, i32, i32) {
    %c0_i32 = arith.constant 0 : i32
    %c0_i32_0 = arith.constant 0 : i32
    %c0_i32_1 = arith.constant 0 : i32
    return %arg0, %c0_i32, %c0_i32_0 : i32, i32, i32
  }
}

</mosaic_0001>

<bundles_post_ra>
// kernel: forward.1
= control target key start
LH: loop header
LB: loop body
LE: loop exit
PB: predicated region body
PF: predicated region fallthrough
CT: control target
= control target key end

     0   :  { %s5126_s27 = smov 0   ;;  %s8098_s0 = inlined_call_operand.vmem [shape: f32[290,256], index: 0, kind: input, shape index: {}]   ;;  %s8099_s1 = inlined_call_operand.vmem [shape: f32[240,100], index: 1, kind: input, shape index: {}]   ;;  %s8100_s2 = inlined_call_operand.vmem [shape: f32[119,290], index: 2, kind: input, shape index: {}]   ;;  %s8101_s3 = inlined_call_operand.vmem [shape: f32[8,104], index: 3, kind: input, shape index: {}]   ;;  %s8102_s4 = inlined_call_operand.vmem [shape: f32[8,240], index: 4, kind: input, shape index: {}]   ;;  %s8103_s5 = inlined_call_operand.vmem [shape: f32[2,290,16], index: 5, kind: input, shape index: {}]   ;;  %s8104_s6 = inlined_call_operand.vmem [shape: f32[2,101,40], index: 6, kind: input, shape index: {}]   ;;  %s8105_s7 = inlined_call_operand.vmem [shape: f32[2,226,4], index: 7, kind: input, shape index: {}]   ;;  %s8106_s8 = inlined_call_operand.vmem [shape: f32[2,2,8], index: 8, kind: output, shape index: {}]  }
   0x1 LB: > { %s4099_s28 = sadd.s32 4294967295, %s5075_s27   ;;  %p4103_p0 = scmp.ge.s32.totalorder %s5075_s27, 1  ;;  %s5075_s27 = sphi %s5126_s27, %s18_s27  }
   0x2   : > { %p282_p1 = scmp.lt.s32.totalorder %s5075_s27, 3 }
   0x4   : > { %p283_p2 = pnand %p4103_p0, %p282_p1 }
   0x6   : > { %286 = sbr.rel (%p283_p2) target bundleno = 2129 (0x851), region = 52 }
   0xd   : > { %p325_p3 = scmp.lt.s32.totalorder %s4099_s28, 1  ;;  %v345_v0 = vld [vmem:[%s8098_s0 + $0x8] sm:$0xff]  ;;  %v8107_v1 = vmov 0.0|0.0   ;;  %v344_v50 = vld [vmem:[%s8098_s0] sm:$0xff]  ;;  %v347_v51 = vld [vmem:[%s8098_s0 + $0x18] sm:$0xff]  ;;  %s5080_s25 = smov 4  }
   0xe   : > { %4718 = vmatprep.subr.bf16.mxu0 %v8107_v1  ;;  %519 = vmatprep.mubr.f32.mxu0 %v345_v0  ;;  %v346_v52 = vld [vmem:[%s8098_s0 + $0x10] sm:$0xff]  ;;  %v349_v53 = vld [vmem:[%s8098_s0 + $0x28] sm:$0xff]  ;;  %v348_v54 = vld [vmem:[%s8098_s0 + $0x20] sm:$0xff] }
   0xf   : > { %s8410_s28 = smov (!%p325_p3, %s4099_s28), 1  ;;  %v351_v55 = vld [vmem:[%s8098_s0 + $0x38] sm:$0xff]  ;;  %v350_v56 = vld [vmem:[%s8098_s0 + $0x30] sm:$0xff]  ;;  %v353_v57 = vld [vmem:[%s8098_s0 + $0x48] sm:$0xff] }
  0x10   : > { %s4944_s9 = smul.u32 296, %s8410_s28  ;;  %v352_v58 = vld [vmem:[%s8098_s0 + $0x40] sm:$0xff]  ;;  %v355_v59 = vld [vmem:[%s8098_s0 + $0x58] sm:$0xff]  ;;  %v354_v60 = vld [vmem:[%s8098_s0 + $0x50] sm:$0xff]  ;;  %s4107_s26 = sshll.u32 %s8410_s28, 1 }
  0x11   : > { %v357_v61 = vld [vmem:[%s8098_s0 + $0x68] sm:$0xff]  ;;  %v356_v62 = vld [vmem:[%s8098_s0 + $0x60] sm:$0xff]  ;;  %v359_v63 = vld [vmem:[%s8098_s0 + $0x78] sm:$0xff]  ;;  %s4945_s30 = smul.u32 104, %s8410_s28 }
  0x12   : > { %s5144_s12 = scalar_lea.vmem %s8103_s5, %s4944_s9  ;;  %v358_v0 = vld [vmem:[%s8098_s0 + $0x70] sm:$0xff]  ;;  %s4946_s19 = smul.u32 232, %s8410_s28 }
  0x13   : > { %v418_v2 = vld [vmem:[%s5144_s12] sm:$0xff]  ;;  %v419_v3 = vld [vmem:[%s5144_s12 + $0x8] sm:$0xff]  ;;  %v420_v4 = vld [vmem:[%s5144_s12 + $0x10] sm:$0xff]  ;;  %s5561_s11 = scalar_lea.vmem %s8104_s6, %s4945_s30  ;;  %s343_s9 = scalar_lea.vmem %s8106_s8, %s4107_s26 }
  0x14   : > { %v4719_v5 = vpack.c.bf16 %v419_v3, %v418_v2  ;;  %v421_v6 = vld [vmem:[%s5144_s12 + $0x18] sm:$0xff]  ;;  %v422_v8 = vld [vmem:[%s5144_s12 + $0x20] sm:$0xff]  ;;  %v423_v9 = vld [vmem:[%s5144_s12 + $0x28] sm:$0xff]  ;;  %s8012_s22 = scalar_lea.vmem %s8105_s7, %s4946_s19 }
  0x15   : > { %v4722_v7 = vpack.c.bf16 %v421_v6, %v420_v4  ;;  %v4725_v10 = vpack.c.bf16 %v423_v9, %v422_v8  ;;  %v424_v11 = vld [vmem:[%s5144_s12 + $0x30] sm:$0xff]  ;;  %v425_v12 = vld [vmem:[%s5144_s12 + $0x38] sm:$0xff]  ;;  %v426_v14 = vld [vmem:[%s5144_s12 + $0x40] sm:$0xff] }
  0x16   : > { %4720 = vmatpush1.bf16.msra.mxu0 %v4719_v5  ;;  %v4728_v13 = vpack.c.bf16 %v425_v12, %v424_v11  ;;  %v427_v15 = vld [vmem:[%s5144_s12 + $0x48] sm:$0xff]  ;;  %v428_v17 = vld [vmem:[%s5144_s12 + $0x50] sm:$0xff]  ;;  %v429_v18 = vld [vmem:[%s5144_s12 + $0x58] sm:$0xff] }
  0x17   : > { %4721 = vmatprep.subr.bf16.mxu0 %v8107_v1  ;;  %v4731_v16 = vpack.c.bf16 %v427_v15, %v426_v14  ;;  %v4734_v19 = vpack.c.bf16 %v429_v18, %v428_v17  ;;  %v430_v20 = vld [vmem:[%s5144_s12 + $0x60] sm:$0xff]  ;;  %v431_v21 = vld [vmem:[%s5144_s12 + $0x68] sm:$0xff]  ;;  %v432_v23 = vld [vmem:[%s5144_s12 + $0x70] sm:$0xff] }
  0x18   : > { %v4737_v22 = vpack.c.bf16 %v431_v21, %v430_v20  ;;  %v433_v24 = vld [vmem:[%s5144_s12 + $0x78] sm:$0xff]  ;;  %v434_v26 = vld [vmem:[%s5144_s12 + $0x80] sm:$0xff]  ;;  %v435_v27 = vld [vmem:[%s5144_s12 + $0x88] sm:$0xff] }
  0x19   : > { %v4740_v25 = vpack.c.bf16 %v433_v24, %v432_v23  ;;  %v4743_v28 = vpack.c.bf16 %v435_v27, %v434_v26  ;;  %v436_v29 = vld [vmem:[%s5144_s12 + $0x90] sm:$0xff]  ;;  %v437_v30 = vld [vmem:[%s5144_s12 + $0x98] sm:$0xff]  ;;  %v438_v32 = vld [vmem:[%s5144_s12 + $0xa0] sm:$0xff] }
  0x1a   : > { %4723 = vmatpush1.bf16.msra.mxu0 %v4722_v7  ;;  %v4746_v31 = vpack.c.bf16 %v437_v30, %v436_v29  ;;  %v439_v33 = vld [vmem:[%s5144_s12 + $0xa8] sm:$0xff]  ;;  %v440_v35 = vld [vmem:[%s5144_s12 + $0xb0] sm:$0xff]  ;;  %v441_v36 = vld [vmem:[%s5144_s12 + $0xb8] sm:$0xff] }
  0x1b   : > { %4724 = vmatprep.subr.bf16.mxu0 %v8107_v1  ;;  %v4749_v34 = vpack.c.bf16 %v439_v33, %v438_v32  ;;  %v4752_v37 = vpack.c.bf16 %v441_v36, %v440_v35  ;;  %v442_v38 = vld [vmem:[%s5144_s12 + $0xc0] sm:$0xff]  ;;  %v443_v39 = vld [vmem:[%s5144_s12 + $0xc8] sm:$0xff]  ;;  %v444_v41 = vld [vmem:[%s5144_s12 + $0xd0] sm:$0xff] }
  0x1c   : > { %v4755_v40 = vpack.c.bf16 %v443_v39, %v442_v38  ;;  %v445_v42 = vld [vmem:[%s5144_s12 + $0xd8] sm:$0xff]  ;;  %v446_v44 = vld [vmem:[%s5144_s12 + $0xe0] sm:$0xff]  ;;  %v447_v45 = vld [vmem:[%s5144_s12 + $0xe8] sm:$0xff] }
  0x1d   : > { %v4758_v43 = vpack.c.bf16 %v445_v42, %v444_v41  ;;  %v4761_v46 = vpack.c.bf16 %v447_v45, %v446_v44  ;;  %v448_v47 = vld [vmem:[%s5144_s12 + $0xf0] sm:$0xff]  ;;  %v449_v48 = vld [vmem:[%s5144_s12 + $0xf8] sm:$0xff]  ;;  %v361_v2 = vld [vmem:[%s8098_s0 + $0x88] sm:$0xff] }
  0x1e   : > { %4726 = vmatpush1.bf16.msra.mxu0 %v4725_v10  ;;  %v4764_v49 = vpack.c.bf16 %v449_v48, %v448_v47  ;;  %v360_v3 = vld [vmem:[%s8098_s0 + $0x80] sm:$0xff]  ;;  %v363_v4 = vld [vmem:[%s8098_s0 + $0x98] sm:$0xff]  ;;  %v362_v5 = vld [vmem:[%s8098_s0 + $0x90] sm:$0xff] }
  0x1f   : > { %4727 = vmatprep.subr.bf16.mxu0 %v8107_v1  ;;  %v365_v6 = vld [vmem:[%s8098_s0 + $0xa8] sm:$0xff]  ;;  %v364_v7 = vld [vmem:[%s8098_s0 + $0xa0] sm:$0xff]  ;;  %v367_v8 = vld [vmem:[%s8098_s0 + $0xb8] sm:$0xff] }
  0x20   : > { %v366_v9 = vld [vmem:[%s8098_s0 + $0xb0] sm:$0xff]  ;;  %v369_v10 = vld [vmem:[%s8098_s0 + $0xc8] sm:$0xff]  ;;  %v368_v11 = vld [vmem:[%s8098_s0 + $0xc0] sm:$0xff] }
  0x21   : > { %v371_v12 = vld [vmem:[%s8098_s0 + $0xd8] sm:$0xff]  ;;  %v373_v14 = vld [vmem:[%s8098_s0 + $0xe8] sm:$0xff]  ;;  %v372_v15 = vld [vmem:[%s8098_s0 + $0xe0] sm:$0xff] }
  0x22   : > { %4729 = vmatpush1.bf16.msra.mxu0 %v4728_v13  ;;  %v370_v13 = vld [vmem:[%s8098_s0 + $0xd0] sm:$0xff]  ;;  %v377_v18 = vld [vmem:[%s8098_s0 + $0x108] sm:$0xff]  ;;  %v379_v20 = vld [vmem:[%s8098_s0 + $0x118] sm:$0xff] }
  0x23   : > { %4730 = vmatprep.subr.bf16.mxu0 %v8107_v1  ;;  %v374_v17 = vld [vmem:[%s8098_s0 + $0xf0] sm:$0xff]  ;;  %v380_v23 = vld [vmem:[%s8098_s0 + $0x120] sm:$0xff]  ;;  %v383_v24 = vld [vmem:[%s8098_s0 + $0x138] sm:$0xff] }
  0x24   : > { %v378_v21 = vld [vmem:[%s8098_s0 + $0x110] sm:$0xff]  ;;  %v385_v26 = vld [vmem:[%s8098_s0 + $0x148] sm:$0xff]  ;;  %v384_v27 = vld [vmem:[%s8098_s0 + $0x140] sm:$0xff] }
  0x25   : > { %v386_v29 = vld [vmem:[%s8098_s0 + $0x150] sm:$0xff]  ;;  %v389_v30 = vld [vmem:[%s8098_s0 + $0x168] sm:$0xff]  ;;  %v391_v32 = vld [vmem:[%s8098_s0 + $0x178] sm:$0xff] }
  0x26   : > { %4732 = vmatpush1.bf16.msra.mxu0 %v4731_v16  ;;  %v375_v16 = vld [vmem:[%s8098_s0 + $0xf8] sm:$0xff]  ;;  %v390_v33 = vld [vmem:[%s8098_s0 + $0x170] sm:$0xff]  ;;  %v392_v35 = vld [vmem:[%s8098_s0 + $0x180] sm:$0xff] }
  0x27   : > { %4733 = vmatprep.subr.bf16.mxu0 %v8107_v1  ;;  %v395_v36 = vld [vmem:[%s8098_s0 + $0x198] sm:$0xff]  ;;  %v397_v38 = vld [vmem:[%s8098_s0 + $0x1a8] sm:$0xff]  ;;  %v396_v39 = vld [vmem:[%s8098_s0 + $0x1a0] sm:$0xff] }
  0x28   : > { %v398_v41 = vld [vmem:[%s8098_s0 + $0x1b0] sm:$0xff]  ;;  %v401_v42 = vld [vmem:[%s8098_s0 + $0x1c8] sm:$0xff]  ;;  %v403_v44 = vld [vmem:[%s8098_s0 + $0x1d8] sm:$0xff] }
  0x29   : > { %v402_v45 = vld [vmem:[%s8098_s0 + $0x1d0] sm:$0xff]  ;;  %v404_v47 = vld [vmem:[%s8098_s0 + $0x1e0] sm:$0xff]  ;;  %v407_v48 = vld [vmem:[%s8098_s0 + $0x1f8] sm:$0xff] }
  0x2a   : > { %4735 = vmatpush1.bf16.msra.mxu0 %v4734_v19  ;;  %v376_v19 = vld [vmem:[%s8098_s0 + $0x100] sm:$0xff] }
  0x2b   : > { %4736 = vmatprep.subr.bf16.mxu0 %v8107_v1 }
  0x2e   : > { %4738 = vmatpush1.bf16.msra.mxu0 %v4737_v22  ;;  %v381_v22 = vld [vmem:[%s8098_s0 + $0x128] sm:$0xff] }
  0x2f   : > { %4739 = vmatprep.subr.bf16.mxu0 %v8107_v1 }
  0x32   : > { %4741 = vmatpush1.bf16.msra.mxu0 %v4740_v25  ;;  %v382_v25 = vld [vmem:[%s8098_s0 + $0x130] sm:$0xff] }
  0x33   : > { %4742 = vmatprep.subr.bf16.mxu0 %v8107_v1 }
  0x36   : > { %4744 = vmatpush1.bf16.msra.mxu0 %v4743_v28  ;;  %v387_v28 = vld [vmem:[%s8098_s0 + $0x158] sm:$0xff] }
  0x37   : > { %4745 = vmatprep.subr.bf16.mxu0 %v8107_v1 }
  0x3a   : > { %4747 = vmatpush1.bf16.msra.mxu0 %v4746_v31  ;;  %v388_v31 = vld [vmem:[%s8098_s0 + $0x160] sm:$0xff] }
  0x3b   : > { %4748 = vmatprep.subr.bf16.mxu0 %v8107_v1 }
  0x3e   : > { %4750 = vmatpush1.bf16.msra.mxu0 %v4749_v34  ;;  %v393_v34 = vld [vmem:[%s8098_s0 + $0x188] sm:$0xff] }
  0x3f   : > { %4751 = vmatprep.subr.bf16.mxu0 %v8107_v1 }
  0x42   : > { %4753 = vmatpush1.bf16.msra.mxu0 %v4752_v37  ;;  %v394_v37 = vld [vmem:[%s8098_s0 + $0x190] sm:$0xff] }
  0x43   : > { %4754 = vmatprep.subr.bf16.mxu0 %v8107_v1 }
  0x46   : > { %4756 = vmatpush1.bf16.msra.mxu0 %v4755_v40  ;;  %v399_v40 = vld [vmem:[%s8098_s0 + $0x1b8] sm:$0xff] }
  0x47   : > { %4757 = vmatprep.subr.bf16.mxu0 %v8107_v1 }
  0x4a   : > { %4759 = vmatpush1.bf16.msra.mxu0 %v4758_v43  ;;  %v400_v43 = vld [vmem:[%s8098_s0 + $0x1c0] sm:$0xff] }
  0x4b   : > { %4760 = vmatprep.subr.bf16.mxu0 %v8107_v1 }
  0x4e   : > { %4762 = vmatpush1.bf16.msra.mxu0 %v4761_v46  ;;  %v405_v46 = vld [vmem:[%s8098_s0 + $0x1e8] sm:$0xff] }
  0x4f   : > { %4763 = vmatprep.subr.bf16.mxu0 %v8107_v1 }
  0x52   : > { %4765 = vmatpush1.bf16.msra.mxu0 %v4764_v49  ;;  %v406_v49 = vld [vmem:[%s8098_s0 + $0x1f0] sm:$0xff] }
  0x55   : > { %520 = vmatmul.mubr.f32.vlgmr.msra.gmra.mrb[0].mxu0 %v344_v50  ;;  %v409_v50 = vld [vmem:[%s8098_s0 + $0x208] sm:$0xff] }
  0x56   : > { %524 = vmatprep.mubr.f32.mxu0 %v347_v51  ;;  %v408_v51 = vld [vmem:[%s8098_s0 + $0x200] sm:$0xff] }
  0x59   : > { %525 = vmatmul.mubr.f32.gmra.mrb[2].mxu0 %v346_v52  ;;  %v411_v52 = vld [vmem:[%s8098_s0 + $0x218] sm:$0xff] }
  0x5a   : > { %529 = vmatprep.mubr.f32.mxu0 %v349_v53  ;;  %v410_v53 = vld [vmem:[%s8098_s0 + $0x210] sm:$0xff] }
  0x5d   : > { %530 = vmatmul.mubr.f32.gmra.mrb[4].mxu0 %v348_v54  ;;  %v413_v54 = vld [vmem:[%s8098_s0 + $0x228] sm:$0xff] }
  0x5e   : > { %534 = vmatprep.mubr.f32.mxu0 %v351_v55  ;;  %v412_v55 = vld [vmem:[%s8098_s0 + $0x220] sm:$0xff] }
  0x61   : > { %535 = vmatmul.mubr.f32.gmra.mrb[6].mxu0 %v350_v56  ;;  %v415_v56 = vld [vmem:[%s8098_s0 + $0x238] sm:$0xff] }
  0x62   : > { %539 = vmatprep.mubr.f32.mxu0 %v353_v57  ;;  %v414_v57 = vld [vmem:[%s8098_s0 + $0x230] sm:$0xff] }
  0x65   : > { %540 = vmatmul.mubr.f32.gmra.mrb[8].mxu0 %v352_v58  ;;  %v417_v58 = vld [vmem:[%s8098_s0 + $0x248] sm:$0x3] }
  0x66   : > { %544 = vmatprep.mubr.f32.mxu0 %v355_v59  ;;  %v416_v59 = vld [vmem:[%s8098_s0 + $0x240] sm:$0x3] }
  0x69   : > { %545 = vmatmul.mubr.f32.gmra.mrb[10].mxu0 %v354_v60  ;;  %v5413_v60 = vld [vmem:[%s5144_s12 + $0x120] ss:$0 sm:$0xff] }
  0x6a   : > { %549 = vmatprep.mubr.f32.mxu0 %v357_v61 }
  0x6d   : > { %550 = vmatmul.mubr.f32.gmra.mrb[12].mxu0 %v356_v62 }
  0x6e   : > { %554 = vmatprep.mubr.f32.mxu0 %v359_v63 }
  0x71   : > { %555 = vmatmul.mubr.f32.gmra.mrb[14].mxu0 %v358_v0 }
  0x72   : > { %559 = vmatprep.mubr.f32.mxu0 %v361_v2 }
  0x75   : > { %560 = vmatmul.mubr.f32.gmra.mrb[16].mxu0 %v360_v3 }
  0x76   : > { %564 = vmatprep.mubr.f32.mxu0 %v363_v4 }
  0x79   : > { %565 = vmatmul.mubr.f32.gmra.mrb[18].mxu0 %v362_v5 }
  0x7a   : > { %569 = vmatprep.mubr.f32.mxu0 %v365_v6 }
  0x7d   : > { %570 = vmatmul.mubr.f32.gmra.mrb[20].mxu0 %v364_v7 }
  0x7e   : > { %574 = vmatprep.mubr.f32.mxu0 %v367_v8 }
  0x81   : > { %575 = vmatmul.mubr.f32.gmra.mrb[22].mxu0 %v366_v9 }
  0x82   : > { %579 = vmatprep.mubr.f32.mxu0 %v369_v10 }
  0x85   : > { %580 = vmatmul.mubr.f32.gmra.mrb[24].mxu0 %v368_v11 }
  0x86   : > { %584 = vmatprep.mubr.f32.mxu0 %v371_v12 }
  0x89   : > { %585 = vmatmul.mubr.f32.gmra.mrb[26].mxu0 %v370_v13 }
  0x8a   : > { %589 = vmatprep.mubr.f32.mxu0 %v373_v14 }
  0x8d   : > { %590 = vmatmul.mubr.f32.gmra.mrb[28].mxu0 %v372_v15 }
  0x8e   : > { %594 = vmatprep.mubr.f32.mxu0 %v375_v16 }
  0x91   : > { %595 = vmatmul.mubr.f32.gmra.mrb[30].mxu0 %v374_v17 }
  0x92   : > { %599 = vmatprep.mubr.f32.mxu0 %v377_v18 }
  0x95   : > { %600 = vmatmul.mubr.f32.gmra.mrb[32].mxu0 %v376_v19 }
  0x96   : > { %604 = vmatprep.mubr.f32.mxu0 %v379_v20 }
  0x99   : > { %605 = vmatmul.mubr.f32.gmra.mrb[34].mxu0 %v378_v21 }
  0x9a   : > { %609 = vmatprep.mubr.f32.mxu0 %v381_v22 }
  0x9d   : > { %610 = vmatmul.mubr.f32.gmra.mrb[36].mxu0 %v380_v23 }
  0x9e   : > { %614 = vmatprep.mubr.f32.mxu0 %v383_v24 }
  0xa1   : > { %615 = vmatmul.mubr.f32.gmra.mrb[38].mxu0 %v382_v25 }
  0xa2   : > { %619 = vmatprep.mubr.f32.mxu0 %v385_v26 }
  0xa5   : > { %620 = vmatmul.mubr.f32.gmra.mrb[40].mxu0 %v384_v27 }
  0xa6   : > { %624 = vmatprep.mubr.f32.mxu0 %v387_v28 }
  0xa9   : > { %625 = vmatmul.mubr.f32.gmra.mrb[42].mxu0 %v386_v29  ;;  %v928_v29 = vld [vmem:[%s8100_s2 + $0x8] sm:$0xff] }
  0xaa   : > { %629 = vmatprep.mubr.f32.mxu0 %v389_v30  ;;  %1086 = vmatprep.mubr.f32.mxu1 %v928_v29 }
  0xad   : > { %630 = vmatmul.mubr.f32.gmra.mrb[44].mxu0 %v388_v31 }
  0xae   : > { %634 = vmatprep.mubr.f32.mxu0 %v391_v32 }
  0xb1   : > { %635 = vmatmul.mubr.f32.gmra.mrb[46].mxu0 %v390_v33 }
  0xb2   : > { %639 = vmatprep.mubr.f32.mxu0 %v393_v34 }
  0xb5   : > { %640 = vmatmul.mubr.f32.gmra.mrb[48].mxu0 %v392_v35 }
  0xb6   : > { %644 = vmatprep.mubr.f32.mxu0 %v395_v36 }
  0xb9   : > { %645 = vmatmul.mubr.f32.gmra.mrb[50].mxu0 %v394_v37 }
  0xba   : > { %649 = vmatprep.mubr.f32.mxu0 %v397_v38 }
  0xbd   : > { %650 = vmatmul.mubr.f32.gmra.mrb[52].mxu0 %v396_v39 }
  0xbe   : > { %654 = vmatprep.mubr.f32.mxu0 %v399_v40 }
  0xc1   : > { %655 = vmatmul.mubr.f32.gmra.mrb[54].mxu0 %v398_v41 }
  0xc2   : > { %659 = vmatprep.mubr.f32.mxu0 %v401_v42 }
  0xc5   : > { %660 = vmatmul.mubr.f32.gmra.mrb[56].mxu0 %v400_v43 }
  0xc6   : > { %664 = vmatprep.mubr.f32.mxu0 %v403_v44 }
  0xc9   : > { %665 = vmatmul.mubr.f32.gmra.mrb[58].mxu0 %v402_v45 }
  0xca   : > { %669 = vmatprep.mubr.f32.mxu0 %v405_v46 }
  0xcd   : > { %670 = vmatmul.mubr.f32.gmra.mrb[60].mxu0 %v404_v47 }
  0xce   : > { %674 = vmatprep.mubr.f32.mxu0 %v407_v48 }
  0xd1   : > { %675 = vmatmul.mubr.f32.gmra.mrb[62].mxu0 %v406_v49 }
  0xd2   : > { %679 = vmatprep.mubr.f32.mxu0 %v409_v50 }
  0xd5   : > { %680 = vmatmul.mubr.f32.gmra.mrb[64].mxu0 %v408_v51 }
  0xd6   : > { %684 = vmatprep.mubr.f32.mxu0 %v411_v52 }
  0xd9   : > { %685 = vmatmul.mubr.f32.gmra.mrb[66].mxu0 %v410_v53 }
  0xda   : > { %689 = vmatprep.mubr.f32.mxu0 %v413_v54 }
  0xdd   : > { %690 = vmatmul.mubr.f32.gmra.mrb[68].mxu0 %v412_v55 }
  0xde   : > { %694 = vmatprep.mubr.f32.mxu0 %v415_v56 }
  0xe1   : > { %695 = vmatmul.mubr.f32.gmra.mrb[70].mxu0 %v414_v57 }
  0xe2   : > { %699 = vmatprep.mubr.f32.mxu0 %v417_v58 }
  0xe5   : > { %700 = vmatmul.mubr.f32.gmra.mrb[72].mxu0 %v416_v59 }
 0x128   : > { %v521_v61 = vpop.f32.mrb[0].mxu0 }
 0x129   : > { %v522_v62 = vadd.f32 %v5413_v60, %v521_v61  ;;  %v523_v63 = vpop.f32.mrb[1].mxu0 }
 0x12b   : > { %v742_v0 = vmin.f32 %v522_v62, 0.0  ;;  %vm705_vm0 = vcmp.gt.f32.partialorder %v522_v62, 0.0 }
 0x12c   : > { %v526_v2 = vpop.f32.mrb[2].mxu0 }
 0x12d   : > { %v779_v3 = vmul.f32 1.442695, %v742_v0  ;;  %v527_v4 = vadd.f32 %v5413_v60, %v526_v2  ;;  %v528_v5 = vpop.f32.mrb[3].mxu0 }
 0x12f   : > { %4959 = vpow2.f32 %v779_v3  ;;  %v743_v6 = vmin.f32 %v527_v4, 0.0  ;;  %vm706_vm1 = vcmp.gt.f32.partialorder %v527_v4, 0.0 }
 0x130   : > { %v531_v7 = vpop.f32.mrb[4].mxu0 }
 0x131   : > { %v781_v8 = vmul.f32 1.442695, %v743_v6  ;;  %v532_v9 = vadd.f32 %v5413_v60, %v531_v7  ;;  %v533_v10 = vpop.f32.mrb[5].mxu0 }
 0x133   : > { %4961 = vpow2.f32 %v781_v8  ;;  %v744_v11 = vmin.f32 %v532_v9, 0.0  ;;  %vm707_vm2 = vcmp.gt.f32.partialorder %v532_v9, 0.0 }
 0x134   : > { %v536_v12 = vpop.f32.mrb[6].mxu0 }
 0x135   : > { %v783_v13 = vmul.f32 1.442695, %v744_v11  ;;  %v537_v14 = vadd.f32 %v5413_v60, %v536_v12  ;;  %v538_v15 = vpop.f32.mrb[7].mxu0 }
 0x137   : > { %4963 = vpow2.f32 %v783_v13  ;;  %v745_v16 = vmin.f32 %v537_v14, 0.0  ;;  %vm708_vm3 = vcmp.gt.f32.partialorder %v537_v14, 0.0 }
 0x138   : > { %v541_v17 = vpop.f32.mrb[8].mxu0 }
 0x139   : > { %v4960_v18 = vpop.eup %4959  ;;  %v785_v19 = vmul.f32 1.442695, %v745_v16  ;;  %v542_v20 = vadd.f32 %v5413_v60, %v541_v17  ;;  %v543_v21 = vpop.f32.mrb[9].mxu0 }
 0x13a   : > { %v4109_v24 = vadd.f32 -1.0, %v4960_v18 }
 0x13b   : > { %4965 = vpow2.f32 %v785_v19  ;;  %v746_v22 = vmin.f32 %v542_v20, 0.0  ;;  %vm709_vm4 = vcmp.gt.f32.partialorder %v542_v20, 0.0 }
 0x13c   : > { %v546_v23 = vpop.f32.mrb[10].mxu0  ;;  %v5424_v33 = vsel %vm705_vm0, %v522_v62, %v4109_v24 }
 0x13d   : > { %v4962_v25 = vpop.eup %4961  ;;  %v787_v26 = vmul.f32 1.442695, %v746_v22  ;;  %v547_v27 = vadd.f32 %v5413_v60, %v546_v23  ;;  %v548_v28 = vpop.f32.mrb[11].mxu0 }
 0x13e   : > { %v4110_v30 = vadd.f32 -1.0, %v4962_v25 }
 0x13f   : > { %4967 = vpow2.f32 %v787_v26  ;;  %v747_v31 = vmin.f32 %v547_v27, 0.0  ;;  %vm710_vm5 = vcmp.gt.f32.partialorder %v547_v27, 0.0 }
 0x140   : > { %v551_v32 = vpop.f32.mrb[12].mxu0  ;;  %v5426_v34 = vsel %vm706_vm1, %v527_v4, %v4110_v30 }
 0x141   : > { %v4964_v35 = vpop.eup %4963  ;;  %v789_v36 = vmul.f32 1.442695, %v747_v31  ;;  %v552_v37 = vadd.f32 %v5413_v60, %v551_v32  ;;  %v553_v38 = vpop.f32.mrb[13].mxu0  ;;  %v4768_v39 = vpack.c.bf16 %v5426_v34, %v5424_v33 }
 0x142   : > { %v4111_v41 = vadd.f32 -1.0, %v4964_v35 }
 0x143   : > { %4969 = vpow2.f32 %v789_v36  ;;  %v748_v40 = vmin.f32 %v552_v37, 0.0  ;;  %vm711_vm6 = vcmp.gt.f32.partialorder %v552_v37, 0.0 }
 0x144   : > { %v556_v42 = vpop.f32.mrb[14].mxu0  ;;  %v5432_v50 = vsel %vm707_vm2, %v532_v9, %v4111_v41 }
 0x145   : > { %v4966_v43 = vpop.eup %4965  ;;  %v791_v44 = vmul.f32 1.442695, %v748_v40  ;;  %v557_v45 = vadd.f32 %v5413_v60, %v556_v42  ;;  %v558_v46 = vpop.f32.mrb[15].mxu0 }
 0x146   : > { %v4112_v47 = vadd.f32 -1.0, %v4966_v43 }
 0x147   : > { %4971 = vpow2.f32 %v791_v44  ;;  %v749_v48 = vmin.f32 %v557_v45, 0.0  ;;  %vm712_vm7 = vcmp.gt.f32.partialorder %v557_v45, 0.0 }
 0x148   : > { %v561_v49 = vpop.f32.mrb[16].mxu0  ;;  %v5434_v51 = vsel %vm708_vm3, %v537_v14, %v4112_v47 }
 0x149   : > { %v4968_v52 = vpop.eup %4967  ;;  %v793_v53 = vmul.f32 1.442695, %v749_v48  ;;  %v562_v54 = vadd.f32 %v5413_v60, %v561_v49  ;;  %v563_v55 = vpop.f32.mrb[17].mxu0  ;;  %v4772_v56 = vpack.c.bf16 %v5434_v51, %v5432_v50 }
 0x14a   : > { %v4113_v58 = vadd.f32 -1.0, %v4968_v52 }
 0x14b   : > { %4973 = vpow2.f32 %v793_v53  ;;  %v750_v57 = vmin.f32 %v562_v54, 0.0  ;;  %vm713_vm8 = vcmp.gt.f32.partialorder %v562_v54, 0.0 }
 0x14c   : > { %v566_v59 = vpop.f32.mrb[18].mxu0  ;;  %v5440_v5 = vsel %vm709_vm4, %v542_v20, %v4113_v58 }
 0x14d   : > { %v4970_v61 = vpop.eup %4969  ;;  %v795_v62 = vmul.f32 1.442695, %v750_v57  ;;  %v567_v63 = vadd.f32 %v5413_v60, %v566_v59  ;;  %v568_v0 = vpop.f32.mrb[19].mxu0 }
 0x14e   : > { %v4114_v2 = vadd.f32 -1.0, %v4970_v61 }
 0x14f   : > { %4975 = vpow2.f32 %v795_v62  ;;  %v751_v3 = vmin.f32 %v567_v63, 0.0  ;;  %vm714_vm9 = vcmp.gt.f32.partialorder %v567_v63, 0.0 }
 0x150   : > { %v571_v4 = vpop.f32.mrb[20].mxu0  ;;  %v5442_v6 = vsel %vm710_vm5, %v547_v27, %v4114_v2 }
 0x151   : > { %v4972_v7 = vpop.eup %4971  ;;  %v797_v8 = vmul.f32 1.442695, %v751_v3  ;;  %v572_v9 = vadd.f32 %v5413_v60, %v571_v4  ;;  %v573_v10 = vpop.f32.mrb[21].mxu0  ;;  %v4776_v11 = vpack.c.bf16 %v5442_v6, %v5440_v5 }
 0x152   : > { %v4115_v13 = vadd.f32 -1.0, %v4972_v7 }
 0x153   : > { %4977 = vpow2.f32 %v797_v8  ;;  %v752_v12 = vmin.f32 %v572_v9, 0.0  ;;  %vm715_vm10 = vcmp.gt.f32.partialorder %v572_v9, 0.0 }
 0x154   : > { %v576_v14 = vpop.f32.mrb[22].mxu0  ;;  %v5448_v22 = vsel %vm711_vm6, %v552_v37, %v4115_v13 }
 0x155   : > { %v4974_v15 = vpop.eup %4973  ;;  %v799_v16 = vmul.f32 1.442695, %v752_v12  ;;  %v577_v17 = vadd.f32 %v5413_v60, %v576_v14  ;;  %v578_v18 = vpop.f32.mrb[23].mxu0 }
 0x156   : > { %v4116_v19 = vadd.f32 -1.0, %v4974_v15 }
 0x157   : > { %4979 = vpow2.f32 %v799_v16  ;;  %v753_v20 = vmin.f32 %v577_v17, 0.0  ;;  %vm716_vm11 = vcmp.gt.f32.partialorder %v577_v17, 0.0 }
 0x158   : > { %v581_v21 = vpop.f32.mrb[24].mxu0  ;;  %v5450_v23 = vsel %vm712_vm7, %v557_v45, %v4116_v19 }
 0x159   : > { %v4976_v24 = vpop.eup %4975  ;;  %v801_v25 = vmul.f32 1.442695, %v753_v20  ;;  %v582_v26 = vadd.f32 %v5413_v60, %v581_v21  ;;  %v583_v27 = vpop.f32.mrb[25].mxu0  ;;  %v4780_v28 = vpack.c.bf16 %v5450_v23, %v5448_v22 }
 0x15a   : > { %v4117_v30 = vadd.f32 -1.0, %v4976_v24 }
 0x15b   : > { %4981 = vpow2.f32 %v801_v25  ;;  %v754_v29 = vmin.f32 %v582_v26, 0.0  ;;  %vm717_vm12 = vcmp.gt.f32.partialorder %v582_v26, 0.0 }
 0x15c   : > { %v586_v31 = vpop.f32.mrb[26].mxu0  ;;  %v5456_v42 = vsel %vm713_vm8, %v562_v54, %v4117_v30 }
 0x15d   : > { %v4978_v32 = vpop.eup %4977  ;;  %v803_v35 = vmul.f32 1.442695, %v754_v29  ;;  %v587_v36 = vadd.f32 %v5413_v60, %v586_v31  ;;  %v588_v37 = vpop.f32.mrb[27].mxu0 }
 0x15e   : > { %v4118_v38 = vadd.f32 -1.0, %v4978_v32 }
 0x15f   : > { %4983 = vpow2.f32 %v803_v35  ;;  %v755_v40 = vmin.f32 %v587_v36, 0.0  ;;  %vm718_vm13 = vcmp.gt.f32.partialorder %v587_v36, 0.0 }
 0x160   : > { %v591_v41 = vpop.f32.mrb[28].mxu0  ;;  %v5458_v43 = vsel %vm714_vm9, %v567_v63, %v4118_v38 }
 0x161   : > { %v4980_v44 = vpop.eup %4979  ;;  %v805_v45 = vmul.f32 1.442695, %v755_v40  ;;  %v592_v46 = vadd.f32 %v5413_v60, %v591_v41  ;;  %v593_v47 = vpop.f32.mrb[29].mxu0  ;;  %v4784_v48 = vpack.c.bf16 %v5458_v43, %v5456_v42 }
 0x162   : > { %v4119_v52 = vadd.f32 -1.0, %v4980_v44 }
 0x163   : > { %4985 = vpow2.f32 %v805_v45  ;;  %v756_v49 = vmin.f32 %v592_v46, 0.0  ;;  %vm719_vm14 = vcmp.gt.f32.partialorder %v592_v46, 0.0 }
 0x164   : > { %v596_v53 = vpop.f32.mrb[30].mxu0  ;;  %v5464_v63 = vsel %vm715_vm10, %v572_v9, %v4119_v52 }
 0x165   : > { %v4982_v55 = vpop.eup %4981  ;;  %v807_v57 = vmul.f32 1.442695, %v756_v49  ;;  %v597_v58 = vadd.f32 %v5413_v60, %v596_v53  ;;  %v598_v54 = vpop.f32.mrb[31].mxu0 }
 0x166   : > { %v4120_v59 = vadd.f32 -1.0, %v4982_v55 }
 0x167   : > { %4987 = vpow2.f32 %v807_v57  ;;  %v757_v61 = vmin.f32 %v597_v58, 0.0  ;;  %vm720_vm15 = vcmp.gt.f32.partialorder %v597_v58, 0.0 }
 0x168   : > { %v601_v62 = vpop.f32.mrb[32].mxu0  ;;  %v5466_v0 = vsel %vm716_vm11, %v577_v17, %v4120_v59 }
 0x169   : > { %v4984_v2 = vpop.eup %4983  ;;  %v809_v3 = vmul.f32 1.442695, %v757_v61  ;;  %v602_v4 = vadd.f32 %v5413_v60, %v601_v62  ;;  %v603_v7 = vpop.f32.mrb[33].mxu0  ;;  %v4788_v8 = vpack.c.bf16 %v5466_v0, %v5464_v63 }
 0x16a   : > { %v4121_v12 = vadd.f32 -1.0, %v4984_v2 }
 0x16b   : > { %4989 = vpow2.f32 %v809_v3  ;;  %v758_v10 = vmin.f32 %v602_v4, 0.0  ;;  %vm721_vm0 = vcmp.gt.f32.partialorder %v602_v4, 0.0 }
 0x16c   : > { %v606_v13 = vpop.f32.mrb[34].mxu0  ;;  %v5472_v20 = vsel %vm717_vm12, %v582_v26, %v4121_v12 }
 0x16d   : > { %v4986_v14 = vpop.eup %4985  ;;  %v811_v15 = vmul.f32 1.442695, %v758_v10  ;;  %v607_v16 = vadd.f32 %v5413_v60, %v606_v13  ;;  %v608_v9 = vpop.f32.mrb[35].mxu0 }
 0x16e   : > { %v4122_v18 = vadd.f32 -1.0, %v4986_v14 }
 0x16f   : > { %4991 = vpow2.f32 %v811_v15  ;;  %v759_v17 = vmin.f32 %v607_v16, 0.0  ;;  %vm722_vm1 = vcmp.gt.f32.partialorder %v607_v16, 0.0 }
 0x170   : > { %v611_v19 = vpop.f32.mrb[36].mxu0  ;;  %v5474_v21 = vsel %vm718_vm13, %v587_v36, %v4122_v18 }
 0x171   : > { %v4988_v24 = vpop.eup %4987  ;;  %v813_v25 = vmul.f32 1.442695, %v759_v17  ;;  %v612_v27 = vadd.f32 %v5413_v60, %v611_v19  ;;  %v613_v29 = vpop.f32.mrb[37].mxu0  ;;  %v4792_v30 = vpack.c.bf16 %v5474_v21, %v5472_v20 }
 0x172   : > { %v4123_v32 = vadd.f32 -1.0, %v4988_v24 }
 0x173   : > { %4993 = vpow2.f32 %v813_v25  ;;  %v760_v31 = vmin.f32 %v612_v27, 0.0  ;;  %vm723_vm2 = vcmp.gt.f32.partialorder %v612_v27, 0.0 }
 0x174   : > { %v616_v35 = vpop.f32.mrb[38].mxu0  ;;  %v5480_v45 = vsel %vm719_vm14, %v592_v46, %v4123_v32 }
 0x175   : > { %v4990_v37 = vpop.eup %4989  ;;  %v815_v38 = vmul.f32 1.442695, %v760_v31  ;;  %v617_v40 = vadd.f32 %v5413_v60, %v616_v35  ;;  %v618_v26 = vpop.f32.mrb[39].mxu0 }
 0x176   : > { %v4124_v41 = vadd.f32 -1.0, %v4990_v37 }
 0x177   : > { %4995 = vpow2.f32 %v815_v38  ;;  %v761_v36 = vmin.f32 %v617_v40, 0.0  ;;  %vm724_vm3 = vcmp.gt.f32.partialorder %v617_v40, 0.0 }
 0x178   : > { %v621_v44 = vpop.f32.mrb[40].mxu0  ;;  %v5482_v47 = vsel %vm720_vm15, %v597_v58, %v4124_v41 }
 0x179   : > { %v4992_v49 = vpop.eup %4991  ;;  %v817_v52 = vmul.f32 1.442695, %v761_v36  ;;  %v5485_v53 = vadd.f32 %v5413_v60, %v621_v44  ;;  %v623_v55 = vpop.f32.mrb[41].mxu0  ;;  %v4796_v57 = vpack.c.bf16 %v5482_v47, %v5480_v45  ;;  %v930_v47 = vld [vmem:[%s8100_s2 + $0x18] sm:$0xff] }
 0x17a   : > { %v4125_v61 = vadd.f32 -1.0, %v4992_v49 }
 0x17b   : > { %4997 = vpow2.f32 %v817_v52  ;;  %v762_v54 = vmin.f32 %v5485_v53, 0.0  ;;  %vm725_vm4 = vcmp.gt.f32.partialorder %v5485_v53, 0.0 }
 0x17c   : > { %v626_v59 = vpop.f32.mrb[42].mxu0  ;;  %v906_v12 = vsel %vm721_vm0, %v602_v4, %v4125_v61 }
 0x17d   : > { %v4994_v62 = vpop.eup %4993  ;;  %v819_v2 = vmul.f32 1.442695, %v762_v54  ;;  %v627_v46 = vadd.f32 %v5413_v60, %v626_v59  ;;  %v628_v58 = vpop.f32.mrb[43].mxu0 }
 0x17e   : > { %v4126_v3 = vadd.f32 -1.0, %v4994_v62 }
 0x17f   : > { %4999 = vpow2.f32 %v819_v2  ;;  %v763_v7 = vmin.f32 %v627_v46, 0.0  ;;  %vm726_vm5 = vcmp.gt.f32.partialorder %v627_v46, 0.0 }
 0x180   : > { %v631_v10 = vpop.f32.mrb[44].mxu0  ;;  %v907_v13 = vsel %vm722_vm1, %v607_v16, %v4126_v3 }
 0x181   : > { %v4996_v14 = vpop.eup %4995  ;;  %v821_v15 = vmul.f32 1.442695, %v763_v7  ;;  %v5492_v9 = vadd.f32 %v5413_v60, %v631_v10  ;;  %v633_v18 = vpop.f32.mrb[45].mxu0  ;;  %v4766_v17 = vpack.c.bf16 %v907_v13, %v906_v12 }
 0x182   : > { %v4127_v24 = vadd.f32 -1.0, %v4996_v14 }
 0x183   : > { %5001 = vpow2.f32 %v821_v15  ;;  %v764_v19 = vmin.f32 %v5492_v9, 0.0  ;;  %4767 = vmatprep.subr.bf16.mxu1 %v4766_v17  ;;  %vm727_vm6 = vcmp.gt.f32.partialorder %v5492_v9, 0.0 }
 0x184   : > { %v636_v25 = vpop.f32.mrb[46].mxu0  ;;  %4769 = vmatpush3.bf16.msra.mxu1 %v4768_v39  ;;  %v908_v38 = vsel %vm723_vm2, %v612_v27, %v4127_v24 }
 0x185   : > { %v4998_v29 = vpop.eup %4997  ;;  %v823_v4 = vmul.f32 1.442695, %v764_v19  ;;  %v637_v16 = vadd.f32 %v5413_v60, %v636_v25  ;;  %v638_v31 = vpop.f32.mrb[47].mxu0 }
 0x186   : > { %v4128_v32 = vadd.f32 -1.0, %v4998_v29 }
 0x187   : > { %5003 = vpow2.f32 %v823_v4  ;;  %v765_v35 = vmin.f32 %v637_v16, 0.0  ;;  %vm728_vm7 = vcmp.gt.f32.partialorder %v637_v16, 0.0 }
 0x188   : > { %v641_v37 = vpop.f32.mrb[48].mxu0  ;;  %v909_v26 = vsel %vm724_vm3, %v617_v40, %v4128_v32 }
 0x189   : > { %v5000_v41 = vpop.eup %4999  ;;  %v825_v36 = vmul.f32 1.442695, %v765_v35  ;;  %v5500_v44 = vadd.f32 %v5413_v60, %v641_v37  ;;  %v643_v33 = vpop.f32.mrb[49].mxu0  ;;  %v4770_v34 = vpack.c.bf16 %v909_v26, %v908_v38 }
 0x18a   : > { %v4129_v49 = vadd.f32 -1.0, %v5000_v41 }
 0x18b   : > { %5005 = vpow2.f32 %v825_v36  ;;  %v766_v39 = vmin.f32 %v5500_v44, 0.0  ;;  %4771 = vmatprep.subr.bf16.mxu1 %v4770_v34  ;;  %vm729_vm8 = vcmp.gt.f32.partialorder %v5500_v44, 0.0 }
 0x18c   : > { %v646_v52 = vpop.f32.mrb[50].mxu0  ;;  %4773 = vmatpush3.bf16.msra.mxu1 %v4772_v56  ;;  %v910_v2 = vsel %vm725_vm4, %v5485_v53, %v4129_v49 }
 0x18d   : > { %v5002_v55 = vpop.eup %5001  ;;  %v827_v27 = vmul.f32 1.442695, %v766_v39  ;;  %v647_v40 = vadd.f32 %v5413_v60, %v646_v52  ;;  %v648_v54 = vpop.f32.mrb[51].mxu0 }
 0x18e   : > { %v4130_v59 = vadd.f32 -1.0, %v5002_v55 }
 0x18f   : > { %5007 = vpow2.f32 %v827_v27  ;;  %v767_v61 = vmin.f32 %v647_v40, 0.0  ;;  %vm730_vm9 = vcmp.gt.f32.partialorder %v647_v40, 0.0 }
 0x190   : > { %v651_v62 = vpop.f32.mrb[52].mxu0  ;;  %v911_v58 = vsel %vm726_vm5, %v627_v46, %v4130_v59  ;;  %vm1018_vm5 = vcmask 1041408  }
 0x191   : > { %v5004_v3 = vpop.eup %5003  ;;  %v829_v7 = vmul.f32 1.442695, %v767_v61  ;;  %v5510_v50 = vadd.f32 %v5413_v60, %v651_v62  ;;  %v653_v51 = vpop.f32.mrb[53].mxu0  ;;  %v4774_v56 = vpack.c.bf16 %v911_v58, %v910_v2 }
 0x192   : > { %v4131_v12 = vadd.f32 -1.0, %v5004_v3 }
 0x193   : > { %5009 = vpow2.f32 %v829_v7  ;;  %v768_v10 = vmin.f32 %v5510_v50, 0.0  ;;  %4775 = vmatprep.subr.bf16.mxu1 %v4774_v56  ;;  %vm731_vm10 = vcmp.gt.f32.partialorder %v5510_v50, 0.0 }
 0x194   : > { %v656_v13 = vpop.f32.mrb[54].mxu0  ;;  %4777 = vmatpush3.bf16.msra.mxu1 %v4776_v11  ;;  %v912_v24 = vsel %vm727_vm6, %v5492_v9, %v4131_v12  ;;  %vm5079_vm6 = vmmov 0  }
 0x195   : > { %v5006_v14 = vpop.eup %5005  ;;  %v831_v53 = vmul.f32 1.442695, %v768_v10  ;;  %v657_v46 = vadd.f32 %v5413_v60, %v656_v13  ;;  %v658_v15 = vpop.f32.mrb[55].mxu0 }
 0x196   : > { %v4132_v18 = vadd.f32 -1.0, %v5006_v14 }
 0x197   : > { %5011 = vpow2.f32 %v831_v53  ;;  %v769_v17 = vmin.f32 %v657_v46, 0.0  ;;  %vm732_vm11 = vcmp.gt.f32.partialorder %v657_v46, 0.0 }
 0x198   : > { %v661_v19 = vpop.f32.mrb[56].mxu0  ;;  %v913_v25 = vsel %vm728_vm7, %v637_v16, %v4132_v18  ;;  %vm972_vm7 = vcmask 277504  }
 0x199   : > { %v5008_v29 = vpop.eup %5007  ;;  %v833_v4 = vmul.f32 1.442695, %v769_v17  ;;  %v5520_v5 = vadd.f32 %v5413_v60, %v661_v19  ;;  %v663_v6 = vpop.f32.mrb[57].mxu0  ;;  %v4778_v11 = vpack.c.bf16 %v913_v25, %v912_v24 }
 0x19a   : > { %v4133_v32 = vadd.f32 -1.0, %v5008_v29 }
 0x19b   : > { %5013 = vpow2.f32 %v833_v4  ;;  %v770_v31 = vmin.f32 %v5520_v5, 0.0  ;;  %4779 = vmatprep.subr.bf16.mxu1 %v4778_v11  ;;  %vm733_vm12 = vcmp.gt.f32.partialorder %v5520_v5, 0.0 }
 0x19c   : > { %v666_v35 = vpop.f32.mrb[58].mxu0  ;;  %4781 = vmatpush3.bf16.msra.mxu1 %v4780_v28  ;;  %v914_v33 = vsel %vm729_vm8, %v5500_v44, %v4133_v32  ;;  %vm1624_vm8 = vcmask 1043456  }
 0x19d   : > { %v5010_v37 = vpop.eup %5009  ;;  %v835_v9 = vmul.f32 1.442695, %v770_v31  ;;  %v667_v16 = vadd.f32 %v5413_v60, %v666_v35  ;;  %v668_v38 = vpop.f32.mrb[59].mxu0 }
 0x19e   : > { %v4134_v26 = vadd.f32 -1.0, %v5010_v37  ;;  %v3243_v37 = vld [vmem:[%s5561_s11] sm:$0xff] }
 0x19f   : > { %5015 = vpow2.f32 %v835_v9  ;;  %v771_v41 = vmin.f32 %v667_v16, 0.0  ;;  %vm734_vm13 = vcmp.gt.f32.partialorder %v667_v16, 0.0  ;;  %v3244_v9 = vld [vmem:[%s5561_s11 + $0x8] sm:$0xff] }
 0x1a0   : > { %v671_v36 = vpop.f32.mrb[60].mxu0  ;;  %v915_v34 = vsel %vm730_vm9, %v647_v40, %v4134_v26  ;;  %v4837_v21 = vpack.c.bf16 %v3244_v9, %v3243_v37  ;;  %v938_v37 = vld [vmem:[%s8100_s2 + $0x58] sm:$0xff]  ;;  %v941_v9 = vld [vmem:[%s8100_s2 + $0x70] sm:$0xff]  ;;  %vm3261_vm9 = vcmask 818176  }
 0x1a1   : > { %v5012_v39 = vpop.eup %5011  ;;  %v837_v49 = vmul.f32 1.442695, %v771_v41  ;;  %v5530_v22 = vadd.f32 %v5413_v60, %v671_v36  ;;  %v673_v23 = vpop.f32.mrb[61].mxu0  ;;  %v4782_v28 = vpack.c.bf16 %v915_v34, %v914_v33 }
 0x1a2   : > { %v4135_v55 = vadd.f32 -1.0, %v5012_v39  ;;  %4838 = vmatprep.subr.bf16.mxu0 %v4837_v21 }
 0x1a3   : > { %5017 = vpow2.f32 %v837_v49  ;;  %v772_v52 = vmin.f32 %v5530_v22, 0.0  ;;  %4783 = vmatprep.subr.bf16.mxu1 %v4782_v28  ;;  %vm735_vm14 = vcmp.gt.f32.partialorder %v5530_v22, 0.0  ;;  %4840 = vmatpush3.bf16.msra.mxu0 %v4837_v21  ;;  %v947_v21 = vld [vmem:[%s8100_s2 + $0xa0] sm:$0xff] }
 0x1a4   : > { %v676_v27 = vpop.f32.mrb[62].mxu0  ;;  %4785 = vmatpush3.bf16.msra.mxu1 %v4784_v48  ;;  %v916_v58 = vsel %vm731_vm10, %v5510_v50, %v4135_v55  ;;  %vm1366_vm10 = vcmask 1046528  }
 0x1a5   : > { %v5014_v54 = vpop.eup %5013  ;;  %v839_v44 = vmul.f32 1.442695, %v772_v52  ;;  %v677_v40 = vadd.f32 %v5413_v60, %v676_v27  ;;  %v678_v59 = vpop.f32.mrb[63].mxu0 }
 0x1a6   : > { %v4136_v61 = vadd.f32 -1.0, %v5014_v54  ;;  %v934_v54 = vld [vmem:[%s8100_s2 + $0x38] sm:$0xff] }
 0x1a7   : > { %5019 = vpow2.f32 %v839_v44  ;;  %v773_v62 = vmin.f32 %v677_v40, 0.0  ;;  %vm736_vm15 = vcmp.gt.f32.partialorder %v677_v40, 0.0 }
 0x1a8   : > { %v681_v2 = vpop.f32.mrb[64].mxu0  ;;  %v917_v3 = vsel %vm732_vm11, %v657_v46, %v4136_v61  ;;  %v937_v61 = vld [vmem:[%s8100_s2 + $0x50] sm:$0xff]  ;;  %vm1452_vm11 = vcmask 1045504  }
 0x1a9   : > { %v5016_v7 = vpop.eup %5015  ;;  %v841_v51 = vmul.f32 1.442695, %v773_v62  ;;  %v5540_v42 = vadd.f32 %v5413_v60, %v681_v2  ;;  %v683_v43 = vpop.f32.mrb[65].mxu0  ;;  %v4786_v48 = vpack.c.bf16 %v917_v3, %v916_v58  ;;  %v936_v3 = vld [vmem:[%s8100_s2 + $0x48] sm:$0xff] }
 0x1aa   : > { %v4137_v10 = vadd.f32 -1.0, %v5016_v7 }
 0x1ab   : > { %5021 = vpow2.f32 %v841_v51  ;;  %v774_v56 = vmin.f32 %v5540_v42, 0.0  ;;  %4787 = vmatprep.subr.bf16.mxu1 %v4786_v48  ;;  %vm737_vm0 = vcmp.gt.f32.partialorder %v5540_v42, 0.0  ;;  %v939_v48 = vld [vmem:[%s8100_s2 + $0x60] sm:$0xff] }
 0x1ac   : > { %v686_v12 = vpop.f32.mrb[66].mxu0  ;;  %4789 = vmatpush3.bf16.msra.mxu1 %v4788_v8  ;;  %v918_v17 = vsel %vm733_vm12, %v5520_v5, %v4137_v10  ;;  %v943_v10 = vld [vmem:[%s8100_s2 + $0x80] sm:$0xff]  ;;  %vm1538_vm12 = vcmask 1044480  }
 0x1ad   : > { %v5018_v13 = vpop.eup %5017  ;;  %v843_v50 = vmul.f32 1.442695, %v774_v56  ;;  %v687_v14 = vadd.f32 %v5413_v60, %v686_v12  ;;  %v688_v53 = vpop.f32.mrb[67].mxu0  ;;  %v8109_v12 = vmov 0.0  }
 0x1ae   : > { %v4138_v46 = vadd.f32 -1.0, %v5018_v13  ;;  %v942_v13 = vld [vmem:[%s8100_s2 + $0x78] sm:$0xff]  ;;  %v949_v53 = vld [vmem:[%s8100_s2 + $0xb0] sm:$0xff] }
 0x1af   : > { %5023 = vpow2.f32 %v843_v50  ;;  %v775_v15 = vmin.f32 %v687_v14, 0.0  ;;  %vm738_vm1 = vcmp.gt.f32.partialorder %v687_v14, 0.0  ;;  %v946_v50 = vld [vmem:[%s8100_s2 + $0x98] sm:$0xff] }
 0x1b0   : > { %v691_v18 = vpop.f32.mrb[68].mxu0  ;;  %v919_v19 = vsel %vm734_vm13, %v667_v16, %v4138_v46  ;;  %v948_v46 = vld [vmem:[%s8100_s2 + $0xa8] sm:$0xff]  ;;  %vm1710_vm13 = vcmask 1042432  }
 0x1b1   : > { %v5020_v24 = vpop.eup %5019  ;;  %v845_v25 = vmul.f32 1.442695, %v775_v15  ;;  %v5550_v63 = vadd.f32 %v5413_v60, %v691_v18  ;;  %v693_v0 = vpop.f32.mrb[69].mxu0  ;;  %v4790_v8 = vpack.c.bf16 %v919_v19, %v918_v17  ;;  %v952_v15 = vld [vmem:[%s8100_s2 + $0xc8] sm:$0xff]  ;;  %v951_v18 = vld [vmem:[%s8100_s2 + $0xc0] sm:$0xff]  ;;  %v954_v19 = vld [vmem:[%s8100_s2 + $0xd8] sm:$0xff] }
 0x1b2   : > { %v4139_v4 = vadd.f32 -1.0, %v5020_v24  ;;  %v955_v17 = vld [vmem:[%s8100_s2 + $0xe0] sm:$0xff]  ;;  %v958_v24 = vld [vmem:[%s8100_s2 + $0xf8] sm:$0xff]  ;;  %v960_v0 = vld [vmem:[%s8100_s2 + $0x108] sm:$0xff] }
 0x1b3   : > { %5025 = vpow2.f32 %v845_v25  ;;  %v776_v29 = vmin.f32 %v5550_v63, 0.0  ;;  %4791 = vmatprep.subr.bf16.mxu1 %v4790_v8  ;;  %vm739_vm2 = vcmp.gt.f32.partialorder %v5550_v63, 0.0  ;;  %v957_v25 = vld [vmem:[%s8100_s2 + $0xf0] sm:$0xff]  ;;  %v964_v8 = vld [vmem:[%s8100_s2 + $0x128] sm:$0xff] }
 0x1b4   : > { %v696_v6 = vpop.f32.mrb[70].mxu0  ;;  %4793 = vmatpush3.bf16.msra.mxu1 %v4792_v30  ;;  %v920_v30 = vsel %vm735_vm14, %v5530_v22, %v4139_v4  ;;  %v927_v22 = vld [vmem:[%s8100_s2] sm:$0xff]  ;;  %vm1881_vm14 = vcmask 1040384  }
 0x1b5   : > { %v5022_v5 = vpop.eup %5021  ;;  %v847_v11 = vmul.f32 1.442695, %v776_v29  ;;  %v697_v31 = vadd.f32 %v5413_v60, %v696_v6  ;;  %v698_v32 = vpop.f32.mrb[71].mxu0  ;;  %v963_v29 = vld [vmem:[%s8100_s2 + $0x120] sm:$0xff]  ;;  %v966_v6 = vld [vmem:[%s8100_s2 + $0x138] sm:$0xff] }
 0x1b6   : > { %v4140_v35 = vadd.f32 -1.0, %v5022_v5  ;;  %v967_v4 = vld [vmem:[%s8100_s2 + $0x140] sm:$0xff]  ;;  %v970_v5 = vld [vmem:[%s8100_s2 + $0x158] sm:$0x7f]  ;;  %v932_v32 = vld [vmem:[%s8100_s2 + $0x28] sm:$0xff] }
 0x1b7   : > { %5027 = vpow2.f32 %v847_v11  ;;  %v777_v20 = vmin.f32 %v697_v31, 0.0  ;;  %vm740_vm3 = vcmp.gt.f32.partialorder %v697_v31, 0.0  ;;  %v969_v11 = vld [vmem:[%s8100_s2 + $0x150] sm:$0x7f] }
 0x1b8   : > { %v921_v16 = vsel %vm736_vm15, %v677_v40, %v4140_v35  ;;  %v701_v38 = vpop.f32.mrb[72].mxu0  ;;  %v933_v40 = vld [vmem:[%s8100_s2 + $0x30] sm:$0xff]  ;;  %v935_v35 = vld [vmem:[%s8100_s2 + $0x40] sm:$0xff]  ;;  %vm2567_vm15 = vcmask 130048  }
 0x1b9   : > { %v5024_v26 = vpop.eup %5023  ;;  %v849_v41 = vmul.f32 1.442695, %v777_v20  ;;  %v4794_v36 = vpack.c.bf16 %v921_v16, %v920_v30  ;;  %v702_v33 = vadd.f32 %v5413_v60, %v701_v38  ;;  %v703_v34 = vpop.f32.mrb[73].mxu0  ;;  %v931_v60 = vld [vmem:[%s8100_s2 + $0x20] sm:$0xff]  ;;  %v944_v20 = vld [vmem:[%s8100_s2 + $0x88] sm:$0xff]  ;;  %v950_v30 = vld [vmem:[%s8100_s2 + $0xb8] sm:$0xff] }
 0x1ba   : > { %v4141_v39 = vadd.f32 -1.0, %v5024_v26  ;;  %v953_v16 = vld [vmem:[%s8100_s2 + $0xd0] sm:$0xff]  ;;  %v3246_v26 = vld [vmem:[%s5561_s11 + $0x18] sm:$0xff] }
 0x1bb   : > { %5029 = vpow2.f32 %v849_v41  ;;  %4795 = vmatprep.subr.bf16.mxu1 %v4794_v36  ;;  %v778_v49 = vmin.f32 %v702_v33, 0.0  ;;  %vm741_vm4 = vcmp.gt.f32.partialorder %v702_v33, 0.0  ;;  %v3245_v38 = vld [vmem:[%s5561_s11 + $0x10] sm:$0xff]  ;;  %v956_v36 = vld [vmem:[%s8100_s2 + $0xe8] sm:$0xff]  ;;  %v962_v34 = vld [vmem:[%s8100_s2 + $0x118] sm:$0xff] }
 0x1bc   : > { %4797 = vmatpush3.bf16.msra.mxu1 %v4796_v57  ;;  %v922_v52 = vsel %vm737_vm0, %v5540_v42, %v4141_v39  ;;  %v940_v42 = vld [vmem:[%s8100_s2 + $0x68] sm:$0xff]  ;;  %v4841_v41 = vpack.c.bf16 %v3246_v26, %v3245_v38  ;;  %v965_v39 = vld [vmem:[%s8100_s2 + $0x130] sm:$0xff] }
 0x1bd   : > { %v5026_v23 = vpop.eup %5025  ;;  %4798 = vmatprep.subr.bf16.mxu1 %v8107_v1  ;;  %v851_v28 = vmul.f32 1.442695, %v778_v49  ;;  %v968_v49 = vld [vmem:[%s8100_s2 + $0x148] sm:$0xff] }
 0x1be   : > { %v4142_v55 = vadd.f32 -1.0, %v5026_v23  ;;  %4842 = vmatprep.subr.bf16.mxu0 %v4841_v41  ;;  %v3247_v23 = vld [vmem:[%s5561_s11 + $0x20] sm:$0xff] }
 0x1bf   : > { %1087 = vmatmul.mubr.f32.vlgmr.msra.gmra.mrb[0].mxu1 %v927_v22  ;;  %5031 = vpow2.f32 %v851_v28  ;;  %4844 = vmatpush3.bf16.msra.mxu0 %v4841_v41  ;;  %v971_v22 = vld [vmem:[%s8100_s2 + $0x160] sm:$0x7f] }
 0x1c0   : > { %v923_v45 = vsel %vm738_vm1, %v687_v14, %v4142_v55  ;;  %1091 = vmatprep.mubr.f32.mxu1 %v931_v60  ;;  %v945_v14 = vld [vmem:[%s8100_s2 + $0x90] sm:$0xff]  ;;  %v3248_v60 = vld [vmem:[%s5561_s11 + $0x28] sm:$0xff]  ;;  %v3250_v55 = vld [vmem:[%s5561_s11 + $0x38] sm:$0xff] }
 0x1c1   : > { %v5028_v57 = vpop.eup %5027  ;;  %v4799_v27 = vpack.c.bf16 %v923_v45, %v922_v52  ;;  %v4845_v28 = vpack.c.bf16 %v3248_v60, %v3247_v23  ;;  %v3249_v52 = vld [vmem:[%s5561_s11 + $0x30] sm:$0xff]  ;;  %v1302_v60 = vld [vmem:[%s5144_s12 + $0x100] sm:$0xff] }
 0x1c2   : > { %v4143_v44 = vadd.f32 -1.0, %v5028_v57  ;;  %v2560_v45 = vld [vmem:[%s5144_s12 + $0x110] sm:$0xff]  ;;  %v2561_v57 = vld [vmem:[%s5144_s12 + $0x118] sm:$0xff] }
 0x1c3   : > { %1092 = vmatmul.mubr.f32.gmra.mrb[2].mxu1 %v930_v47  ;;  %4846 = vmatprep.subr.bf16.mxu0 %v4845_v28  ;;  %v4849_v47 = vpack.c.bf16 %v3250_v55, %v3249_v52 }
 0x1c4   : > { %4800 = vmatpush3.bf16.msra.mxu1 %v4799_v27  ;;  %1096 = vmatprep.mubr.f32.mxu1 %v934_v54  ;;  %v924_v62 = vsel %vm739_vm2, %v5550_v63, %v4143_v44  ;;  %v961_v63 = vld [vmem:[%s8100_s2 + $0x110] sm:$0xff]  ;;  %v4805_v27 = vpack.c.bf16 %v2561_v57, %v2560_v45  ;;  %v3251_v54 = vld [vmem:[%s5561_s11 + $0x40] sm:$0xff]  ;;  %v3252_v44 = vld [vmem:[%s5561_s11 + $0x48] sm:$0xff] }
 0x1c5   : > { %v5030_v59 = vpop.eup %5029  ;;  %4801 = vmatprep.subr.bf16.mxu1 %v8107_v1  ;;  %4848 = vmatpush3.bf16.msra.mxu0 %v4845_v28 }
 0x1c6   : > { %v4144_v2 = vadd.f32 -1.0, %v5030_v59  ;;  %4850 = vmatprep.subr.bf16.mxu0 %v4849_v47  ;;  %v3253_v59 = vld [vmem:[%s5561_s11 + $0x50] sm:$0xff] }
 0x1c7   : > { %1097 = vmatmul.mubr.f32.gmra.mrb[4].mxu1 %v933_v40  ;;  %v4853_v40 = vpack.c.bf16 %v3252_v44, %v3251_v54  ;;  %v1303_v54 = vld [vmem:[%s5144_s12 + $0x108] sm:$0xff] }
 0x1c8   : > { %v925_v58 = vsel %vm740_vm3, %v697_v31, %v4144_v2  ;;  %1101 = vmatprep.mubr.f32.mxu1 %v937_v61  ;;  %v929_v31 = vld [vmem:[%s8100_s2 + $0x10] sm:$0xff]  ;;  %v3254_v61 = vld [vmem:[%s5561_s11 + $0x58] sm:$0xff] }
 0x1c9   : > { %v5032_v7 = vpop.eup %5031  ;;  %v4802_v51 = vpack.c.bf16 %v925_v58, %v924_v62  ;;  %4852 = vmatpush3.bf16.msra.mxu0 %v4849_v47  ;;  %v4857_v62 = vpack.c.bf16 %v3254_v61, %v3253_v59 }
 0x1ca   : > { %v4145_v43 = vadd.f32 -1.0, %v5032_v7  ;;  %4854 = vmatprep.subr.bf16.mxu0 %v4853_v40 }
 0x1cb   : > { %1102 = vmatmul.mubr.f32.gmra.mrb[6].mxu1 %v936_v3 }
 0x1cc   : > { %4803 = vmatpush3.bf16.msra.mxu1 %v4802_v51  ;;  %1106 = vmatprep.mubr.f32.mxu1 %v940_v42  ;;  %v926_v56 = vsel %vm741_vm4, %v702_v33, %v4145_v43  ;;  %v959_v33 = vld [vmem:[%s8100_s2 + $0x100] sm:$0xff]  ;;  %vm3602_vm4 = vcmask 916480  }
 0x1cd   : > { %4448 = vmatprep.subr.mxu1 %v8109_v12  ;;  %4856 = vmatpush3.bf16.msra.mxu0 %v4853_v40  ;;  %v3255_v43 = vld [vmem:[%s5561_s11 + $0x60] sm:$0xf] }
 0x1ce   : > { %4858 = vmatprep.subr.bf16.mxu0 %v4857_v62 }
 0x1cf   : > { %1107 = vmatmul.mubr.f32.gmra.mrb[8].mxu1 %v939_v48 }
 0x1d0   : > { %1111 = vmatprep.mubr.f32.mxu1 %v943_v10  ;;  %4449 = vmatpush3.msk.msra.mxu1 %vm1018_vm5, %v926_v56 }
 0x1d1   : > { %4804 = vmatprep.subr.bf16.mxu1 %v8107_v1  ;;  %4860 = vmatpush3.bf16.msra.mxu0 %v4857_v62 }
 0x1d2   : > { %4619 = vmatprep.subr.msk.mxu0 %vm1624_vm8, %v3255_v43 }
 0x1d3   : > { %1112 = vmatmul.mubr.f32.gmra.mrb[10].mxu1 %v942_v13 }
 0x1d4   : > { %1116 = vmatprep.mubr.f32.mxu1 %v946_v50 }
 0x1d5   : > { %4620 = vmatpush3.msk.msra.mxu0 %vm1624_vm8, %v3255_v43 }
 0x1d6   : > { %4861 = vmatprep.subr.bf16.mxu0 %v8107_v1 }
 0x1d7   : > { %1117 = vmatmul.mubr.f32.gmra.mrb[12].mxu1 %v945_v14 }
 0x1d8   : > { %1121 = vmatprep.mubr.f32.mxu1 %v949_v53 }
 0x1db   : > { %1122 = vmatmul.mubr.f32.gmra.mrb[14].mxu1 %v948_v46 }
 0x1dc   : > { %1126 = vmatprep.mubr.f32.mxu1 %v952_v15 }
 0x1df   : > { %1127 = vmatmul.mubr.f32.gmra.mrb[16].mxu1 %v951_v18 }
 0x1e0   : > { %1131 = vmatprep.mubr.f32.mxu1 %v955_v17 }
 0x1e3   : > { %1132 = vmatmul.mubr.f32.gmra.mrb[18].mxu1 %v954_v19 }
 0x1e4   : > { %1136 = vmatprep.mubr.f32.mxu1 %v958_v24 }
 0x1e7   : > { %1137 = vmatmul.mubr.f32.gmra.mrb[20].mxu1 %v957_v25 }
 0x1e8   : > { %1141 = vmatprep.mubr.f32.mxu1 %v961_v63 }
 0x1eb   : > { %1142 = vmatmul.mubr.f32.gmra.mrb[22].mxu1 %v960_v0 }
 0x1ec   : > { %1146 = vmatprep.mubr.f32.mxu1 %v964_v8 }
 0x1ef   : > { %1147 = vmatmul.mubr.f32.gmra.mrb[24].mxu1 %v963_v29 }
 0x1f0   : > { %1151 = vmatprep.mubr.f32.mxu1 %v967_v4 }
 0x1f3   : > { %1152 = vmatmul.mubr.f32.gmra.mrb[26].mxu1 %v966_v6 }
 0x1f4   : > { %1156 = vmatprep.mubr.f32.mxu1 %v970_v5 }
 0x1f7   : > { %1157 = vmatmul.mubr.f32.gmra.mrb[28].mxu1 %v969_v11 }
 0x1f8   : > { %4450 = vmatprep.mubr.msk.f32.mxu1 %vm5079_vm6, %v8109_v12 }
 0x1fb   : > { %4451 = vmatmul.mubr.msk.f32.vlgmr.msra.gmra.mrb[30].mxu1 %vm972_vm7, %v929_v31 }
 0x1fc   : > { %4453 = vmatprep.mubr.msk.f32.mxu1 %vm5079_vm6, %v8109_v12  ;;  %4806 = vmatpush3.bf16.msra.mxu1 %v4805_v27 }
 0x1fd   : > { %4807 = vmatprep.subr.bf16.mxu1 %v8107_v1 }
 0x1ff   : > { %4454 = vmatmul.mubr.msk.f32.gmra.mrb[32].mxu1 %vm972_vm7, %v932_v32 }
 0x200   : > { %4456 = vmatprep.mubr.msk.f32.mxu1 %vm5079_vm6, %v8109_v12 }
 0x203   : > { %4457 = vmatmul.mubr.msk.f32.gmra.mrb[34].mxu1 %vm972_vm7, %v935_v35 }
 0x204   : > { %4459 = vmatprep.mubr.msk.f32.mxu1 %vm5079_vm6, %v8109_v12 }
 0x207   : > { %4460 = vmatmul.mubr.msk.f32.gmra.mrb[36].mxu1 %vm972_vm7, %v938_v37 }
 0x208   : > { %4462 = vmatprep.mubr.msk.f32.mxu1 %vm5079_vm6, %v8109_v12 }
 0x20b   : > { %4463 = vmatmul.mubr.msk.f32.gmra.mrb[38].mxu1 %vm972_vm7, %v941_v9 }
 0x20c   : > { %4465 = vmatprep.mubr.msk.f32.mxu1 %vm5079_vm6, %v8109_v12 }
 0x20f   : > { %4466 = vmatmul.mubr.msk.f32.gmra.mrb[40].mxu1 %vm972_vm7, %v944_v20 }
 0x210   : > { %4468 = vmatprep.mubr.msk.f32.mxu1 %vm5079_vm6, %v8109_v12 }
 0x213   : > { %4469 = vmatmul.mubr.msk.f32.gmra.mrb[42].mxu1 %vm972_vm7, %v947_v21 }
 0x214   : > { %4471 = vmatprep.mubr.msk.f32.mxu1 %vm5079_vm6, %v8109_v12 }
 0x217   : > { %4472 = vmatmul.mubr.msk.f32.gmra.mrb[44].mxu1 %vm972_vm7, %v950_v30  ;;  %v1304_v30 = vlaneseq }
 0x218   : > { %4474 = vmatprep.mubr.msk.f32.mxu1 %vm5079_vm6, %v8109_v12 }
 0x219   : > { %v1305_v41 = vshrl.u32 %v1304_v30, 7 }
 0x21b   : > { %4475 = vmatmul.mubr.msk.f32.gmra.mrb[46].mxu1 %vm972_vm7, %v953_v16  ;;  %v1422_v28 = vsub.s32 2, %v1305_v41  ;;  %v1508_v52 = vsub.s32 3, %v1305_v41  ;;  %v1594_v55 = vsub.s32 4, %v1305_v41  ;;  %v1680_v45 = vsub.s32 5, %v1305_v41 }
 0x21c   : > { %4477 = vmatprep.mubr.msk.f32.mxu1 %vm5079_vm6, %v8109_v12  ;;  %v1766_v47 = vsub.s32 6, %v1305_v41  ;;  %v1851_v57 = vsub.s32 7, %v1305_v41 }
 0x21d   : > { %v5816_v62 = vrot.slane %v1302_v60, %v1422_v28 }
 0x21e   : > { %v5826_v43 = vrot.slane %v1302_v60, %v1851_v57 }
 0x21f   : > { %4478 = vmatmul.mubr.msk.f32.gmra.mrb[48].mxu1 %vm972_vm7, %v956_v36 }
 0x220   : > { %4480 = vmatprep.mubr.msk.f32.mxu1 %vm5079_vm6, %v8109_v12 }
 0x223   : > { %4481 = vmatmul.mubr.msk.f32.gmra.mrb[50].mxu1 %vm972_vm7, %v959_v33 }
 0x224   : > { %4483 = vmatprep.mubr.msk.f32.mxu1 %vm5079_vm6, %v8109_v12 }
 0x227   : > { %4484 = vmatmul.mubr.msk.f32.gmra.mrb[52].mxu1 %vm972_vm7, %v962_v34  ;;  %v3213_v34 = vld [vmem:[%s8099_s1] sm:$0xff] }
 0x228   : > { %4486 = vmatprep.mubr.msk.f32.mxu1 %vm5079_vm6, %v8109_v12  ;;  %4621 = vmatprep.mubr.msk.f32.mxu0 %vm3261_vm9, %v3213_v34 }
 0x22b   : > { %4487 = vmatmul.mubr.msk.f32.gmra.mrb[54].mxu1 %vm972_vm7, %v965_v39 }
 0x22c   : > { %4489 = vmatprep.mubr.msk.f32.mxu1 %vm5079_vm6, %v8109_v12 }
 0x22f   : > { %4490 = vmatmul.mubr.msk.f32.gmra.mrb[56].mxu1 %vm972_vm7, %v968_v49  ;;  %v1306_v49 = vsub.s32 0, %v1305_v41 }
 0x230   : > { %4492 = vmatprep.mubr.msk.f32.mxu1 %vm5079_vm6, %v8109_v12 }
 0x231   : > { %v5810_v40 = vrot.slane %v1302_v60, %v1306_v49 }
 0x233   : > { %4493 = vmatmul.mubr.msk.f32.gmra.mrb[58].mxu1 %vm972_vm7, %v971_v22  ;;  %v1336_v22 = vsub.s32 1, %v1305_v41 }
 0x234   : > { %4499 = vmatprep.mubr.msk.f32.mxu1 %vm5079_vm6, %v8109_v12 }
 0x235   : > { %v5812_v59 = vrot.slane %v1302_v60, %v1336_v22 }
 0x292   : > { %v4267_v2 = vpop.f32.mrb[0].mxu1 }
 0x293   : > { %v4268_v58 = vpop.f32.mrb[1].mxu1 }
 0x294   : > { %v5772_v3 = vadd.f32 %v4268_v58, %v4267_v2  ;;  %v5818_v2 = vrot.slane %v1302_v60, %v1508_v52  ;;  %v5820_v58 = vrot.slane %v1302_v60, %v1594_v55 }
 0x296   : > { %v4270_v7 = vpop.f32.mrb[2].mxu1 }
 0x297   : > { %v4271_v51 = vpop.f32.mrb[3].mxu1 }
 0x298   : > { %v5774_v42 = vadd.f32 %v4271_v51, %v4270_v7  ;;  %v5822_v7 = vrot.slane %v1302_v60, %v1680_v45  ;;  %v5824_v51 = vrot.slane %v1302_v60, %v1766_v47  ;;  %v3215_v60 = vld [vmem:[%s8099_s1 + $0x10] sm:$0xff] }
 0x29a   : > { %v4273_v48 = vpop.f32.mrb[4].mxu1 }
 0x29b   : > { %v4274_v56 = vpop.f32.mrb[5].mxu1 }
 0x29c   : > { %v5780_v10 = vadd.f32 %v4274_v56, %v4273_v48  ;;  %v5828_v48 = vrot.slane %v1303_v54, %v1306_v49 }
 0x29e   : > { %v4276_v13 = vpop.f32.mrb[6].mxu1 }
 0x29f   : > { %v4277_v50 = vpop.f32.mrb[7].mxu1 }
 0x2a0   : > { %v5782_v14 = vadd.f32 %v4277_v50, %v4276_v13  ;;  %v5830_v13 = vrot.slane %v1303_v54, %v1336_v22  ;;  %v5832_v50 = vrot.slane %v1303_v54, %v1422_v28 }
 0x2a2   : > { %v4279_v53 = vpop.f32.mrb[8].mxu1 }
 0x2a3   : > { %v4280_v46 = vpop.f32.mrb[9].mxu1 }
 0x2a4   : > { %v5784_v15 = vadd.f32 %v4280_v46, %v4279_v53 }
 0x2a6   : > { %v4282_v18 = vpop.f32.mrb[10].mxu1 }
 0x2a7   : > { %v4283_v17 = vpop.f32.mrb[11].mxu1 }
 0x2a8   : > { %v5786_v19 = vadd.f32 %v4283_v17, %v4282_v18  ;;  %v5835_v18 = vrot.slane %v1303_v54, %v1508_v52  ;;  %v5837_v17 = vrot.slane %v1303_v54, %v1594_v55 }
 0x2aa   : > { %v4285_v24 = vpop.f32.mrb[12].mxu1 }
 0x2ab   : > { %v4286_v25 = vpop.f32.mrb[13].mxu1 }
 0x2ac   : > { %v5788_v63 = vadd.f32 %v4286_v25, %v4285_v24  ;;  %v5839_v24 = vrot.slane %v1303_v54, %v1680_v45  ;;  %v5841_v25 = vrot.slane %v1303_v54, %v1766_v47 }
 0x2ae   : > { %v4288_v0 = vpop.f32.mrb[14].mxu1 }
 0x2af   : > { %v4289_v8 = vpop.f32.mrb[15].mxu1 }
 0x2b0   : > { %v5790_v29 = vadd.f32 %v4289_v8, %v4288_v0  ;;  %v5843_v0 = vrot.slane %v1303_v54, %v1851_v57 }
 0x2b2   : > { %v4291_v4 = vpop.f32.mrb[16].mxu1 }
 0x2b3   : > { %v4292_v6 = vpop.f32.mrb[17].mxu1 }
 0x2b4   : > { %v5792_v5 = vadd.f32 %v4292_v6, %v4291_v4 }
 0x2b6   : > { %v4294_v11 = vpop.f32.mrb[18].mxu1 }
 0x2b7   : > { %v4295_v31 = vpop.f32.mrb[19].mxu1 }
 0x2b8   : > { %v5794_v32 = vadd.f32 %v4295_v31, %v4294_v11 }
 0x2ba   : > { %v4297_v35 = vpop.f32.mrb[20].mxu1 }
 0x2bb   : > { %v4298_v37 = vpop.f32.mrb[21].mxu1 }
 0x2bc   : > { %v5796_v9 = vadd.f32 %v4298_v37, %v4297_v35 }
 0x2be   : > { %v4300_v20 = vpop.f32.mrb[22].mxu1 }
 0x2bf   : > { %v4301_v21 = vpop.f32.mrb[23].mxu1 }
 0x2c0   : > { %v5798_v16 = vadd.f32 %v4301_v21, %v4300_v20 }
 0x2c2   : > { %v4303_v38 = vpop.f32.mrb[24].mxu1 }
 0x2c3   : > { %v4304_v26 = vpop.f32.mrb[25].mxu1 }
 0x2c4   : > { %v5800_v36 = vadd.f32 %v4304_v26, %v4303_v38 }
 0x2c6   : > { %8247 = vst [vmem:[#allocation2_spill] sm:$0xff] %v5800_v36  ;;  %v4306_v33 = vpop.f32.mrb[26].mxu1 }
 0x2c7   : > { %v4307_v39 = vpop.f32.mrb[27].mxu1 }
 0x2c8   : > { %v5806_v23 = vadd.f32 %v4307_v39, %v4306_v33  ;;  %v3214_v33 = vld [vmem:[%s8099_s1 + $0x8] sm:$0xff] }
 0x2c9   : > { %4622 = vmatmul.mubr.msk.f32.vlgmr.msra.gmra.mrb[74].mxu0 %vm3261_vm9, %v3214_v33 }
 0x2ca   : > { %8248 = vst [vmem:[#allocation3_spill] sm:$0xff] %v5806_v23  ;;  %v4309_v27 = vpop.f32.mrb[28].mxu1  ;;  %4624 = vmatprep.mubr.msk.f32.mxu0 %vm3261_vm9, %v3215_v60 }
 0x2cb   : > { %v4310_v44 = vpop.f32.mrb[29].mxu1 }
 0x2cc   : > { %v5814_v61 = vadd.f32 %v4310_v44, %v4309_v27 }
 0x2ce   : > { %8249 = vst [vmem:[#allocation4_spill] sm:$0xff] %v5814_v61  ;;  %v1228_v56 = vpop.f32.mrb[30].mxu1 }
 0x2cf   : > { %v1229_v53 = vadd.f32 %v5772_v3, %v1228_v56  ;;  %v4452_v46 = vpop.f32.mrb[31].mxu1 }
 0x2d1   : > { %v1308_v8 = vmul.f32 %v5810_v40, %v1229_v53  ;;  %v1338_v4 = vmul.f32 %v5812_v59, %v1229_v53  ;;  %v1424_v3 = vmul.f32 %v5816_v62, %v1229_v53  ;;  %v1510_v6 = vmul.f32 %v5818_v2, %v1229_v53 }
 0x2d2   : > { %v1596_v11 = vmul.f32 %v5820_v58, %v1229_v53  ;;  %v1682_v31 = vmul.f32 %v5822_v7, %v1229_v53  ;;  %v1768_v35 = vmul.f32 %v5824_v51, %v1229_v53  ;;  %v1853_v37 = vmul.f32 %v5826_v43, %v1229_v53  ;;  %v1233_v20 = vpop.f32.mrb[32].mxu1 }
 0x2d3   : > { %v1367_v21 = vrot.slane %v1338_v4, 1  ;;  %v1453_v30 = vrot.slane %v1424_v3, 2  ;;  %v1539_v38 = vrot.slane %v1510_v6, 3  ;;  %v5854_v26 = vadd.f32 %v5774_v42, %v1233_v20  ;;  %v4455_v41 = vpop.f32.mrb[33].mxu1 }
 0x2d4   : > { %v1625_v34 = vrot.slane %v1596_v11, 4  ;;  %v1711_v39 = vrot.slane %v1682_v31, 5  ;;  %v1796_v49 = vrot.slane %v1768_v35, 6  ;;  %v1882_v22 = vrot.slane %v1853_v37, 7 }
 0x2d5   : > { %v5865_v28 = vmul.f32 %v5812_v59, %v5854_v26  ;;  %v5869_v42 = vmul.f32 %v5816_v62, %v5854_v26  ;;  %v5873_v52 = vmul.f32 %v5818_v2, %v5854_v26  ;;  %v5877_v55 = vmul.f32 %v5820_v58, %v5854_v26 }
 0x2d6   : > { %v1238_v45 = vpop.f32.mrb[34].mxu1  ;;  %v5882_v47 = vmul.f32 %v5822_v7, %v5854_v26  ;;  %v5886_v57 = vmul.f32 %v5824_v51, %v5854_v26  ;;  %v5890_v27 = vmul.f32 %v5826_v43, %v5854_v26  ;;  %v5894_v54 = vmul.f32 %v5828_v48, %v5854_v26 }
 0x2d7   : > { %v5897_v44 = vadd.f32 %v5780_v10, %v1238_v45  ;;  %v4458_v56 = vpop.f32.mrb[35].mxu1  ;;  %v8117_v53 = vrot.slane %v5865_v28, 1  ;;  %v8116_v46 = vrot.slane %v5869_v42, 2  ;;  %v8115_v4 = vrot.slane %v5873_v52, 3 }
 0x2d8   : > { %v8114_v3 = vrot.slane %v5877_v55, 4  ;;  %v8113_v6 = vrot.slane %v5882_v47, 5  ;;  %v8112_v11 = vrot.slane %v5886_v57, 6  ;;  %v8111_v31 = vrot.slane %v5890_v27, 7 }
 0x2d9   : > { %v1369_v10 = vsel %vm1366_vm10, %v1367_v21, %v8117_v53  ;;  %v1455_v35 = vsel %vm1452_vm11, %v1453_v30, %v8116_v46  ;;  %v1541_v37 = vsel %vm1538_vm12, %v1539_v38, %v8115_v4  ;;  %v1969_v20 = vmul.f32 %v5830_v13, %v5854_v26 }
 0x2da   : > { %v1243_v41 = vpop.f32.mrb[36].mxu1  ;;  %v1407_v33 = vadd.f32 %v1369_v10, %v1308_v8  ;;  %v1627_v60 = vsel %vm1624_vm8, %v1625_v34, %v8114_v3  ;;  %v1713_v21 = vsel %vm1710_vm13, %v1711_v39, %v8113_v6  ;;  %v1798_v30 = vsel %vm1018_vm5, %v1796_v49, %v8112_v11 }
 0x2db   : > { %v5927_v45 = vadd.f32 %v5782_v14, %v1243_v41  ;;  %v4461_v38 = vpop.f32.mrb[37].mxu1  ;;  %v1884_v8 = vsel %vm1881_vm14, %v1882_v22, %v8111_v31  ;;  %v5934_v56 = vmul.f32 %v5830_v13, %v5897_v44  ;;  %v1997_v34 = vrot.slane %v1969_v20, 1 }
 0x2dc   : > { %v1493_v10 = vadd.f32 %v1455_v35, %v1407_v33  ;;  %v2054_v39 = vmul.f32 %v5832_v50, %v5854_v26  ;;  %v5940_v49 = vmul.f32 %v5832_v50, %v5897_v44  ;;  %v2139_v14 = vmul.f32 %v5835_v18, %v5854_v26 }
 0x2dd   : > { %v8120_v41 = vrot.slane %v5934_v56, 1  ;;  %v5947_v22 = vmul.f32 %v5835_v18, %v5897_v44  ;;  %v2224_v20 = vmul.f32 %v5837_v17, %v5854_v26  ;;  %v5953_v35 = vmul.f32 %v5837_v17, %v5897_v44 }
 0x2de   : > { %v1248_v33 = vpop.f32.mrb[38].mxu1  ;;  %v1579_v38 = vadd.f32 %v1541_v37, %v1493_v10  ;;  %v2082_v1 = vrot.slane %v2054_v39, 2  ;;  %v8119_v12 = vrot.slane %v5940_v49, 2  ;;  %v2167_v31 = vrot.slane %v2139_v14, 3 }
 0x2df   : > { %v5957_v11 = vadd.f32 %v5784_v15, %v1248_v33  ;;  %v4464_v6 = vpop.f32.mrb[39].mxu1  ;;  %v1999_v3 = vsel %vm1366_vm10, %v1997_v34, %v8120_v41  ;;  %v8118_v4 = vrot.slane %v5947_v22, 3  ;;  %v2252_v46 = vrot.slane %v2224_v20, 4 }
 0x2e0   : > { %v1665_v53 = vadd.f32 %v1627_v60, %v1579_v38  ;;  %v2084_v37 = vsel %vm1452_vm11, %v2082_v1, %v8119_v12  ;;  %v8121_v10 = vrot.slane %v5953_v35, 4  ;;  %v2309_v39 = vmul.f32 %v5839_v24, %v5854_v26  ;;  %v3216_v38 = vld [vmem:[%s8099_s1 + $0x18] sm:$0xff] }
 0x2e1   : > { %8250 = vst [vmem:[#allocation5_spill] sm:$0xff] %v5957_v11  ;;  %v5972_v15 = vsel %vm1538_vm12, %v2167_v31, %v8118_v4  ;;  %v5976_v6 = vmul.f32 %v5839_v24, %v5897_v44  ;;  %v2394_v60 = vmul.f32 %v5841_v25, %v5854_v26  ;;  %v5982_v1 = vmul.f32 %v5841_v25, %v5897_v44 }
 0x2e2   : > { %v1253_v34 = vpop.f32.mrb[40].mxu1  ;;  %v1751_v14 = vadd.f32 %v1713_v21, %v1665_v53  ;;  %v5987_v20 = vsel %vm1624_vm8, %v2252_v46, %v8121_v10  ;;  %v2337_v31 = vrot.slane %v2309_v39, 5  ;;  %v2479_v33 = vmul.f32 %v5843_v0, %v5854_v26  ;;  %4625 = vmatmul.mubr.msk.f32.gmra.mrb[76].mxu0 %vm3261_vm9, %v3216_v38  ;;  %v3217_v46 = vld [vmem:[%s8099_s1 + $0x20] sm:$0xff] }
 0x2e3   : > { %v5995_v4 = vadd.f32 %v5786_v19, %v1253_v34  ;;  %v4467_v12 = vpop.f32.mrb[41].mxu1  ;;  %v8123_v41 = vrot.slane %v5976_v6, 5  ;;  %v2422_v53 = vrot.slane %v2394_v60, 6  ;;  %v8122_v21 = vrot.slane %v5982_v1, 6  ;;  %4627 = vmatprep.mubr.msk.f32.mxu0 %vm3261_vm9, %v3217_v46 }
 0x2e4   : > { %v1836_v39 = vadd.f32 %v1798_v30, %v1751_v14  ;;  %v6005_v10 = vmul.f32 %v5843_v0, %v5897_v44  ;;  %v2507_v61 = vrot.slane %v2479_v33, 7  ;;  %v1309_v12 = vmul.f32 %v5810_v40, %v5854_v26 }
 0x2e5   : > { %8251 = vst [vmem:[#allocation6_spill] sm:$0xff] %v5995_v4  ;;  %v2339_v19 = vsel %vm1710_vm13, %v2337_v31, %v8123_v41  ;;  %v6016_v60 = vsel %vm1018_vm5, %v2422_v53, %v8122_v21  ;;  %v6020_v30 = vmul.f32 %v5812_v59, %v5897_v44  ;;  %v6024_v34 = vmul.f32 %v5816_v62, %v5897_v44 }
 0x2e6   : > { %v1258_v26 = vpop.f32.mrb[42].mxu1  ;;  %v1922_v14 = vadd.f32 %v1884_v8, %v1836_v39  ;;  %v8126_v33 = vrot.slane %v6005_v10, 7  ;;  %v6029_v31 = vmul.f32 %v5818_v2, %v5897_v44  ;;  %v6033_v38 = vmul.f32 %v5820_v58, %v5897_v44 }
 0x2e7   : > { %v6036_v53 = vadd.f32 %v5788_v63, %v1258_v26  ;;  %v4470_v46 = vpop.f32.mrb[43].mxu1  ;;  %v8127_v21 = vrot.slane %v6020_v30, 1  ;;  %v8128_v41 = vrot.slane %v6024_v34, 2  ;;  %v6042_v8 = vmul.f32 %v5822_v7, %v5897_v44 }
 0x2e8   : > { %v1952_v39 = vadd.f32 %v5894_v54, %v1922_v14  ;;  %v6048_v4 = vsel %vm1881_vm14, %v2507_v61, %v8126_v33  ;;  %v8253_v26 = vrot.slane %v5865_v28, 1  ;;  %v6065_v61 = vmul.f32 %v5824_v51, %v5897_v44 }
 0x2e9   : > { %8252 = vst [vmem:[#allocation7_spill] sm:$0xff] %v6036_v53  ;;  %v8254_v53 = vrot.slane %v5869_v42, 2  ;;  %v8255_v36 = vrot.slane %v6029_v31, 3  ;;  %v8256_v28 = vrot.slane %v5873_v52, 3  ;;  %v8258_v42 = vrot.slane %v5877_v55, 4 }
 0x2ea   : > { %v1371_v46 = vsel %vm1366_vm10, %v8253_v26, %v8127_v21  ;;  %v1263_v33 = vpop.f32.mrb[44].mxu1  ;;  %v2037_v63 = vadd.f32 %v1999_v3, %v1952_v39  ;;  %v8257_v21 = vrot.slane %v6033_v38, 4  ;;  %v8259_v11 = vrot.slane %v6042_v8, 5 }
 0x2eb   : > { %v1457_v54 = vsel %vm1452_vm11, %v8254_v53, %v8128_v41  ;;  %v1408_v23 = vadd.f32 %v1371_v46, %v1309_v12  ;;  %v1543_v26 = vsel %vm1538_vm12, %v8256_v28, %v8255_v36  ;;  %v6078_v41 = vadd.f32 %v5790_v29, %v1263_v33  ;;  %v4473_v14 = vpop.f32.mrb[45].mxu1 }
 0x2ec   : > { %v1629_v53 = vsel %vm1624_vm8, %v8258_v42, %v8257_v21  ;;  %v8260_v3 = vrot.slane %v5882_v47, 5  ;;  %v8130_v52 = vrot.slane %v6065_v61, 6  ;;  %v6088_v36 = vmul.f32 %v5826_v43, %v5897_v44 }
 0x2ed   : > { %v2122_v39 = vadd.f32 %v2084_v37, %v2037_v63  ;;  %v1494_v55 = vadd.f32 %v1457_v54, %v1408_v23  ;;  %v1940_v21 = vmul.f32 %v5828_v48, %v5897_v44  ;;  %v6094_v29 = vmul.f32 %v5830_v13, %v5927_v45 }
 0x2ee   : > { %v1715_v12 = vsel %vm1710_vm13, %v8260_v3, %v8259_v11  ;;  %v8261_v47 = vrot.slane %v5886_v57, 6  ;;  %v8141_v33 = vrot.slane %v6088_v36, 7  ;;  %v6104_v37 = vmul.f32 %v5832_v50, %v5927_v45  ;;  %v1268_v63 = vpop.f32.mrb[46].mxu1 }
 0x2ef   : > { %v6108_v23 = vmul.f32 %v5835_v18, %v5927_v45  ;;  %v2207_v46 = vadd.f32 %v5972_v15, %v2122_v39  ;;  %v1580_v54 = vadd.f32 %v1543_v26, %v1494_v55  ;;  %v8136_v14 = vrot.slane %v6094_v29, 1  ;;  %v4476_v42 = vpop.f32.mrb[47].mxu1 }
 0x2f0   : > { %v1800_v11 = vsel %vm1018_vm5, %v8261_v47, %v8130_v52  ;;  %v6114_v57 = vmul.f32 %v5837_v17, %v5927_v45  ;;  %v6117_v28 = vadd.f32 %v5792_v5, %v1268_v63  ;;  %v8262_v3 = vrot.slane %v5890_v27, 7 }
 0x2f1   : > { %v8133_v52 = vrot.slane %v6104_v37, 2  ;;  %v8131_v15 = vrot.slane %v6108_v23, 3  ;;  %v2292_v26 = vadd.f32 %v5987_v20, %v2207_v46  ;;  %v1666_v39 = vadd.f32 %v1629_v53, %v1580_v54 }
 0x2f2   : > { %v1886_v47 = vsel %vm1881_vm14, %v8262_v3, %v8141_v33  ;;  %v8263_v55 = vrot.slane %v5934_v56, 1  ;;  %v8132_v63 = vrot.slane %v6114_v57, 4  ;;  %v8264_v27 = vrot.slane %v5940_v49, 2  ;;  %v3218_v49 = vld [vmem:[%s8099_s1 + $0x28] sm:$0xff]  ;;  %v1273_v46 = vpop.f32.mrb[48].mxu1 }
 0x2f3   : > { %v8265_v3 = vrot.slane %v5947_v22, 3  ;;  %v6147_v56 = vmul.f32 %v5839_v24, %v5927_v45  ;;  %v6151_v53 = vmul.f32 %v5841_v25, %v5927_v45  ;;  %v2377_v54 = vadd.f32 %v2339_v19, %v2292_v26  ;;  %4628 = vmatmul.mubr.msk.f32.gmra.mrb[78].mxu0 %vm3261_vm9, %v3218_v49 }
 0x2f4   : > { %v2001_v5 = vsel %vm1366_vm10, %v8263_v55, %v8136_v14  ;;  %v2086_v42 = vsel %vm1452_vm11, %v8264_v27, %v8133_v52  ;;  %v1752_v55 = vadd.f32 %v1715_v12, %v1666_v39  ;;  %v8266_v22 = vrot.slane %v5953_v35, 4  ;;  %v4479_v12 = vpop.f32.mrb[49].mxu1 }
 0x2f5   : > { %v6143_v20 = vsel %vm1538_vm12, %v8265_v3, %v8131_v15  ;;  %v6165_v3 = vmul.f32 %v5843_v0, %v5927_v45  ;;  %v3219_v15 = vld [vmem:[%s8099_s1 + $0x30] sm:$0xff]  ;;  %v6172_v19 = vadd.f32 %v5794_v32, %v1273_v46  ;;  %v8135_v26 = vrot.slane %v6147_v56, 5 }
 0x2f6   : > { %v6161_v27 = vsel %vm1624_vm8, %v8266_v22, %v8132_v63  ;;  %v8134_v35 = vrot.slane %v6151_v53, 6  ;;  %v1310_v39 = vmul.f32 %v5810_v40, %v5897_v44  ;;  %4630 = vmatprep.mubr.msk.f32.mxu0 %vm3261_vm9, %v3219_v15  ;;  %v2462_v22 = vadd.f32 %v6016_v60, %v2377_v54  ;;  %v1278_v54 = vpop.f32.mrb[50].mxu1 }
 0x2f7   : > { %v1837_v49 = vadd.f32 %v1800_v11, %v1752_v55  ;;  %v8138_v63 = vrot.slane %v6165_v3, 7  ;;  %v6183_v52 = vmul.f32 %v5812_v59, %v5927_v45  ;;  %v8267_v32 = vrot.slane %v5976_v6, 5 }
 0x2f8   : > { %v8268_v44 = vrot.slane %v5982_v1, 6  ;;  %v6201_v11 = vmul.f32 %v5816_v62, %v5927_v45  ;;  %v6205_v15 = vmul.f32 %v5818_v2, %v5927_v45  ;;  %v2547_v6 = vadd.f32 %v6048_v4, %v2462_v22 }
 0x2f9   : > { %v6190_v46 = vsel %vm1710_vm13, %v8267_v32, %v8135_v26  ;;  %v1923_v55 = vadd.f32 %v1886_v47, %v1837_v49  ;;  %v8269_v12 = vrot.slane %v6005_v10, 7  ;;  %v8137_v32 = vrot.slane %v6183_v52, 1 }
 0x2fa   : > { %v6197_v60 = vsel %vm1018_vm5, %v8268_v44, %v8134_v35  ;;  %v6217_v44 = vadd.f32 %v5796_v9, %v1278_v54  ;;  %v4482_v35 = vpop.f32.mrb[51].mxu1  ;;  %v8139_v26 = vrot.slane %v6201_v11, 2  ;;  %v8140_v14 = vrot.slane %v6205_v15, 3  ;;  %4500 = vmatmul.mubr.msk.f32.vlgmr.msra.gmra.mrb[60].mxu1 %vm2567_vm15, %v2547_v6 }
 0x2fb   : > { %v6213_v1 = vsel %vm1881_vm14, %v8269_v12, %v8138_v63  ;;  %v6223_v4 = vmul.f32 %v5820_v58, %v5927_v45  ;;  %v1953_v10 = vadd.f32 %v1940_v21, %v1923_v55  ;;  %v8271_v47 = vrot.slane %v6020_v30, 1 }
 0x2fc   : > { %8270 = vst [vmem:[#allocation8_spill] sm:$0xff] %v6217_v44  ;;  %v6233_v9 = vmul.f32 %v5822_v7, %v5927_v45  ;;  %v6237_v35 = vmul.f32 %v5824_v51, %v5927_v45  ;;  %v8272_v49 = vmov 0.0   ;;  %v8273_v21 = vrot.slane %v6024_v34, 2  ;;  %v3220_v44 = vld [vmem:[%s8099_s1 + $0x38] sm:$0xff] }
 0x2fd   : > { %v1373_v22 = vsel %vm1366_vm10, %v8271_v47, %v8137_v32  ;;  %4502 = vmatprep.mubr.msk.f32.mxu1 %vm5079_vm6, %v8272_v49  ;;  %v8274_v6 = vrot.slane %v6029_v31, 3  ;;  %v8144_v12 = vrot.slane %v6223_v4, 4  ;;  %v1283_v47 = vpop.f32.mrb[52].mxu1  ;;  %v2038_v32 = vadd.f32 %v2001_v5, %v1953_v10  ;;  %4631 = vmatmul.mubr.msk.f32.gmra.mrb[80].mxu0 %vm3261_vm9, %v3220_v44 }
 0x2fe   : > { %v1409_v54 = vadd.f32 %v1373_v22, %v1310_v39  ;;  %v1459_v30 = vsel %vm1452_vm11, %v8273_v21, %v8139_v26  ;;  %v8143_v63 = vrot.slane %v6233_v9, 5  ;;  %v8142_v39 = vrot.slane %v6237_v35, 6  ;;  %v4485_v21 = vpop.f32.mrb[53].mxu1 }
 0x2ff   : > { %v1545_v55 = vsel %vm1538_vm12, %v8274_v6, %v8140_v14  ;;  %v6256_v22 = vmul.f32 %v5826_v43, %v5927_v45  ;;  %v6259_v34 = vadd.f32 %v5798_v16, %v1283_v47  ;;  %v8276_v31 = vrot.slane %v6033_v38, 4  ;;  %v8279_v47 = vld [vmem:[#allocation5_spill] sm:$0xff] }
 0x300   : > { %v1495_v26 = vadd.f32 %v1459_v30, %v1409_v54  ;;  %v1941_v5 = vmul.f32 %v5828_v48, %v5927_v45  ;;  %v2123_v10 = vadd.f32 %v2086_v42, %v2038_v32  ;;  %v8277_v14 = vrot.slane %v6042_v8, 5 }
 0x301   : > { %8275 = vst [vmem:[#allocation9_spill] sm:$0xff] %v6259_v34  ;;  %v1631_v6 = vsel %vm1624_vm8, %v8276_v31, %v8144_v12  ;;  %v8278_v16 = vrot.slane %v6065_v61, 6  ;;  %v8145_v38 = vrot.slane %v6256_v22, 7  ;;  %v6281_v21 = vmul.f32 %v5830_v13, %v8279_v47  ;;  %v1288_v61 = vpop.f32.mrb[54].mxu1 }
 0x302   : > { %v1717_v33 = vsel %vm1710_vm13, %v8277_v14, %v8143_v63  ;;  %v1581_v30 = vadd.f32 %v1545_v55, %v1495_v26  ;;  %v6285_v42 = vmul.f32 %v5832_v50, %v8279_v47  ;;  %v6289_v8 = vmul.f32 %v5835_v18, %v8279_v47  ;;  %v4488_v63 = vpop.f32.mrb[55].mxu1 }
 0x303   : > { %v1802_v54 = vsel %vm1018_vm5, %v8278_v16, %v8142_v39  ;;  %v2208_v14 = vadd.f32 %v6143_v20, %v2123_v10  ;;  %v8280_v32 = vrot.slane %v6088_v36, 7  ;;  %v6299_v55 = vmul.f32 %v5837_v17, %v8279_v47  ;;  %v8281_v16 = vld [vmem:[#allocation2_spill] sm:$0xff] }
 0x304   : > { %v6303_v31 = vmul.f32 %v5839_v24, %v8279_v47  ;;  %v6306_v39 = vadd.f32 %v8281_v16, %v1288_v61  ;;  %v1667_v20 = vadd.f32 %v1631_v6, %v1581_v30  ;;  %v8158_v10 = vrot.slane %v6281_v21, 1 }
 0x305   : > { %v1888_v26 = vsel %vm1881_vm14, %v8280_v32, %v8145_v38  ;;  %v8152_v12 = vrot.slane %v6285_v42, 2  ;;  %v2293_v36 = vadd.f32 %v6161_v27, %v2208_v14  ;;  %v8148_v32 = vrot.slane %v6289_v8, 3 }
 0x306   : > { %v8149_v38 = vrot.slane %v6299_v55, 4  ;;  %v8151_v34 = vrot.slane %v6303_v31, 5  ;;  %v1753_v61 = vadd.f32 %v1717_v33, %v1667_v20  ;;  %v8282_v63 = vrot.slane %v6094_v29, 1  ;;  %v3221_v33 = vld [vmem:[%s8099_s1 + $0x40] sm:$0xff] }
 0x307   : > { %v8283_v27 = vrot.slane %v6104_v37, 2  ;;  %v6329_v14 = vmul.f32 %v5841_v25, %v8279_v47  ;;  %v2378_v29 = vadd.f32 %v6190_v46, %v2293_v36  ;;  %v8284_v16 = vrot.slane %v6108_v23, 3  ;;  %v1293_v46 = vpop.f32.mrb[56].mxu1  ;;  %4633 = vmatprep.mubr.msk.f32.mxu0 %vm3261_vm9, %v3221_v33 }
 0x308   : > { %v2003_v6 = vsel %vm1366_vm10, %v8282_v63, %v8158_v10  ;;  %v8285_v20 = vrot.slane %v6114_v57, 4  ;;  %v8286_v44 = vrot.slane %v6147_v56, 5  ;;  %v1838_v36 = vadd.f32 %v1802_v54, %v1753_v61  ;;  %v8287_v57 = vld [vmem:[#allocation3_spill] sm:$0xff] }
 0x309   : > { %v2088_v30 = vsel %vm1452_vm11, %v8283_v27, %v8152_v12  ;;  %v2173_v37 = vsel %vm1538_vm12, %v8284_v16, %v8148_v32  ;;  %v8150_v23 = vrot.slane %v6329_v14, 6  ;;  %v6357_v16 = vmul.f32 %v5843_v0, %v8279_v47 }
 0x30a   : > { %v2258_v63 = vsel %vm1624_vm8, %v8285_v20, %v8149_v38  ;;  %v6351_v27 = vsel %vm1710_vm13, %v8286_v44, %v8151_v34  ;;  %v6360_v32 = vadd.f32 %v8287_v57, %v1293_v46  ;;  %v4491_v20 = vpop.f32.mrb[57].mxu1  ;;  %v2463_v38 = vadd.f32 %v6197_v60, %v2378_v29 }
 0x30b   : > { %v1311_v56 = vmul.f32 %v5810_v40, %v5927_v45  ;;  %v6367_v44 = vmul.f32 %v5812_v59, %v8279_v47  ;;  %v6371_v54 = vmul.f32 %v5816_v62, %v8279_v47  ;;  %v1924_v61 = vadd.f32 %v1888_v26, %v1838_v36 }
 0x30c   : > { %8288 = vst [vmem:[#allocation5_spill] sm:$0xff] %v6360_v32  ;;  %v8289_v33 = vrot.slane %v6151_v53, 6  ;;  %v8153_v60 = vrot.slane %v6357_v16, 7  ;;  %v6383_v45 = vmul.f32 %v5818_v2, %v8279_v47  ;;  %v2548_v29 = vadd.f32 %v6213_v1, %v2463_v38  ;;  %v1298_v53 = vpop.f32.mrb[58].mxu1 }
 0x30d   : > { %v8155_v57 = vrot.slane %v6367_v44, 1  ;;  %v8154_v20 = vrot.slane %v6371_v54, 2  ;;  %v6390_v26 = vmul.f32 %v5820_v58, %v8279_v47  ;;  %v1954_v36 = vadd.f32 %v1941_v5, %v1924_v61  ;;  %v4494_v38 = vpop.f32.mrb[59].mxu1 }
 0x30e   : > { %v6378_v46 = vsel %vm1018_vm5, %v8289_v33, %v8150_v23  ;;  %v8290_v33 = vrot.slane %v6165_v3, 7  ;;  %v8157_v34 = vrot.slane %v6383_v45, 3  ;;  %v6400_v1 = vmul.f32 %v5822_v7, %v8279_v47  ;;  %4503 = vmatmul.mubr.msk.f32.gmra.mrb[62].mxu1 %vm2567_vm15, %v2548_v29 }
 0x30f   : > { %v8291_v12 = vrot.slane %v6183_v52, 1  ;;  %v8292_v3 = vrot.slane %v6201_v11, 2  ;;  %4505 = vmatprep.mubr.msk.f32.mxu1 %vm5079_vm6, %v8272_v49  ;;  %v2039_v29 = vadd.f32 %v2003_v6, %v1954_v36  ;;  %v8293_v52 = vrot.slane %v6205_v15, 3 }
 0x310   : > { %v2513_v23 = vsel %vm1881_vm14, %v8290_v33, %v8153_v60  ;;  %v8156_v33 = vrot.slane %v6390_v26, 4  ;;  %v6416_v60 = vmul.f32 %v5824_v51, %v8279_v47  ;;  %v8160_v11 = vrot.slane %v6400_v1, 5 }
 0x311   : > { %v1375_v5 = vsel %vm1366_vm10, %v8291_v12, %v8155_v57  ;;  %v1461_v61 = vsel %vm1452_vm11, %v8292_v3, %v8154_v20  ;;  %v1547_v12 = vsel %vm1538_vm12, %v8293_v52, %v8157_v34  ;;  %v8294_v3 = vrot.slane %v6223_v4, 4  ;;  %v8296_v4 = vld [vmem:[#allocation6_spill] sm:$0xff] }
 0x312   : > { %v1410_v38 = vadd.f32 %v1375_v5, %v1311_v56  ;;  %v8159_v57 = vrot.slane %v6416_v60, 6  ;;  %v6434_v6 = vmul.f32 %v5826_v43, %v8279_v47  ;;  %v1942_v56 = vmul.f32 %v5828_v48, %v8279_v47 }
 0x313   : > { %v1633_v20 = vsel %vm1624_vm8, %v8294_v3, %v8156_v33  ;;  %v2124_v15 = vadd.f32 %v2088_v30, %v2039_v29  ;;  %v8295_v5 = vrot.slane %v6233_v9, 5  ;;  %v6445_v3 = vmul.f32 %v5830_v13, %v8296_v4 }
 0x314   : > { %v1496_v36 = vadd.f32 %v1461_v61, %v1410_v38  ;;  %v8297_v33 = vrot.slane %v6237_v35, 6  ;;  %v8161_v10 = vrot.slane %v6434_v6, 7  ;;  %v6455_v30 = vmul.f32 %v5832_v50, %v8296_v4 }
 0x315   : > { %v1719_v52 = vsel %vm1710_vm13, %v8295_v5, %v8160_v11  ;;  %v6459_v9 = vmul.f32 %v5835_v18, %v8296_v4  ;;  %v2209_v61 = vadd.f32 %v2173_v37, %v2124_v15  ;;  %v8163_v38 = vrot.slane %v6445_v3, 1  ;;  %v3223_v11 = vld [vmem:[%s8099_s1 + $0x50] sm:$0xff] }
 0x316   : > { %v1804_v34 = vsel %vm1018_vm5, %v8297_v33, %v8159_v57  ;;  %v1582_v29 = vadd.f32 %v1547_v12, %v1496_v36  ;;  %v6464_v5 = vmul.f32 %v5837_v17, %v8296_v4  ;;  %v8298_v35 = vrot.slane %v6256_v22, 7  ;;  %v3222_v12 = vld [vmem:[%s8099_s1 + $0x48] sm:$0xff] }
 0x317   : > { %v8169_v57 = vrot.slane %v6455_v30, 2  ;;  %v6475_v37 = vmul.f32 %v5839_v24, %v8296_v4  ;;  %v2294_v15 = vadd.f32 %v2258_v63, %v2209_v61  ;;  %v8299_v22 = vrot.slane %v6281_v21, 1  ;;  %4634 = vmatmul.mubr.msk.f32.gmra.mrb[82].mxu0 %vm3261_vm9, %v3222_v12 }
 0x318   : > { %v1890_v33 = vsel %vm1881_vm14, %v8298_v35, %v8161_v10  ;;  %v1668_v36 = vadd.f32 %v1633_v20, %v1582_v29  ;;  %v8164_v10 = vrot.slane %v6464_v5, 4  ;;  %v8300_v32 = vrot.slane %v6285_v42, 2  ;;  %4636 = vmatprep.mubr.msk.f32.mxu0 %vm3261_vm9, %v3223_v11  ;;  %v8305_v11 = vld [vmem:[#allocation4_spill] sm:$0xff] }
 0x319   : > { %v2005_v35 = vsel %vm1366_vm10, %v8299_v22, %v8163_v38  ;;  %v8301_v20 = vrot.slane %v6459_v9, 3  ;;  %v8302_v21 = vrot.slane %v6289_v8, 3  ;;  %v8166_v29 = vrot.slane %v6475_v37, 5 }
 0x31a   : > { %v2090_v63 = vsel %vm1452_vm11, %v8300_v32, %v8169_v57  ;;  %v6503_v12 = vmul.f32 %v5841_v25, %v8296_v4  ;;  %v2379_v22 = vadd.f32 %v6351_v27, %v2294_v15  ;;  %v1754_v38 = vadd.f32 %v1719_v52, %v1668_v36 }
 0x31b   : > { %v2175_v61 = vsel %vm1538_vm12, %v8302_v21, %v8301_v20  ;;  %v8303_v42 = vrot.slane %v6299_v55, 4  ;;  %v6514_v8 = vmul.f32 %v5843_v0, %v8296_v4  ;;  %v8304_v20 = vrot.slane %v6303_v31, 5 }
 0x31c   : > { %v8165_v27 = vrot.slane %v6503_v12, 6  ;;  %v6525_v52 = vadd.f32 %v8305_v11, %v1298_v53  ;;  %v1312_v55 = vmul.f32 %v5810_v40, %v8279_v47  ;;  %v2464_v15 = vadd.f32 %v6378_v46, %v2379_v22 }
 0x31d   : > { %v2260_v32 = vsel %vm1624_vm8, %v8303_v42, %v8164_v10  ;;  %v6521_v21 = vsel %vm1710_vm13, %v8304_v20, %v8166_v29  ;;  %v1839_v36 = vadd.f32 %v1804_v34, %v1754_v38  ;;  %v8167_v42 = vrot.slane %v6514_v8, 7 }
 0x31e   : > { %8306 = vst [vmem:[#allocation2_spill] sm:$0xff] %v6525_v52  ;;  %v6533_v10 = vmul.f32 %v5812_v59, %v8296_v4  ;;  %v8307_v31 = vrot.slane %v6329_v14, 6  ;;  %v6544_v53 = vmul.f32 %v5830_v13, %v6525_v52  ;;  %v6548_v34 = vmul.f32 %v5816_v62, %v8296_v4 }
 0x31f   : > { %v6552_v47 = vmul.f32 %v5818_v2, %v8296_v4  ;;  %v2549_v46 = vadd.f32 %v2513_v23, %v2464_v15  ;;  %v1925_v38 = vadd.f32 %v1890_v33, %v1839_v36  ;;  %v8309_v14 = vrot.slane %v6357_v16, 7 }
 0x320   : > { %v6540_v20 = vsel %vm1018_vm5, %v8307_v31, %v8165_v27  ;;  %8308 = vst [vmem:[#allocation3_spill] sm:$0xff] %v6544_v53  ;;  %v8168_v11 = vrot.slane %v6533_v10, 1  ;;  %v8174_v31 = vrot.slane %v6548_v34, 2  ;;  %v6566_v29 = vmul.f32 %v5820_v58, %v8296_v4 }
 0x321   : > { %v6559_v22 = vsel %vm1881_vm14, %v8309_v14, %v8167_v42  ;;  %v8172_v27 = vrot.slane %v6552_v47, 3  ;;  %v6570_v23 = vmul.f32 %v5822_v7, %v8296_v4  ;;  %4506 = vmatmul.mubr.msk.f32.gmra.mrb[64].mxu1 %vm2567_vm15, %v2549_v46  ;;  %v1955_v16 = vadd.f32 %v1942_v56, %v1925_v38 }
 0x322   : > { %v8310_v33 = vrot.slane %v6367_v44, 1  ;;  %v6580_v36 = vmul.f32 %v5824_v51, %v8296_v4  ;;  %v6584_v14 = vmul.f32 %v5826_v43, %v8296_v4  ;;  %4508 = vmatprep.mubr.msk.f32.mxu1 %vm5079_vm6, %v8272_v49  ;;  %v8311_v56 = vrot.slane %v6371_v54, 2 }
 0x323   : > { %v8312_v46 = vrot.slane %v6383_v45, 3  ;;  %v8177_v57 = vrot.slane %v6570_v23, 5  ;;  %v8313_v54 = vrot.slane %v6390_v26, 4  ;;  %v1943_v45 = vmul.f32 %v5828_v48, %v8296_v4 }
 0x324   : > { %v1377_v15 = vsel %vm1366_vm10, %v8310_v33, %v8168_v11  ;;  %v1463_v44 = vsel %vm1452_vm11, %v8311_v56, %v8174_v31  ;;  %v8173_v33 = vrot.slane %v6566_v29, 4  ;;  %v2040_v11 = vadd.f32 %v2005_v35, %v1955_v16 }
 0x325   : > { %v1411_v42 = vadd.f32 %v1377_v15, %v1312_v55  ;;  %v1549_v38 = vsel %vm1538_vm12, %v8312_v46, %v8172_v27  ;;  %v8176_v52 = vrot.slane %v6580_v36, 6  ;;  %v8175_v55 = vrot.slane %v6584_v14, 7  ;;  %v8314_v46 = vld [vmem:[#allocation7_spill] sm:$0xff] }
 0x326   : > { %v1635_v56 = vsel %vm1624_vm8, %v8313_v54, %v8173_v33  ;;  %v6611_v27 = vmul.f32 %v5830_v13, %v8314_v46  ;;  %v2125_v35 = vadd.f32 %v2090_v63, %v2040_v11  ;;  %v8315_v16 = vrot.slane %v6400_v1, 5 }
 0x327   : > { %v1497_v15 = vadd.f32 %v1463_v44, %v1411_v42  ;;  %v8316_v26 = vrot.slane %v6416_v60, 6  ;;  %v8317_v54 = vrot.slane %v6434_v6, 7  ;;  %v6631_v1 = vmul.f32 %v5832_v50, %v8314_v46 }
 0x328   : > { %v1721_v42 = vsel %vm1710_vm13, %v8315_v16, %v8177_v57  ;;  %v8178_v63 = vrot.slane %v6611_v27, 1  ;;  %v6635_v11 = vmul.f32 %v5835_v18, %v8314_v46  ;;  %v2210_v60 = vadd.f32 %v2175_v61, %v2125_v35 }
 0x329   : > { %v1806_v44 = vsel %vm1018_vm5, %v8316_v26, %v8176_v52  ;;  %v1892_v33 = vsel %vm1881_vm14, %v8317_v54, %v8175_v55  ;;  %v1583_v31 = vadd.f32 %v1549_v38, %v1497_v15  ;;  %v6639_v16 = vmul.f32 %v5837_v17, %v8314_v46  ;;  %v3224_v15 = vld [vmem:[%s8099_s1 + $0x58] sm:$0xff]  ;;  %v3225_v52 = vld [vmem:[%s8099_s1 + $0x60] sm:$0xff] }
 0x32a   : > { %v6643_v6 = vmul.f32 %v5839_v24, %v8314_v46  ;;  %v6647_v38 = vmul.f32 %v5841_v25, %v8314_v46  ;;  %v8318_v61 = vrot.slane %v6445_v3, 1  ;;  %v2091_v54 = vrot.slane %v6631_v1, 2  ;;  %4637 = vmatmul.mubr.msk.f32.gmra.mrb[84].mxu0 %vm3261_vm9, %v3224_v15  ;;  %v3228_v1 = vld [vmem:[%s8099_s1 + $0x78] sm:$0xff] }
 0x32b   : > { %v1669_v26 = vadd.f32 %v1635_v56, %v1583_v31  ;;  %v8182_v55 = vrot.slane %v6635_v11, 3  ;;  %v2295_v57 = vadd.f32 %v2260_v32, %v2210_v60  ;;  %v8180_v53 = vrot.slane %v6639_v16, 4  ;;  %4639 = vmatprep.mubr.msk.f32.mxu0 %vm3261_vm9, %v3225_v52 }
 0x32c   : > { %v2007_v35 = vsel %vm1366_vm10, %v8318_v61, %v8178_v63  ;;  %v8179_v31 = vrot.slane %v6643_v6, 5  ;;  %v8319_v61 = vrot.slane %v6455_v30, 2  ;;  %v8320_v63 = vrot.slane %v6459_v9, 3 }
 0x32d   : > { %v1755_v3 = vadd.f32 %v1721_v42, %v1669_v26  ;;  %v6679_v60 = vmul.f32 %v5843_v0, %v8314_v46  ;;  %v2380_v56 = vadd.f32 %v6521_v21, %v2295_v57  ;;  %v8321_v52 = vrot.slane %v6464_v5, 4 }
 0x32e   : > { %v2092_v15 = vsel %vm1452_vm11, %v8319_v61, %v2091_v54  ;;  %v2177_v32 = vsel %vm1538_vm12, %v8320_v63, %v8182_v55  ;;  %v8322_v42 = vrot.slane %v6475_v37, 5  ;;  %v8323_v63 = vrot.slane %v6647_v38, 6 }
 0x32f   : > { %v2262_v30 = vsel %vm1624_vm8, %v8321_v52, %v8180_v53  ;;  %v8324_v26 = vrot.slane %v6503_v12, 6  ;;  %v1840_v57 = vadd.f32 %v1806_v44, %v1755_v3  ;;  %v8181_v21 = vrot.slane %v6679_v60, 7 }
 0x330   : > { %v6692_v9 = vsel %vm1710_vm13, %v8322_v42, %v8179_v31  ;;  %v1313_v5 = vmul.f32 %v5810_v40, %v8296_v4  ;;  %v6706_v52 = vmul.f32 %v5812_v59, %v8314_v46  ;;  %v2465_v37 = vadd.f32 %v6540_v20, %v2380_v56 }
 0x331   : > { %v6699_v61 = vsel %vm1018_vm5, %v8324_v26, %v8323_v63  ;;  %v6711_v42 = vmul.f32 %v5816_v62, %v8314_v46  ;;  %v6715_v12 = vmul.f32 %v5818_v2, %v8314_v46  ;;  %v6719_v44 = vmul.f32 %v5820_v58, %v8314_v46 }
 0x332   : > { %v1926_v3 = vadd.f32 %v1892_v33, %v1840_v57  ;;  %v8325_v4 = vrot.slane %v6514_v8, 7  ;;  %v8183_v20 = vrot.slane %v6706_v52, 1  ;;  %v6731_v56 = vmul.f32 %v5822_v7, %v8314_v46 }
 0x333   : > { %v2550_v26 = vadd.f32 %v6559_v22, %v2465_v37  ;;  %v8189_v31 = vrot.slane %v6711_v42, 2  ;;  %v8188_v53 = vrot.slane %v6715_v12, 3  ;;  %v8185_v33 = vrot.slane %v6719_v44, 4 }
 0x334   : > { %v6726_v63 = vsel %vm1881_vm14, %v8325_v4, %v8181_v21  ;;  %v1956_v57 = vadd.f32 %v1943_v45, %v1926_v3  ;;  %v8326_v8 = vrot.slane %v6533_v10, 1  ;;  %v8184_v21 = vrot.slane %v6731_v56, 5 }
 0x335   : > { %v6745_v55 = vmul.f32 %v5824_v51, %v8314_v46  ;;  %4509 = vmatmul.mubr.msk.f32.gmra.mrb[66].mxu1 %vm2567_vm15, %v2550_v26  ;;  %v8327_v37 = vrot.slane %v6548_v34, 2  ;;  %v8328_v10 = vrot.slane %v6552_v47, 3  ;;  %v8330_v34 = vrot.slane %v6570_v23, 5 }
 0x336   : > { %v1379_v4 = vsel %vm1366_vm10, %v8326_v8, %v8183_v20  ;;  %v8329_v8 = vrot.slane %v6566_v29, 4  ;;  %4511 = vmatprep.mubr.msk.f32.mxu1 %vm5079_vm6, %v8272_v49  ;;  %v1944_v29 = vmul.f32 %v5828_v48, %v8314_v46 }
 0x337   : > { %v1412_v22 = vadd.f32 %v1379_v4, %v1313_v5  ;;  %v1465_v45 = vsel %vm1452_vm11, %v8327_v37, %v8189_v31  ;;  %v1551_v3 = vsel %vm1538_vm12, %v8328_v10, %v8188_v53  ;;  %v2041_v5 = vadd.f32 %v2007_v35, %v1956_v57 }
 0x338   : > { %v1637_v20 = vsel %vm1624_vm8, %v8329_v8, %v8185_v33  ;;  %v1723_v26 = vsel %vm1710_vm13, %v8330_v34, %v8184_v21  ;;  %v8186_v47 = vrot.slane %v6745_v55, 6  ;;  %v6773_v4 = vmul.f32 %v5826_v43, %v8314_v46 }
 0x339   : > { %v1498_v37 = vadd.f32 %v1465_v45, %v1412_v22  ;;  %v6779_v10 = vmul.f32 %v5830_v13, %v6078_v41  ;;  %v6783_v35 = vmul.f32 %v5832_v50, %v6078_v41  ;;  %v2126_v23 = vadd.f32 %v2092_v15, %v2041_v5 }
 0x33a   : > { %v8331_v57 = vrot.slane %v6580_v36, 6  ;;  %v8187_v22 = vrot.slane %v6773_v4, 7  ;;  %v6793_v45 = vmul.f32 %v5835_v18, %v6078_v41  ;;  %v6799_v15 = vmul.f32 %v5837_v17, %v6078_v41 }
 0x33b   : > { %v1584_v34 = vadd.f32 %v1551_v3, %v1498_v37  ;;  %v8196_v21 = vrot.slane %v6779_v10, 1  ;;  %v8195_v33 = vrot.slane %v6783_v35, 2  ;;  %v2211_v5 = vadd.f32 %v2177_v32, %v2126_v23  ;;  %v3226_v37 = vld [vmem:[%s8099_s1 + $0x68] sm:$0xff]  ;;  %v3227_v32 = vld [vmem:[%s8099_s1 + $0x70] sm:$0xff] }
 0x33c   : > { %v1808_v8 = vsel %vm1018_vm5, %v8331_v57, %v8186_v47  ;;  %v8332_v36 = vrot.slane %v6584_v14, 7  ;;  %v8191_v47 = vrot.slane %v6793_v45, 3  ;;  %v6809_v3 = vmul.f32 %v5839_v24, %v6078_v41  ;;  %4640 = vmatmul.mubr.msk.f32.gmra.mrb[86].mxu0 %vm3261_vm9, %v3226_v37 }
 0x33d   : > { %v1670_v23 = vadd.f32 %v1637_v20, %v1584_v34  ;;  %v8333_v14 = vrot.slane %v6611_v27, 1  ;;  %v8190_v53 = vrot.slane %v6799_v15, 4  ;;  %v2296_v31 = vadd.f32 %v2262_v30, %v2211_v5  ;;  %4642 = vmatprep.mubr.msk.f32.mxu0 %vm3261_vm9, %v3227_v32  ;;  %v3229_v32 = vld [vmem:[%s8099_s1 + $0x80] sm:$0xff] }
 0x33e   : > { %v1894_v57 = vsel %vm1881_vm14, %v8332_v36, %v8187_v22  ;;  %v2094_v22 = vsel %vm1452_vm11, %v2091_v54, %v8195_v33  ;;  %v8334_v20 = vrot.slane %v6635_v11, 3  ;;  %v8193_v27 = vrot.slane %v6809_v3, 5 }
 0x33f   : > { %v2009_v36 = vsel %vm1366_vm10, %v8333_v14, %v8196_v21  ;;  %v6839_v14 = vmul.f32 %v5841_v25, %v6078_v41  ;;  %v1756_v54 = vadd.f32 %v1723_v26, %v1670_v23  ;;  %v8335_v11 = vrot.slane %v6639_v16, 4 }
 0x340   : > { %v6834_v34 = vsel %vm1538_vm12, %v8334_v20, %v8191_v47  ;;  %v6854_v5 = vmul.f32 %v5843_v0, %v6078_v41  ;;  %v1314_v37 = vmul.f32 %v5810_v40, %v8314_v46  ;;  %v2381_v26 = vadd.f32 %v6692_v9, %v2296_v31  ;;  %4643 = vmatmul.mubr.msk.f32.gmra.mrb[88].mxu0 %vm3261_vm9, %v3228_v1  ;;  %v3230_v1 = vld [vmem:[%s8099_s1 + $0x88] sm:$0xff] }
 0x341   : > { %v6850_v30 = vsel %vm1624_vm8, %v8335_v11, %v8190_v53  ;;  %v8336_v16 = vrot.slane %v6643_v6, 5  ;;  %v8192_v20 = vrot.slane %v6839_v14, 6  ;;  %v6872_v11 = vmul.f32 %v5812_v59, %v6078_v41  ;;  %4645 = vmatprep.mubr.msk.f32.mxu0 %vm3261_vm9, %v3229_v32  ;;  %v3231_v32 = vld [vmem:[%s8099_s1 + $0x90] sm:$0xff] }
 0x342   : > { %v1841_v46 = vadd.f32 %v1808_v8, %v1756_v54  ;;  %v8194_v53 = vrot.slane %v6854_v5, 7  ;;  %v6877_v47 = vmul.f32 %v5816_v62, %v6078_v41  ;;  %v6881_v31 = vmul.f32 %v5818_v2, %v6078_v41 }
 0x343   : > { %v6867_v23 = vsel %vm1710_vm13, %v8336_v16, %v8193_v27  ;;  %v2466_v6 = vadd.f32 %v6699_v61, %v2381_v26  ;;  %v8337_v9 = vrot.slane %v6647_v38, 6  ;;  %v1380_v54 = vrot.slane %v6872_v11, 1 }
 0x344   : > { %v6895_v16 = vmul.f32 %v5820_v58, %v6078_v41  ;;  %v1927_v61 = vadd.f32 %v1894_v57, %v1841_v46  ;;  %v8338_v38 = vrot.slane %v6679_v60, 7  ;;  %v8339_v57 = vrot.slane %v6706_v52, 1  ;;  %4646 = vmatmul.mubr.msk.f32.gmra.mrb[90].mxu0 %vm3261_vm9, %v3230_v1 }
 0x345   : > { %v6890_v8 = vsel %vm1018_vm5, %v8337_v9, %v8192_v20  ;;  %v1466_v9 = vrot.slane %v6877_v47, 2  ;;  %v8198_v20 = vrot.slane %v6881_v31, 3  ;;  %v2551_v27 = vadd.f32 %v6726_v63, %v2466_v6  ;;  %4648 = vmatprep.mubr.msk.f32.mxu0 %vm3261_vm9, %v3231_v32  ;;  %v3233_v32 = vld [vmem:[%s8099_s1 + $0xa0] sm:$0xff] }
 0x346   : > { %v6906_v26 = vsel %vm1881_vm14, %v8338_v38, %v8194_v53  ;;  %v1381_v46 = vsel %vm1366_vm10, %v8339_v57, %v1380_v54  ;;  %v8197_v60 = vrot.slane %v6895_v16, 4  ;;  %v6922_v38 = vmul.f32 %v5822_v7, %v6078_v41 }
 0x347   : > { %v1957_v53 = vadd.f32 %v1944_v29, %v1927_v61  ;;  %v1413_v33 = vadd.f32 %v1381_v46, %v1314_v37  ;;  %v8340_v21 = vrot.slane %v6711_v42, 2  ;;  %v8341_v52 = vrot.slane %v6715_v12, 3  ;;  %4512 = vmatmul.mubr.msk.f32.gmra.mrb[68].mxu1 %vm2567_vm15, %v2551_v27  ;;  %v3232_v27 = vld [vmem:[%s8099_s1 + $0x98] sm:$0xff] }
 0x348   : > { %v8342_v29 = vrot.slane %v6719_v44, 4  ;;  %v8199_v42 = vrot.slane %v6922_v38, 5  ;;  %v6948_v12 = vmul.f32 %v5826_v43, %v6078_v41  ;;  %4514 = vmatprep.mubr.msk.f32.mxu1 %vm5079_vm6, %v8272_v49  ;;  %v1945_v61 = vmul.f32 %v5828_v48, %v6078_v41  ;;  %4649 = vmatmul.mubr.msk.f32.gmra.mrb[92].mxu0 %vm3261_vm9, %v3232_v27 }
 0x349   : > { %v1467_v63 = vsel %vm1452_vm11, %v8340_v21, %v1466_v9  ;;  %v1553_v6 = vsel %vm1538_vm12, %v8341_v52, %v8198_v20  ;;  %v6944_v21 = vmul.f32 %v5824_v51, %v6078_v41  ;;  %v2042_v44 = vadd.f32 %v2009_v36, %v1957_v53  ;;  %4651 = vmatprep.mubr.msk.f32.mxu0 %vm3261_vm9, %v3233_v32 }
 0x34a   : > { %v1639_v37 = vsel %vm1624_vm8, %v8342_v29, %v8197_v60  ;;  %v1499_v1 = vadd.f32 %v1467_v63, %v1413_v33  ;;  %v6960_v57 = vmul.f32 %v5830_v13, %v6117_v28  ;;  %v8343_v46 = vrot.slane %v6731_v56, 5 }
 0x34b   : > { %v8201_v53 = vrot.slane %v6944_v21, 6  ;;  %v8200_v33 = vrot.slane %v6948_v12, 7  ;;  %v6974_v36 = vmul.f32 %v5832_v50, %v6117_v28  ;;  %v2127_v63 = vadd.f32 %v2094_v22, %v2042_v44 }
 0x34c   : > { %v1725_v52 = vsel %vm1710_vm13, %v8343_v46, %v8199_v42  ;;  %v1585_v29 = vadd.f32 %v1553_v6, %v1499_v1  ;;  %v8203_v60 = vrot.slane %v6960_v57, 1  ;;  %v6979_v20 = vmul.f32 %v5835_v18, %v6117_v28 }
 0x34d   : > { %v8344_v56 = vrot.slane %v6745_v55, 6  ;;  %v8345_v42 = vrot.slane %v6773_v4, 7  ;;  %v8202_v6 = vrot.slane %v6974_v36, 2  ;;  %v6995_v44 = vmul.f32 %v5837_v17, %v6117_v28  ;;  %v3234_v55 = vld [vmem:[%s8099_s1 + $0xa8] sm:$0xff] }
 0x34e   : > { %v2212_v27 = vadd.f32 %v6834_v34, %v2127_v63  ;;  %v1671_v1 = vadd.f32 %v1639_v37, %v1585_v29  ;;  %v8346_v4 = vrot.slane %v6779_v10, 1  ;;  %v8347_v32 = vrot.slane %v6783_v35, 2  ;;  %4652 = vmatmul.mubr.msk.f32.gmra.mrb[94].mxu0 %vm3261_vm9, %v3234_v55  ;;  %v3236_v55 = vld [vmem:[%s8099_s1 + $0xb8] sm:$0xff] }
 0x34f   : > { %v1810_v46 = vsel %vm1018_vm5, %v8344_v56, %v8201_v53  ;;  %v1896_v22 = vsel %vm1881_vm14, %v8345_v42, %v8200_v33  ;;  %v8207_v56 = vrot.slane %v6979_v20, 3  ;;  %v3235_v33 = vld [vmem:[%s8099_s1 + $0xb0] sm:$0xff]  ;;  %v8204_v34 = vrot.slane %v6995_v44, 4 }
 0x350   : > { %v2011_v42 = vsel %vm1366_vm10, %v8346_v4, %v8203_v60  ;;  %v2096_v53 = vsel %vm1452_vm11, %v8347_v32, %v8202_v6  ;;  %v7019_v37 = vmul.f32 %v5839_v24, %v6117_v28  ;;  %v7023_v10 = vmul.f32 %v5841_v25, %v6117_v28  ;;  %4654 = vmatprep.mubr.msk.f32.mxu0 %vm3261_vm9, %v3235_v33 }
 0x351   : > { %v2297_v63 = vadd.f32 %v6850_v30, %v2212_v27  ;;  %v1757_v29 = vadd.f32 %v1725_v52, %v1671_v1  ;;  %v8348_v4 = vrot.slane %v6793_v45, 3  ;;  %v7033_v32 = vmul.f32 %v5843_v0, %v6117_v28 }
 0x352   : > { %v8349_v6 = vrot.slane %v6799_v15, 4  ;;  %v8206_v30 = vrot.slane %v7019_v37, 5  ;;  %v8205_v52 = vrot.slane %v7023_v10, 6  ;;  %v1315_v45 = vmul.f32 %v5810_v40, %v6078_v41  ;;  %4655 = vmatmul.mubr.msk.f32.gmra.mrb[96].mxu0 %vm3261_vm9, %v3236_v55 }
 0x353   : > { %v2181_v35 = vsel %vm1538_vm12, %v8348_v4, %v8207_v56  ;;  %v2382_v27 = vadd.f32 %v6867_v23, %v2297_v63  ;;  %v1842_v1 = vadd.f32 %v1810_v46, %v1757_v29  ;;  %v2520_v15 = vrot.slane %v7033_v32, 7  ;;  %v3237_v4 = vld [vmem:[%s8099_s1 + $0xc0] sm:$0xff] }
 0x354   : > { %v7041_v60 = vsel %vm1624_vm8, %v8349_v6, %v8204_v34  ;;  %v7055_v6 = vmul.f32 %v5812_v59, %v6117_v28  ;;  %v8350_v41 = vrot.slane %v6809_v3, 5  ;;  %v8351_v23 = vrot.slane %v6839_v14, 6  ;;  %4657 = vmatprep.mubr.msk.f32.mxu0 %vm3261_vm9, %v3237_v4 }
 0x355   : > { %v7076_v63 = vmul.f32 %v5816_v62, %v6117_v28  ;;  %v7080_v29 = vmul.f32 %v5818_v2, %v6117_v28  ;;  %v2467_v3 = vadd.f32 %v6890_v8, %v2382_v27  ;;  %v1928_v34 = vadd.f32 %v1896_v22, %v1842_v1 }
 0x356   : > { %v7065_v33 = vsel %vm1710_vm13, %v8350_v41, %v8206_v30  ;;  %v7072_v46 = vsel %vm1018_vm5, %v8351_v23, %v8205_v52  ;;  %v8352_v41 = vrot.slane %v6854_v5, 7  ;;  %v1382_v23 = vrot.slane %v7055_v6, 1  ;;  %v3238_v5 = vld [vmem:[%s8099_s1 + $0xc8] sm:$0xff] }
 0x357   : > { %v1468_v52 = vrot.slane %v7076_v63, 2  ;;  %v8213_v30 = vrot.slane %v7080_v29, 3  ;;  %v7096_v56 = vmul.f32 %v5820_v58, %v6117_v28  ;;  %v7100_v8 = vmul.f32 %v5822_v7, %v6117_v28  ;;  %4658 = vmatmul.mubr.msk.f32.gmra.mrb[98].mxu0 %vm3261_vm9, %v3238_v5  ;;  %v3240_v5 = vld [vmem:[%s8099_s1 + $0xd8] sm:$0xff] }
 0x358   : > { %v7088_v14 = vsel %vm1881_vm14, %v8352_v41, %v2520_v15  ;;  %v2552_v22 = vadd.f32 %v6906_v26, %v2467_v3  ;;  %v1958_v55 = vadd.f32 %v1945_v61, %v1928_v34  ;;  %v1383_v27 = vsel %vm1366_vm10, %v1380_v54, %v1382_v23  ;;  %v3239_v54 = vld [vmem:[%s8099_s1 + $0xd0] sm:$0xff] }
 0x359   : > { %v7114_v1 = vmul.f32 %v5824_v51, %v6117_v28  ;;  %v1414_v41 = vadd.f32 %v1383_v27, %v1315_v45  ;;  %v1469_v4 = vsel %vm1452_vm11, %v1466_v9, %v1468_v52  ;;  %v8353_v26 = vrot.slane %v6881_v31, 3  ;;  %4660 = vmatprep.mubr.msk.f32.mxu0 %vm3261_vm9, %v3239_v54 }
 0x35a   : > { %v8208_v11 = vrot.slane %v7096_v56, 4  ;;  %4515 = vmatmul.mubr.msk.f32.gmra.mrb[70].mxu1 %vm2567_vm15, %v2552_v22  ;;  %v2043_v34 = vadd.f32 %v2011_v42, %v1958_v55  ;;  %v8211_v45 = vrot.slane %v7100_v8, 5  ;;  %v7135_v9 = vmul.f32 %v5826_v43, %v6117_v28 }
 0x35b   : > { %v1555_v61 = vsel %vm1538_vm12, %v8353_v26, %v8213_v30  ;;  %v8209_v47 = vrot.slane %v7114_v1, 6  ;;  %4517 = vmatprep.mubr.msk.f32.mxu1 %vm5079_vm6, %v8272_v49  ;;  %v1500_v31 = vadd.f32 %v1469_v4, %v1414_v41  ;;  %v8354_v3 = vrot.slane %v6895_v16, 4  ;;  %4661 = vmatmul.mubr.msk.f32.gmra.mrb[100].mxu0 %vm3261_vm9, %v3240_v5 }
 0x35c   : > { %v1946_v22 = vmul.f32 %v5828_v48, %v6117_v28  ;;  %v7149_v55 = vmul.f32 %v5830_v13, %v6172_v19  ;;  %v2128_v27 = vadd.f32 %v2096_v53, %v2043_v34  ;;  %v8355_v41 = vrot.slane %v6922_v38, 5  ;;  %v3241_v53 = vld [vmem:[%s8099_s1 + $0xe0] sm:$0xff] }
 0x35d   : > { %v1641_v42 = vsel %vm1624_vm8, %v8354_v3, %v8208_v11  ;;  %v8356_v4 = vrot.slane %v6944_v21, 6  ;;  %v8210_v3 = vrot.slane %v7135_v9, 7  ;;  %v1586_v34 = vadd.f32 %v1555_v61, %v1500_v31  ;;  %4663 = vmatprep.mubr.msk.f32.mxu0 %vm3261_vm9, %v3241_v53 }
 0x35e   : > { %v1727_v16 = vsel %vm1710_vm13, %v8355_v41, %v8211_v45  ;;  %v8212_v11 = vrot.slane %v7149_v55, 1  ;;  %v7172_v38 = vmul.f32 %v5832_v50, %v6172_v19  ;;  %v7176_v21 = vmul.f32 %v5835_v18, %v6172_v19 }
 0x35f   : > { %v1812_v26 = vsel %vm1018_vm5, %v8356_v4, %v8209_v47  ;;  %v2213_v41 = vadd.f32 %v2181_v35, %v2128_v27  ;;  %v8357_v54 = vrot.slane %v6948_v12, 7  ;;  %v7185_v61 = vmul.f32 %v5837_v17, %v6172_v19 }
 0x360   : > { %v7189_v31 = vmul.f32 %v5839_v24, %v6172_v19  ;;  %v1672_v47 = vadd.f32 %v1641_v42, %v1586_v34  ;;  %v8358_v35 = vrot.slane %v6960_v57, 1  ;;  %v2097_v12 = vrot.slane %v7172_v38, 2 }
 0x361   : > { %v1898_v4 = vsel %vm1881_vm14, %v8357_v54, %v8210_v3  ;;  %v8214_v54 = vrot.slane %v7176_v21, 3  ;;  %v3242_v3 = vld [vmem:[%s8099_s1 + $0xe8] sm:$0xff]  ;;  %v2298_v45 = vadd.f32 %v7041_v60, %v2213_v41  ;;  %v2267_v42 = vrot.slane %v7185_v61, 4 }
 0x362   : > { %v2013_v27 = vsel %vm1366_vm10, %v8358_v35, %v8212_v11  ;;  %v2352_v5 = vrot.slane %v7189_v31, 5  ;;  %v7208_v57 = vmul.f32 %v5841_v25, %v6172_v19  ;;  %v1758_v34 = vadd.f32 %v1727_v16, %v1672_v47  ;;  %4664 = vmatmul.mubr.msk.f32.gmra.mrb[102].mxu0 %vm3261_vm9, %v3242_v3 }
 0x363   : > { %v8359_v35 = vrot.slane %v6974_v36, 2  ;;  %v8360_v11 = vrot.slane %v6979_v20, 3  ;;  %v7222_v41 = vmul.f32 %v5843_v0, %v6172_v19  ;;  %v2383_v30 = vadd.f32 %v7065_v33, %v2298_v45 }
 0x364   : > { %v8361_v47 = vrot.slane %v6995_v44, 4  ;;  %v8362_v16 = vrot.slane %v7019_v37, 5  ;;  %v1316_v33 = vmul.f32 %v5810_v40, %v6117_v28  ;;  %v7242_v44 = vmul.f32 %v5812_v59, %v6172_v19 }
 0x365   : > { %v2098_v53 = vsel %vm1452_vm11, %v8359_v35, %v2097_v12  ;;  %v2183_v60 = vsel %vm1538_vm12, %v8360_v11, %v8214_v54  ;;  %v2437_v11 = vrot.slane %v7208_v57, 6  ;;  %v1843_v35 = vadd.f32 %v1812_v26, %v1758_v34 }
 0x366   : > { %v2268_v36 = vsel %vm1624_vm8, %v8361_v47, %v2267_v42  ;;  %v2353_v20 = vsel %vm1710_vm13, %v8362_v16, %v2352_v5  ;;  %v8221_v54 = vrot.slane %v7222_v41, 7  ;;  %v2468_v45 = vadd.f32 %v7072_v46, %v2383_v30 }
 0x367   : > { %v8363_v37 = vrot.slane %v7023_v10, 6  ;;  %v7252_v26 = vmul.f32 %v5816_v62, %v6172_v19  ;;  %v7256_v3 = vmul.f32 %v5818_v2, %v6172_v19  ;;  %v1929_v28 = vadd.f32 %v1898_v4, %v1843_v35 }
 0x368   : > { %v7263_v30 = vsel %vm1881_vm14, %v2520_v15, %v8221_v54  ;;  %v8215_v10 = vrot.slane %v7242_v44, 1  ;;  %v7268_v46 = vmul.f32 %v5820_v58, %v6172_v19  ;;  %v2553_v34 = vadd.f32 %v7088_v14, %v2468_v45 }
 0x369   : > { %v2438_v47 = vsel %vm1018_vm5, %v8363_v37, %v2437_v11  ;;  %v8220_v16 = vrot.slane %v7252_v26, 2  ;;  %v8218_v37 = vrot.slane %v7256_v3, 3  ;;  %v7275_v4 = vmul.f32 %v5822_v7, %v6172_v19 }
 0x36a   : > { %v1959_v32 = vadd.f32 %v1946_v22, %v1929_v28  ;;  %v1385_v15 = vsel %vm1366_vm10, %v1382_v23, %v8215_v10  ;;  %v8216_v35 = vrot.slane %v7268_v46, 4  ;;  %v7285_v14 = vmul.f32 %v5824_v51, %v6172_v19  ;;  %4518 = vmatmul.mubr.msk.f32.gmra.mrb[72].mxu1 %vm2567_vm15, %v2553_v34 }
 0x36b   : > { %v1415_v45 = vadd.f32 %v1385_v15, %v1316_v33  ;;  %v1471_v22 = vsel %vm1452_vm11, %v1468_v52, %v8220_v16  ;;  %v8364_v6 = vrot.slane %v7080_v29, 3  ;;  %v8217_v28 = vrot.slane %v7275_v4, 5  ;;  %4520 = vmatprep.mubr.msk.f32.mxu1 %vm5079_vm6, %v8272_v49 }
 0x36c   : > { %v2044_v10 = vadd.f32 %v2013_v27, %v1959_v32  ;;  %v8365_v33 = vrot.slane %v7096_v56, 4  ;;  %v8219_v52 = vrot.slane %v7285_v14, 6  ;;  %v7309_v34 = vmul.f32 %v5826_v43, %v6172_v19  ;;  %v8367_v32 = vld [vmem:[#allocation8_spill] sm:$0xff] }
 0x36d   : > { %v1557_v23 = vsel %vm1538_vm12, %v8364_v6, %v8218_v37  ;;  %v1501_v29 = vadd.f32 %v1471_v22, %v1415_v45  ;;  %v8366_v15 = vrot.slane %v7100_v8, 5  ;;  %v1947_v27 = vmul.f32 %v5828_v48, %v6172_v19 }
 0x36e   : > { %v1643_v63 = vsel %vm1624_vm8, %v8365_v33, %v8216_v35  ;;  %v7320_v56 = vmul.f32 %v5830_v13, %v8367_v32  ;;  %v2129_v33 = vadd.f32 %v2098_v53, %v2044_v10  ;;  %v8368_v35 = vrot.slane %v7114_v1, 6 }
 0x36f   : > { %v1729_v6 = vsel %vm1710_vm13, %v8366_v15, %v8217_v28  ;;  %v8222_v22 = vrot.slane %v7309_v34, 7  ;;  %v7330_v8 = vmul.f32 %v5832_v50, %v8367_v32  ;;  %v1587_v15 = vadd.f32 %v1557_v23, %v1501_v29 }
 0x370   : > { %v1814_v45 = vsel %vm1018_vm5, %v8368_v35, %v8219_v52  ;;  %v2014_v28 = vrot.slane %v7320_v56, 1  ;;  %v7335_v37 = vmul.f32 %v5835_v18, %v8367_v32  ;;  %v7339_v53 = vmul.f32 %v5837_v17, %v8367_v32 }
 0x371   : > { %v2214_v1 = vadd.f32 %v2183_v60, %v2129_v33  ;;  %v8369_v10 = vrot.slane %v7135_v9, 7  ;;  %v2099_v52 = vrot.slane %v7330_v8, 2  ;;  %v7349_v23 = vmul.f32 %v5839_v24, %v8367_v32 }
 0x372   : > { %v1673_v29 = vadd.f32 %v1643_v63, %v1587_v15  ;;  %v8370_v16 = vrot.slane %v7149_v55, 1  ;;  %v2184_v60 = vrot.slane %v7335_v37, 3  ;;  %v2269_v33 = vrot.slane %v7339_v53, 4 }
 0x373   : > { %v1900_v35 = vsel %vm1881_vm14, %v8369_v10, %v8222_v22  ;;  %v2299_v9 = vadd.f32 %v2268_v36, %v2214_v1  ;;  %v2100_v10 = vsel %vm1452_vm11, %v2097_v12, %v2099_v52  ;;  %v8225_v22 = vrot.slane %v7349_v23, 5 }
 0x374   : > { %v2015_v54 = vsel %vm1366_vm10, %v8370_v16, %v2014_v28  ;;  %v7366_v63 = vmul.f32 %v5841_v25, %v8367_v32  ;;  %v1759_v55 = vadd.f32 %v1729_v6, %v1673_v29  ;;  %v8371_v16 = vrot.slane %v7176_v21, 3 }
 0x375   : > { %v2270_v38 = vsel %vm1624_vm8, %v2267_v42, %v2269_v33  ;;  %v7380_v12 = vmul.f32 %v5843_v0, %v8367_v32  ;;  %v2384_v36 = vadd.f32 %v2353_v20, %v2299_v9  ;;  %v2355_v6 = vsel %vm1710_vm13, %v2352_v5, %v8225_v22 }
 0x376   : > { %v2185_v15 = vsel %vm1538_vm12, %v8371_v16, %v2184_v60  ;;  %v8223_v21 = vrot.slane %v7366_v63, 6  ;;  %v1317_v1 = vmul.f32 %v5810_v40, %v6172_v19  ;;  %v1844_v29 = vadd.f32 %v1814_v45, %v1759_v55 }
 0x377   : > { %v8224_v61 = vrot.slane %v7380_v12, 7  ;;  %v7393_v42 = vmul.f32 %v5812_v59, %v8367_v32  ;;  %v7397_v20 = vmul.f32 %v5816_v62, %v8367_v32  ;;  %v2469_v9 = vadd.f32 %v2438_v47, %v2384_v36 }
 0x378   : > { %v2440_v31 = vsel %vm1018_vm5, %v2437_v11, %v8223_v21  ;;  %v7406_v19 = vmul.f32 %v5818_v2, %v8367_v32  ;;  %v7410_v5 = vmul.f32 %v5820_v58, %v8367_v32  ;;  %v1930_v45 = vadd.f32 %v1900_v35, %v1844_v29 }
 0x379   : > { %v8372_v55 = vrot.slane %v7222_v41, 7  ;;  %v8231_v57 = vrot.slane %v7393_v42, 1  ;;  %v8229_v11 = vrot.slane %v7397_v20, 2  ;;  %v2554_v16 = vadd.f32 %v7263_v30, %v2469_v9 }
 0x37a   : > { %v8227_v36 = vrot.slane %v7406_v19, 3  ;;  %v8226_v21 = vrot.slane %v7410_v5, 4  ;;  %v7426_v35 = vmul.f32 %v5822_v7, %v8367_v32  ;;  %v1960_v29 = vadd.f32 %v1947_v27, %v1930_v45 }
 0x37b   : > { %v7417_v47 = vsel %vm1881_vm14, %v8372_v55, %v8224_v61  ;;  %v8373_v41 = vrot.slane %v7242_v44, 1  ;;  %v8374_v61 = vrot.slane %v7252_v26, 2  ;;  %v7440_v9 = vmul.f32 %v5824_v51, %v8367_v32  ;;  %4521 = vmatmul.mubr.msk.f32.gmra.mrb[74].mxu1 %vm2567_vm15, %v2554_v16 }
 0x37c   : > { %v8375_v27 = vrot.slane %v7256_v3, 3  ;;  %v8376_v45 = vrot.slane %v7268_v46, 4  ;;  %4523 = vmatprep.mubr.msk.f32.mxu1 %vm5079_vm6, %v8272_v49  ;;  %v7459_v16 = vmul.f32 %v5826_v43, %v8367_v32  ;;  %v1948_v3 = vmul.f32 %v5828_v48, %v8367_v32 }
 0x37d   : > { %v1387_v55 = vsel %vm1366_vm10, %v8373_v41, %v8231_v57  ;;  %v1473_v30 = vsel %vm1452_vm11, %v8374_v61, %v8229_v11  ;;  %v8228_v61 = vrot.slane %v7426_v35, 5  ;;  %v2045_v41 = vadd.f32 %v2015_v54, %v1960_v29 }
 0x37e   : > { %v1416_v22 = vadd.f32 %v1387_v55, %v1317_v1  ;;  %v1559_v44 = vsel %vm1538_vm12, %v8375_v27, %v8227_v36  ;;  %v1645_v26 = vsel %vm1624_vm8, %v8376_v45, %v8226_v21  ;;  %v8230_v1 = vrot.slane %v7440_v9, 6  ;;  %v8378_v45 = vld [vmem:[#allocation9_spill] sm:$0xff] }
 0x37f   : > { %v8377_v46 = vrot.slane %v7275_v4, 5  ;;  %v7470_v21 = vmul.f32 %v5830_v13, %v8378_v45  ;;  %v7474_v54 = vmul.f32 %v5832_v50, %v8378_v45  ;;  %v2130_v29 = vadd.f32 %v2100_v10, %v2045_v41 }
 0x380   : > { %v1502_v55 = vadd.f32 %v1473_v30, %v1416_v22  ;;  %v8379_v36 = vrot.slane %v7285_v14, 6  ;;  %v1901_v30 = vrot.slane %v7459_v16, 7  ;;  %v7484_v4 = vmul.f32 %v5835_v18, %v8378_v45 }
 0x381   : > { %v1731_v27 = vsel %vm1710_vm13, %v8377_v46, %v8228_v61  ;;  %v2016_v61 = vrot.slane %v7470_v21, 1  ;;  %v2101_v11 = vrot.slane %v7474_v54, 2  ;;  %v7490_v10 = vmul.f32 %v5837_v17, %v8378_v45 }
 0x382   : > { %v1816_v22 = vsel %vm1018_vm5, %v8379_v36, %v8230_v1  ;;  %v1588_v46 = vadd.f32 %v1559_v44, %v1502_v55  ;;  %v2215_v41 = vadd.f32 %v2185_v15, %v2130_v29  ;;  %v8380_v14 = vrot.slane %v7309_v34, 7 }
 0x383   : > { %v2186_v1 = vrot.slane %v7484_v4, 3  ;;  %v7500_v44 = vmul.f32 %v5839_v24, %v8378_v45  ;;  %v2017_v57 = vsel %vm1366_vm10, %v2014_v28, %v2016_v61  ;;  %v2102_v34 = vsel %vm1452_vm11, %v2099_v52, %v2101_v11 }
 0x384   : > { %v1902_v36 = vsel %vm1881_vm14, %v8380_v14, %v1901_v30  ;;  %v1674_v55 = vadd.f32 %v1645_v26, %v1588_v46  ;;  %v8233_v15 = vrot.slane %v7490_v10, 4  ;;  %v2300_v29 = vadd.f32 %v2270_v38, %v2215_v41 }
 0x385   : > { %v2187_v26 = vsel %vm1538_vm12, %v2184_v60, %v2186_v1  ;;  %v8232_v46 = vrot.slane %v7500_v44, 5  ;;  %v7521_v28 = vmul.f32 %v5841_v25, %v8378_v45  ;;  %v7530_v8 = vmul.f32 %v5843_v0, %v8378_v45 }
 0x386   : > { %v1760_v56 = vadd.f32 %v1731_v27, %v1674_v55  ;;  %v2272_v52 = vsel %vm1624_vm8, %v2269_v33, %v8233_v15  ;;  %v1318_v37 = vmul.f32 %v5810_v40, %v8367_v32  ;;  %v2385_v60 = vadd.f32 %v2355_v6, %v2300_v29 }
 0x387   : > { %v8381_v38 = vrot.slane %v7349_v23, 5  ;;  %v8234_v41 = vrot.slane %v7521_v28, 6  ;;  %v7542_v53 = vmul.f32 %v5812_v59, %v8378_v45  ;;  %v8235_v14 = vrot.slane %v7530_v8, 7 }
 0x388   : > { %v1845_v33 = vadd.f32 %v1816_v22, %v1760_v56  ;;  %v7547_v55 = vmul.f32 %v5816_v62, %v8378_v45  ;;  %v7551_v32 = vmul.f32 %v5818_v2, %v8378_v45  ;;  %v2470_v23 = vadd.f32 %v2440_v31, %v2385_v60 }
 0x389   : > { %v2357_v27 = vsel %vm1710_vm13, %v8381_v38, %v8232_v46  ;;  %v8382_v6 = vrot.slane %v7366_v63, 6  ;;  %v1388_v38 = vrot.slane %v7542_v53, 1  ;;  %v7561_v22 = vmul.f32 %v5820_v58, %v8378_v45 }
 0x38a   : > { %v1931_v56 = vadd.f32 %v1902_v36, %v1845_v33  ;;  %v8383_v46 = vrot.slane %v7380_v12, 7  ;;  %v1474_v31 = vrot.slane %v7547_v55, 2  ;;  %v8237_v63 = vrot.slane %v7551_v32, 3 }
 0x38b   : > { %v2442_v29 = vsel %vm1018_vm5, %v8382_v6, %v8234_v41  ;;  %v2555_v60 = vadd.f32 %v7417_v47, %v2470_v23  ;;  %v8384_v6 = vrot.slane %v7393_v42, 1  ;;  %v8236_v36 = vrot.slane %v7561_v22, 4 }
 0x38c   : > { %v7568_v15 = vsel %vm1881_vm14, %v8383_v46, %v8235_v14  ;;  %v7581_v12 = vmul.f32 %v5822_v7, %v8378_v45  ;;  %v1961_v46 = vadd.f32 %v1948_v3, %v1931_v56  ;;  %v8385_v14 = vrot.slane %v7397_v20, 2 }
 0x38d   : > { %v1389_v41 = vsel %vm1366_vm10, %v8384_v6, %v1388_v38  ;;  %v8386_v42 = vrot.slane %v7406_v19, 3  ;;  %4524 = vmatmul.mubr.msk.f32.gmra.mrb[76].mxu1 %vm2567_vm15, %v2555_v60  ;;  %v8387_v6 = vrot.slane %v7410_v5, 4  ;;  %v7602_v20 = vmul.f32 %v5824_v51, %v8378_v45 }
 0x38e   : > { %v1417_v33 = vadd.f32 %v1389_v41, %v1318_v37  ;;  %v1475_v47 = vsel %vm1452_vm11, %v8385_v14, %v1474_v31  ;;  %v8238_v37 = vrot.slane %v7581_v12, 5  ;;  %v7606_v41 = vmul.f32 %v5826_v43, %v8378_v45  ;;  %4526 = vmatprep.mubr.msk.f32.mxu1 %vm5079_vm6, %v8272_v49 }
 0x38f   : > { %v1561_v23 = vsel %vm1538_vm12, %v8386_v42, %v8237_v63  ;;  %v1647_v3 = vsel %vm1624_vm8, %v8387_v6, %v8236_v36  ;;  %v2046_v19 = vadd.f32 %v2017_v57, %v1961_v46  ;;  %v1949_v5 = vmul.f32 %v5828_v48, %v8378_v45 }
 0x390   : > { %v1503_v14 = vadd.f32 %v1475_v47, %v1417_v33  ;;  %v7614_v56 = vmul.f32 %v5830_v13, %v6306_v39  ;;  %v8388_v60 = vrot.slane %v7426_v35, 5  ;;  %v1817_v6 = vrot.slane %v7602_v20, 6 }
 0x391   : > { %v1903_v36 = vrot.slane %v7606_v41, 7  ;;  %v7625_v57 = vmul.f32 %v5832_v50, %v6306_v39  ;;  %v2131_v46 = vadd.f32 %v2102_v34, %v2046_v19  ;;  %v7630_v63 = vmul.f32 %v5835_v18, %v6306_v39 }
 0x392   : > { %v1733_v42 = vsel %vm1710_vm13, %v8388_v60, %v8238_v37  ;;  %v1589_v33 = vadd.f32 %v1561_v23, %v1503_v14  ;;  %v2018_v47 = vrot.slane %v7614_v56, 1  ;;  %v8389_v35 = vrot.slane %v7440_v9, 6 }
 0x393   : > { %v1904_v37 = vsel %vm1881_vm14, %v1901_v30, %v1903_v36  ;;  %v8239_v34 = vrot.slane %v7625_v57, 2  ;;  %v7645_v23 = vmul.f32 %v5837_v17, %v6306_v39  ;;  %v2216_v19 = vadd.f32 %v2187_v26, %v2131_v46 }
 0x394   : > { %v1818_v60 = vsel %vm1018_vm5, %v8389_v35, %v1817_v6  ;;  %v1675_v14 = vadd.f32 %v1647_v3, %v1589_v33  ;;  %v2019_v9 = vsel %vm1366_vm10, %v2016_v61, %v2018_v47  ;;  %v2188_v35 = vrot.slane %v7630_v63, 3 }
 0x395   : > { %v2104_v16 = vsel %vm1452_vm11, %v2101_v11, %v8239_v34  ;;  %v8240_v30 = vrot.slane %v7645_v23, 4  ;;  %v7661_v26 = vmul.f32 %v5839_v24, %v6306_v39  ;;  %v7665_v3 = vmul.f32 %v5841_v25, %v6306_v39 }
 0x396   : > { %v2301_v21 = vadd.f32 %v2272_v52, %v2216_v19  ;;  %v1761_v61 = vadd.f32 %v1733_v42, %v1675_v14  ;;  %v2189_v54 = vsel %vm1538_vm12, %v2186_v1, %v2188_v35  ;;  %v7674_v11 = vmul.f32 %v5843_v0, %v6306_v39 }
 0x397   : > { %v8390_v46 = vrot.slane %v7490_v10, 4  ;;  %v8242_v34 = vrot.slane %v7661_v26, 5  ;;  %v8241_v52 = vrot.slane %v7665_v3, 6  ;;  %v1319_v42 = vmul.f32 %v5810_v40, %v8378_v45 }
 0x398   : > { %v2386_v4 = vadd.f32 %v2357_v27, %v2301_v21  ;;  %v1846_v19 = vadd.f32 %v1818_v60, %v1761_v61  ;;  %v8243_v1 = vrot.slane %v7674_v11, 7  ;;  %v7688_v14 = vmul.f32 %v5812_v59, %v6306_v39 }
 0x399   : > { %v2274_v33 = vsel %vm1624_vm8, %v8390_v46, %v8240_v30  ;;  %v8391_v10 = vrot.slane %v7500_v44, 5  ;;  %v8392_v30 = vrot.slane %v7521_v28, 6  ;;  %v7702_v27 = vmul.f32 %v5816_v62, %v6306_v39 }
 0x39a   : > { %v7706_v60 = vmul.f32 %v5818_v2, %v6306_v39  ;;  %v2471_v21 = vadd.f32 %v2442_v29, %v2386_v4  ;;  %v1932_v61 = vadd.f32 %v1904_v37, %v1846_v19  ;;  %v8393_v44 = vrot.slane %v7530_v8, 7 }
 0x39b   : > { %v2359_v46 = vsel %vm1710_vm13, %v8391_v10, %v8242_v34  ;;  %v2444_v45 = vsel %vm1018_vm5, %v8392_v30, %v8241_v52  ;;  %v1390_v28 = vrot.slane %v7688_v14, 1  ;;  %v1476_v30 = vrot.slane %v7702_v27, 2 }
 0x39c   : > { %v7713_v10 = vsel %vm1881_vm14, %v8393_v44, %v8243_v1  ;;  %v1562_v52 = vrot.slane %v7706_v60, 3  ;;  %v7720_v34 = vmul.f32 %v5820_v58, %v6306_v39  ;;  %v7724_v29 = vmul.f32 %v5822_v7, %v6306_v39 }
 0x39d   : > { %v2556_v37 = vadd.f32 %v7568_v15, %v2471_v21  ;;  %v1962_v8 = vadd.f32 %v1949_v5, %v1932_v61  ;;  %v1391_v4 = vsel %vm1366_vm10, %v1388_v38, %v1390_v28  ;;  %v7734_v19 = vmul.f32 %v5824_v51, %v6306_v39 }
 0x39e   : > { %v1418_v44 = vadd.f32 %v1391_v4, %v1319_v42  ;;  %v1477_v1 = vsel %vm1452_vm11, %v1474_v31, %v1476_v30  ;;  %v8394_v15 = vrot.slane %v7551_v32, 3  ;;  %v8244_v53 = vrot.slane %v7720_v34, 4 }
 0x39f   : > { %4527 = vmatmul.mubr.msk.f32.gmra.mrb[78].mxu1 %vm2567_vm15, %v2556_v37  ;;  %v2047_v38 = vadd.f32 %v2019_v9, %v1962_v8  ;;  %v1734_v21 = vrot.slane %v7724_v29, 5  ;;  %v1819_v42 = vrot.slane %v7734_v19, 6  ;;  %v7752_v55 = vmul.f32 %v5826_v43, %v6306_v39  ;;  %v8396_v37 = vld [vmem:[#allocation5_spill] sm:$0xff] }
 0x3a0   : > { %v1563_v5 = vsel %vm1538_vm12, %v8394_v15, %v1562_v52  ;;  %4529 = vmatprep.mubr.msk.f32.mxu1 %vm5079_vm6, %v8272_v49  ;;  %v1504_v31 = vadd.f32 %v1477_v1, %v1418_v44  ;;  %v8395_v32 = vrot.slane %v7561_v22, 4  ;;  %v1950_v9 = vmul.f32 %v5828_v48, %v6306_v39 }
 0x3a1   : > { %v7765_v8 = vmul.f32 %v5830_v13, %v8396_v37  ;;  %v2132_v4 = vadd.f32 %v2104_v16, %v2047_v38  ;;  %v8397_v15 = vrot.slane %v7581_v12, 5  ;;  %v1820_v22 = vsel %vm1018_vm5, %v1817_v6, %v1819_v42 }
 0x3a2   : > { %v1649_v61 = vsel %vm1624_vm8, %v8395_v32, %v8244_v53  ;;  %v8245_v44 = vrot.slane %v7752_v55, 7  ;;  %v1590_v32 = vadd.f32 %v1563_v5, %v1504_v31  ;;  %v7781_v13 = vmul.f32 %v5832_v50, %v8396_v37 }
 0x3a3   : > { %v1735_v1 = vsel %vm1710_vm13, %v8397_v15, %v1734_v21  ;;  %v2020_v53 = vrot.slane %v7765_v8, 1  ;;  %v7785_v12 = vmul.f32 %v5835_v18, %v8396_v37  ;;  %v2217_v16 = vadd.f32 %v2189_v54, %v2132_v4 }
 0x3a4   : > { %v1906_v20 = vsel %vm1881_vm14, %v1903_v36, %v8245_v44  ;;  %v7794_v6 = vmul.f32 %v5837_v17, %v8396_v37  ;;  %v7798_v5 = vmul.f32 %v5839_v24, %v8396_v37  ;;  %v1676_v38 = vadd.f32 %v1649_v61, %v1590_v32 }
 0x3a5   : > { %v2021_v31 = vsel %vm1366_vm10, %v2018_v47, %v2020_v53  ;;  %v2105_v54 = vrot.slane %v7781_v13, 2  ;;  %v2190_v8 = vrot.slane %v7785_v12, 3  ;;  %v2302_v41 = vadd.f32 %v2274_v33, %v2217_v16 }
 0x3a6   : > { %v2275_v36 = vrot.slane %v7794_v6, 4  ;;  %v2360_v4 = vrot.slane %v7798_v5, 5  ;;  %v7809_v15 = vmul.f32 %v5841_v25, %v8396_v37  ;;  %v1762_v44 = vadd.f32 %v1735_v1, %v1676_v38 }
 0x3a7   : > { %v8398_v56 = vrot.slane %v7625_v57, 2  ;;  %v2191_v33 = vsel %vm1538_vm12, %v2188_v35, %v2190_v8  ;;  %v7823_v61 = vmul.f32 %v5843_v0, %v8396_v37  ;;  %v2387_v32 = vadd.f32 %v2359_v46, %v2302_v41 }
 0x3a8   : > { %v8399_v1 = vrot.slane %v7645_v23, 4  ;;  %v8400_v57 = vrot.slane %v7661_v26, 5  ;;  %v8246_v63 = vrot.slane %v7809_v15, 6  ;;  %v1847_v35 = vadd.f32 %v1820_v22, %v1762_v44 }
 0x3a9   : > { %v2106_v47 = vsel %vm1452_vm11, %v8398_v56, %v2105_v54  ;;  %v2530_v56 = vrot.slane %v7823_v61, 7  ;;  %v1320_v46 = vmul.f32 %v5810_v40, %v6306_v39  ;;  %v1351_v41 = vmul.f32 %v5812_v59, %v8396_v37 }
 0x3aa   : > { %v2276_v16 = vsel %vm1624_vm8, %v8399_v1, %v2275_v36  ;;  %v2361_v38 = vsel %vm1710_vm13, %v8400_v57, %v2360_v4  ;;  %v2472_v23 = vadd.f32 %v2444_v45, %v2387_v32  ;;  %v8401_v1 = vrot.slane %v7665_v3, 6 }
 0x3ab   : > { %v1437_v57 = vmul.f32 %v5816_v62, %v8396_v37  ;;  %v1523_v22 = vmul.f32 %v5818_v2, %v8396_v37  ;;  %v1933_v44 = vadd.f32 %v1906_v20, %v1847_v35  ;;  %v8402_v40 = vrot.slane %v7674_v11, 7 }
 0x3ac   : > { %v2446_v26 = vsel %vm1018_vm5, %v8401_v1, %v8246_v63  ;;  %v1392_v39 = vrot.slane %v1351_v41, 1  ;;  %v1609_v45 = vmul.f32 %v5820_v58, %v8396_v37  ;;  %v2557_v3 = vadd.f32 %v7713_v10, %v2472_v23 }
 0x3ad   : > { %v2531_v59 = vsel %vm1881_vm14, %v8402_v40, %v2530_v56  ;;  %v1478_v32 = vrot.slane %v1437_v57, 2  ;;  %v1564_v1 = vrot.slane %v1523_v22, 3  ;;  %v1695_v62 = vmul.f32 %v5822_v7, %v8396_v37 }
 0x3ae   : > { %v1963_v63 = vadd.f32 %v1950_v9, %v1933_v44  ;;  %v1393_v2 = vsel %vm1366_vm10, %v1390_v28, %v1392_v39  ;;  %v1650_v20 = vrot.slane %v1609_v45, 4  ;;  %v1781_v11 = vmul.f32 %v5824_v51, %v8396_v37  ;;  %4530 = vmatmul.mubr.msk.f32.gmra.mrb[80].mxu1 %vm2567_vm15, %v2557_v3 }
 0x3af   : > { %v1419_v35 = vadd.f32 %v1393_v2, %v1320_v46  ;;  %v1479_v58 = vsel %vm1452_vm11, %v1476_v30, %v1478_v32  ;;  %v1565_v7 = vsel %vm1538_vm12, %v1562_v52, %v1564_v1  ;;  %v1736_v10 = vrot.slane %v1695_v62, 5  ;;  %4532 = vmatprep.mubr.msk.f32.mxu1 %vm5079_vm6, %v8272_v49  ;;  %v8404_v30 = vld [vmem:[#allocation3_spill] sm:$0xff] }
 0x3b0   : > { %v2048_v14 = vadd.f32 %v2021_v31, %v1963_v63  ;;  %v8403_v28 = vrot.slane %v7720_v34, 4  ;;  %v1821_v9 = vrot.slane %v1781_v11, 6  ;;  %v1866_v46 = vmul.f32 %v5826_v43, %v8396_v37  ;;  %v8405_v34 = vld [vmem:[#allocation2_spill] sm:$0xff] }
 0x3b1   : > { %v1505_v27 = vadd.f32 %v1479_v58, %v1419_v35  ;;  %v1737_v60 = vsel %vm1710_vm13, %v1734_v21, %v1736_v10  ;;  %v2022_v52 = vrot.slane %v8404_v30, 1  ;;  %v2067_v23 = vmul.f32 %v5832_v50, %v8405_v34 }
 0x3b2   : > { %v1651_v51 = vsel %vm1624_vm8, %v8403_v28, %v1650_v20  ;;  %v2133_v41 = vadd.f32 %v2106_v47, %v2048_v14  ;;  %v1822_v31 = vsel %vm1018_vm5, %v1819_v42, %v1821_v9  ;;  %v1907_v63 = vrot.slane %v1866_v46, 7 }
 0x3b3   : > { %v1591_v57 = vadd.f32 %v1565_v7, %v1505_v27  ;;  %v2023_v22 = vsel %vm1366_vm10, %v2020_v53, %v2022_v52  ;;  %v2152_v43 = vmul.f32 %v5835_v18, %v8405_v34  ;;  %v2237_v29 = vmul.f32 %v5837_v17, %v8405_v34  ;;  %v7937_v52 = vld [vmem:[%s5144_s12 + $0x121] ss:$0 sm:$0xff] }
 0x3b4   : > { %v2218_v21 = vadd.f32 %v2191_v33, %v2133_v41  ;;  %v8406_v47 = vrot.slane %v7752_v55, 7  ;;  %v2107_v44 = vrot.slane %v2067_v23, 2  ;;  %v2322_v42 = vmul.f32 %v5839_v24, %v8405_v34 }
 0x3b5   : > { %v1677_v40 = vadd.f32 %v1651_v51, %v1591_v57  ;;  %v2192_v50 = vrot.slane %v2152_v43, 3  ;;  %v2277_v39 = vrot.slane %v2237_v29, 4  ;;  %v2407_v53 = vmul.f32 %v5841_v25, %v8405_v34 }
 0x3b6   : > { %v1908_v19 = vsel %vm1881_vm14, %v8406_v47, %v1907_v63  ;;  %v2303_v45 = vadd.f32 %v2276_v16, %v2218_v21  ;;  %v2108_v18 = vsel %vm1452_vm11, %v2105_v54, %v2107_v44  ;;  %v2362_v17 = vrot.slane %v2322_v42, 5 }
 0x3b7   : > { %v2492_v55 = vmul.f32 %v5843_v0, %v8405_v34  ;;  %v1763_v33 = vadd.f32 %v1737_v60, %v1677_v40  ;;  %v2193_v24 = vsel %vm1538_vm12, %v2190_v8, %v2192_v50  ;;  %v2278_v3 = vsel %vm1624_vm8, %v2275_v36, %v2277_v39 }
 0x3b8   : > { %v2447_v32 = vrot.slane %v2407_v53, 6  ;;  %v2388_v25 = vadd.f32 %v2361_v38, %v2303_v45  ;;  %v2363_v13 = vsel %vm1710_vm13, %v2360_v4, %v2362_v17  ;;  %v8407_v1 = vrot.slane %v7809_v15, 6 }
 0x3b9   : > { %v2532_v54 = vrot.slane %v2492_v55, 7  ;;  %v1848_v16 = vadd.f32 %v1822_v31, %v1763_v33  ;;  %v1951_v8 = vmul.f32 %v5828_v48, %v8396_v37  ;;  %v7929_v48 = vld [vmem:[%s5561_s11 + $0x64] ss:$0 sm:$0xff]  ;;  %v4623_v37 = vpop.f32.mrb[74].mxu0  ;;  %v8408_v10 = vmov 0.0|0.0  }
 0x3ba   : > { %v2448_v0 = vsel %vm1018_vm5, %v8407_v1, %v2447_v32  ;;  %v2473_v62 = vadd.f32 %v2446_v26, %v2388_v25 }
 0x3bb   : > { %v2533_v12 = vsel %vm1881_vm14, %v2530_v56, %v2532_v54  ;;  %v1934_v6 = vadd.f32 %v1908_v19, %v1848_v16  ;;  %v3427_v56 = vadd.f32 %v4623_v37, %v7929_v48 }
 0x3bc   : > { %v2558_v36 = vadd.f32 %v2531_v59, %v2473_v62  ;;  %v3421_v59 = vpop.f32.mrb[75].mxu0 }
 0x3bd   : > { %v1964_v5 = vadd.f32 %v1951_v8, %v1934_v6  ;;  %v3422_v11 = vadd.f32 %v7929_v48, %v3421_v59  ;;  %v3571_v35 = vmul.f32 %v3427_v56, %v3427_v56  ;;  %v4626_v14 = vpop.f32.mrb[76].mxu0 }
 0x3be   : > { %4533 = vmatmul.mubr.msk.f32.gmra.mrb[82].mxu1 %vm2567_vm15, %v2558_v36  ;;  %v3437_v51 = vadd.f32 %v4626_v14, %v7929_v48  ;;  %v3431_v9 = vpop.f32.mrb[77].mxu0 }
 0x3bf   : > { %4535 = vmatprep.mubr.msk.f32.mxu1 %vm5079_vm6, %v8272_v49  ;;  %v2049_v4 = vadd.f32 %v2023_v22, %v1964_v5  ;;  %v3570_v58 = vmul.f32 %v3422_v11, %v3422_v11  ;;  %v3432_v27 = vadd.f32 %v7929_v48, %v3431_v9 }
 0x3c0   : > { %v3573_v60 = vmul.f32 %v3437_v51, %v3437_v51 }
 0x3c1   : > { %v2134_v15 = vadd.f32 %v2108_v18, %v2049_v4  ;;  %v4862_v7 = vpack.c.bf16 %v3571_v35, %v3570_v58  ;;  %v3572_v30 = vmul.f32 %v3432_v27, %v3432_v27 }
 0x3c3   : > { %v2219_v38 = vadd.f32 %v2193_v24, %v2134_v15  ;;  %4863 = vmatpush1.bf16.msra.mxu0 %v4862_v7  ;;  %v4865_v41 = vpack.c.bf16 %v3573_v60, %v3572_v30 }
 0x3c4   : > { %4864 = vmatprep.subr.bf16.mxu0 %v8408_v10 }
 0x3c5   : > { %v2304_v26 = vadd.f32 %v2278_v3, %v2219_v38 }
 0x3c6   : > { %v4629_v34 = vpop.f32.mrb[78].mxu0 }
 0x3c7   : > { %v2389_v2 = vadd.f32 %v2363_v13, %v2304_v26  ;;  %4866 = vmatpush1.bf16.msra.mxu0 %v4865_v41  ;;  %v3447_v23 = vadd.f32 %v4629_v34, %v7929_v48  ;;  %v3441_v57 = vpop.f32.mrb[79].mxu0 }
 0x3c8   : > { %4867 = vmatprep.subr.bf16.mxu0 %v8408_v10  ;;  %v3442_v43 = vadd.f32 %v7929_v48, %v3441_v57 }
 0x3c9   : > { %v2474_v61 = vadd.f32 %v2448_v0, %v2389_v2  ;;  %v3575_v21 = vmul.f32 %v3447_v23, %v3447_v23 }
 0x3ca   : > { %v3574_v44 = vmul.f32 %v3442_v43, %v3442_v43 }
 0x3cb   : > { %v2559_v20 = vadd.f32 %v2533_v12, %v2474_v61 }
 0x3cc   : > { %v4868_v40 = vpack.c.bf16 %v3575_v21, %v3574_v44 }
 0x3cd   : > { %4536 = vmatmul.mubr.msk.f32.gmra.mrb[84].mxu1 %vm2567_vm15, %v2559_v20  ;;  %v2673_v28 = vpop.f32.mrb[60].mxu1 }
 0x3ce   : > { %4564 = vmatprep.mubr.msk.f32.mxu1 %vm5079_vm6, %v8272_v49  ;;  %v4501_v46 = vpop.f32.mrb[61].mxu1  ;;  %v2674_v31 = vadd.f32 %v7937_v52, %v2673_v28  ;;  %4869 = vmatpush1.bf16.msra.mxu0 %v4868_v40 }
 0x3cf   : > { %4870 = vmatprep.subr.bf16.mxu0 %v8408_v10 }
 0x3d0   : > { %v2750_v63 = vmin.f32 %v2674_v31, 0.0  ;;  %v4632_v53 = vpop.f32.mrb[80].mxu0  ;;  %vm2737_vm0 = vcmp.gt.f32.partialorder %v2674_v31, 0.0 }
 0x3d1   : > { %v3457_v45 = vadd.f32 %v4632_v53, %v7929_v48  ;;  %v3451_v18 = vpop.f32.mrb[81].mxu0 }
 0x3d2   : > { %v2763_v22 = vmul.f32 1.442695, %v2750_v63  ;;  %v3452_v55 = vadd.f32 %v7929_v48, %v3451_v18 }
 0x3d3   : > { %v3577_v3 = vmul.f32 %v3457_v45, %v3457_v45 }
 0x3d4   : > { %5033 = vpow2.f32 %v2763_v22  ;;  %v3576_v25 = vmul.f32 %v3452_v55, %v3452_v55 }
 0x3d6   : > { %v4871_v54 = vpack.c.bf16 %v3577_v3, %v3576_v25 }
 0x3d8   : > { %4872 = vmatpush1.bf16.msra.mxu0 %v4871_v54 }
 0x3d9   : > { %4873 = vmatprep.subr.bf16.mxu0 %v8408_v10 }
 0x3de   : > { %v5034_v39 = vpop.eup %5033 }
 0x3df   : > { %v4176_v33 = vadd.f32 -1.0, %v5034_v39 }
 0x3e1   : > { %v2678_v29 = vpop.f32.mrb[62].mxu1  ;;  %v2802_v16 = vsel %vm2737_vm0, %v2674_v31, %v4176_v33  ;;  %vm2816_vm0 = vcmask 850944  }
 0x3e2   : > { %v2679_v47 = vadd.f32 %v7937_v52, %v2678_v29  ;;  %v4504_v19 = vpop.f32.mrb[63].mxu1 }
 0x3e4   : > { %v2751_v42 = vmin.f32 %v2679_v47, 0.0  ;;  %vm2738_vm1 = vcmp.gt.f32.partialorder %v2679_v47, 0.0 }
 0x3e6   : > { %v2765_v50 = vmul.f32 1.442695, %v2751_v42 }
 0x3e8   : > { %5035 = vpow2.f32 %v2765_v50 }
 0x3ea   : > { %v4635_v6 = vpop.f32.mrb[82].mxu0 }
 0x3eb   : > { %v3467_v8 = vadd.f32 %v4635_v6, %v7929_v48  ;;  %v3461_v36 = vpop.f32.mrb[83].mxu0 }
 0x3ec   : > { %v3462_v5 = vadd.f32 %v7929_v48, %v3461_v36 }
 0x3ed   : > { %v3579_v4 = vmul.f32 %v3467_v8, %v3467_v8 }
 0x3ee   : > { %v3578_v38 = vmul.f32 %v3462_v5, %v3462_v5 }
 0x3f0   : > { %v4874_v20 = vpack.c.bf16 %v3579_v4, %v3578_v38 }
 0x3f2   : > { %v5036_v32 = vpop.eup %5035  ;;  %4875 = vmatpush1.bf16.msra.mxu0 %v4874_v20 }
 0x3f3   : > { %v4177_v13 = vadd.f32 -1.0, %v5036_v32  ;;  %4876 = vmatprep.subr.bf16.mxu0 %v8408_v10 }
 0x3f4   : > { %v2683_v17 = vpop.f32.mrb[64].mxu1 }
 0x3f5   : > { %v4507_v24 = vpop.f32.mrb[65].mxu1  ;;  %v2803_v1 = vsel %vm2738_vm1, %v2679_v47, %v4177_v13  ;;  %v2684_v62 = vadd.f32 %v7937_v52, %v2683_v17  ;;  %vm3690_vm1 = vcmask 326656  }
 0x3f6   : > { %v4808_v0 = vpack.c.bf16 %v2803_v1, %v2802_v16 }
 0x3f7   : > { %v2752_v12 = vmin.f32 %v2684_v62, 0.0  ;;  %vm2739_vm2 = vcmp.gt.f32.partialorder %v2684_v62, 0.0 }
 0x3f8   : > { %4809 = vmatpush3.bf16.msra.mxu1 %v4808_v0 }
 0x3f9   : > { %4810 = vmatprep.subr.bf16.mxu1 %v8408_v10  ;;  %v2767_v15 = vmul.f32 1.442695, %v2752_v12 }
 0x3fb   : > { %5037 = vpow2.f32 %v2767_v15 }
 0x3fd   : > { %v4638_v59 = vpop.f32.mrb[84].mxu0 }
 0x3fe   : > { %v3471_v11 = vpop.f32.mrb[85].mxu0  ;;  %v3477_v35 = vadd.f32 %v4638_v59, %v7929_v48 }
 0x3ff   : > { %v3472_v58 = vadd.f32 %v7929_v48, %v3471_v11 }
 0x400   : > { %v3581_v7 = vmul.f32 %v3477_v35, %v3477_v35 }
 0x401   : > { %v3580_v14 = vmul.f32 %v3472_v58, %v3472_v58 }
 0x403   : > { %v4877_v27 = vpack.c.bf16 %v3581_v7, %v3580_v14 }
 0x405   : > { %v5038_v51 = vpop.eup %5037  ;;  %4878 = vmatpush1.bf16.msra.mxu0 %v4877_v27 }
 0x406   : > { %v4178_v23 = vadd.f32 -1.0, %v5038_v51  ;;  %4879 = vmatprep.subr.bf16.mxu0 %v8408_v10 }
 0x408   : > { %v2688_v26 = vpop.f32.mrb[66].mxu1  ;;  %v2804_v55 = vsel %vm2739_vm2, %v2684_v62, %v4178_v23  ;;  %vm4020_vm2 = vcmask 58368  }
 0x409   : > { %v2689_v2 = vadd.f32 %v7937_v52, %v2688_v26  ;;  %v4510_v61 = vpop.f32.mrb[67].mxu1 }
 0x40b   : > { %v2753_v37 = vmin.f32 %v2689_v2, 0.0  ;;  %vm2740_vm3 = vcmp.gt.f32.partialorder %v2689_v2, 0.0 }
 0x40d   : > { %v2769_v56 = vmul.f32 1.442695, %v2753_v37 }
 0x40f   : > { %5039 = vpow2.f32 %v2769_v56  ;;  %v4641_v28 = vpop.f32.mrb[86].mxu0 }
 0x410   : > { %v3487_v9 = vadd.f32 %v4641_v28, %v7929_v48  ;;  %v3481_v46 = vpop.f32.mrb[87].mxu0 }
 0x411   : > { %v3482_v60 = vadd.f32 %v7929_v48, %v3481_v46 }
 0x412   : > { %v3583_v31 = vmul.f32 %v3487_v9, %v3487_v9 }
 0x413   : > { %v4644_v30 = vpop.f32.mrb[88].mxu0  ;;  %v3582_v22 = vmul.f32 %v3482_v60, %v3482_v60 }
 0x414   : > { %v3497_v63 = vadd.f32 %v4644_v30, %v7929_v48  ;;  %v3491_v34 = vpop.f32.mrb[89].mxu0 }
 0x415   : > { %v3492_v43 = vadd.f32 %v7929_v48, %v3491_v34  ;;  %v4880_v40 = vpack.c.bf16 %v3583_v31, %v3582_v22 }
 0x416   : > { %v3585_v47 = vmul.f32 %v3497_v63, %v3497_v63 }
 0x417   : > { %v4647_v29 = vpop.f32.mrb[90].mxu0  ;;  %v3584_v39 = vmul.f32 %v3492_v43, %v3492_v43  ;;  %4881 = vmatpush1.bf16.msra.mxu0 %v4880_v40 }
 0x418   : > { %v3507_v19 = vadd.f32 %v4647_v29, %v7929_v48  ;;  %v3501_v44 = vpop.f32.mrb[91].mxu0  ;;  %4882 = vmatprep.subr.bf16.mxu0 %v8408_v10 }
 0x419   : > { %v5040_v21 = vpop.eup %5039  ;;  %v3502_v45 = vadd.f32 %v7929_v48, %v3501_v44  ;;  %v4883_v25 = vpack.c.bf16 %v3585_v47, %v3584_v39 }
 0x41a   : > { %v2693_v41 = vpop.f32.mrb[68].mxu1  ;;  %v4179_v42 = vadd.f32 -1.0, %v5040_v21  ;;  %v3587_v53 = vmul.f32 %v3507_v19, %v3507_v19 }
 0x41b   : > { %v4513_v57 = vpop.f32.mrb[69].mxu1  ;;  %v4650_v50 = vpop.f32.mrb[92].mxu0  ;;  %v7965_v24 = vadd.f32 %v7937_v52, %v2693_v41  ;;  %v3586_v13 = vmul.f32 %v3502_v45, %v3502_v45  ;;  %4884 = vmatpush1.bf16.msra.mxu0 %v4883_v25 }
 0x41c   : > { %v3517_v18 = vadd.f32 %v4650_v50, %v7929_v48  ;;  %v3511_v17 = vpop.f32.mrb[93].mxu0  ;;  %v2805_v33 = vsel %vm2740_vm3, %v2689_v2, %v4179_v42  ;;  %4885 = vmatprep.subr.bf16.mxu0 %v8408_v10  ;;  %v3601_v2 = vld [vmem:[%s8102_s4 + $0x8] sm:$0xff] }
 0x41d   : > { %v3512_v3 = vadd.f32 %v7929_v48, %v3511_v17  ;;  %v4811_v32 = vpack.c.bf16 %v2805_v33, %v2804_v55  ;;  %v4886_v0 = vpack.c.bf16 %v3587_v53, %v3586_v13  ;;  %v2754_v36 = vmin.f32 %v7965_v24, 0.0  ;;  %4227 = vmatprep.mubr.msk.f32.mxu0 %vm3602_vm4, %v3601_v2 }
 0x41e   : > { %v3589_v54 = vmul.f32 %v3517_v18, %v3517_v18  ;;  %vm2741_vm5 = vcmp.gt.f32.partialorder %v7965_v24, 0.0 }
 0x41f   : > { %v3588_v16 = vmul.f32 %v3512_v3, %v3512_v3  ;;  %4812 = vmatpush3.bf16.msra.mxu1 %v4811_v32  ;;  %4887 = vmatpush1.bf16.msra.mxu0 %v4886_v0  ;;  %v2771_v37 = vmul.f32 1.442695, %v2754_v36  ;;  %v3600_v32 = vld [vmem:[%s8102_s4] sm:$0xff] }
 0x420   : > { %4813 = vmatprep.subr.bf16.mxu1 %v8408_v10  ;;  %4888 = vmatprep.subr.bf16.mxu0 %v8408_v10 }
 0x421   : > { %v4653_v1 = vpop.f32.mrb[94].mxu0  ;;  %v4889_v6 = vpack.c.bf16 %v3589_v54, %v3588_v16  ;;  %5041 = vpow2.f32 %v2771_v37 }
 0x422   : > { %v3527_v12 = vadd.f32 %v4653_v1, %v7929_v48  ;;  %v3521_v62 = vpop.f32.mrb[95].mxu0 }
 0x423   : > { %v3522_v8 = vadd.f32 %v7929_v48, %v3521_v62  ;;  %4890 = vmatpush1.bf16.msra.mxu0 %v4889_v6 }
 0x424   : > { %v3591_v5 = vmul.f32 %v3527_v12, %v3527_v12  ;;  %4891 = vmatprep.subr.bf16.mxu0 %v8408_v10 }
 0x425   : > { %v3590_v4 = vmul.f32 %v3522_v8, %v3522_v8  ;;  %v4656_v15 = vpop.f32.mrb[96].mxu0 }
 0x426   : > { %v3537_v38 = vadd.f32 %v4656_v15, %v7929_v48  ;;  %v3531_v26 = vpop.f32.mrb[97].mxu0 }
 0x427   : > { %v4892_v61 = vpack.c.bf16 %v3591_v5, %v3590_v4  ;;  %v3532_v20 = vadd.f32 %v7929_v48, %v3531_v26 }
 0x428   : > { %v3593_v56 = vmul.f32 %v3537_v38, %v3537_v38 }
 0x429   : > { %v3592_v11 = vmul.f32 %v3532_v20, %v3532_v20  ;;  %4893 = vmatpush1.bf16.msra.mxu0 %v4892_v61 }
 0x42a   : > { %v4659_v35 = vpop.f32.mrb[98].mxu0  ;;  %4894 = vmatprep.subr.bf16.mxu0 %v8408_v10 }
 0x42b   : > { %v3547_v14 = vadd.f32 %v4659_v35, %v7929_v48  ;;  %v3541_v28 = vpop.f32.mrb[99].mxu0  ;;  %v4895_v51 = vpack.c.bf16 %v3593_v56, %v3592_v11  ;;  %v5042_v40 = vpop.eup %5041 }
 0x42c   : > { %v3542_v9 = vadd.f32 %v7929_v48, %v3541_v28  ;;  %v4180_v45 = vadd.f32 -1.0, %v5042_v40 }
 0x42d   : > { %v2698_v59 = vpop.f32.mrb[70].mxu1  ;;  %v3595_v27 = vmul.f32 %v3547_v14, %v3547_v14  ;;  %4896 = vmatpush1.bf16.msra.mxu0 %v4895_v51 }
 0x42e   : > { %v2699_v58 = vadd.f32 %v7937_v52, %v2698_v59  ;;  %v4516_v7 = vpop.f32.mrb[71].mxu1  ;;  %v3594_v60 = vmul.f32 %v3542_v9, %v3542_v9  ;;  %v4662_v30 = vpop.f32.mrb[100].mxu0  ;;  %4897 = vmatprep.subr.bf16.mxu0 %v8408_v10 }
 0x42f   : > { %v3557_v31 = vadd.f32 %v4662_v30, %v7929_v48  ;;  %v3551_v63 = vpop.f32.mrb[101].mxu0 }
 0x430   : > { %v2755_v46 = vmin.f32 %v2699_v58, 0.0  ;;  %v4898_v34 = vpack.c.bf16 %v3595_v27, %v3594_v60  ;;  %v3552_v23 = vadd.f32 %v7929_v48, %v3551_v63  ;;  %vm2742_vm7 = vcmp.gt.f32.partialorder %v2699_v58, 0.0 }
 0x431   : > { %v3597_v57 = vmul.f32 %v3557_v31, %v3557_v31 }
 0x432   : > { %v2773_v41 = vmul.f32 1.442695, %v2755_v46  ;;  %v3596_v22 = vmul.f32 %v3552_v23, %v3552_v23  ;;  %4899 = vmatpush1.bf16.msra.mxu0 %v4898_v34 }
 0x433   : > { %4900 = vmatprep.subr.bf16.mxu0 %v8408_v10 }
 0x434   : > { %5043 = vpow2.f32 %v2773_v41  ;;  %v4901_v47 = vpack.c.bf16 %v3597_v57, %v3596_v22 }
 0x435   : > { %v4665_v43 = vpop.f32.mrb[102].mxu0 }
 0x436   : > { %v3567_v29 = vadd.f32 %v4665_v43, %v7929_v48  ;;  %v3561_v21 = vpop.f32.mrb[103].mxu0  ;;  %4902 = vmatpush1.bf16.msra.mxu0 %v4901_v47 }
 0x437   : > { %v3562_v19 = vadd.f32 %v7929_v48, %v3561_v21  ;;  %4903 = vmatprep.subr.bf16.mxu0 %v8408_v10  ;;  %v2806_v48 = vsel %vm2741_vm5, %v7965_v24, %v4180_v45  ;;  %v2897_v45 = vld [vmem:[%s8012_s22 + $0x8] sm:$0xff] }
 0x438   : > { %v3599_v44 = vmul.f32 %v3567_v29, %v3567_v29 }
 0x439   : > { %v3598_v42 = vmul.f32 %v3562_v19, %v3562_v19 }
 0x43b   : > { %v4904_v39 = vpack.c.bf16 %v3599_v44, %v3598_v42 }
 0x43d   : > { %v2703_v50 = vpop.f32.mrb[72].mxu1  ;;  %4905 = vmatpush1.bf16.msra.mxu0 %v4904_v39 }
 0x43e   : > { %v4519_v53 = vpop.f32.mrb[73].mxu1  ;;  %v5044_v18 = vpop.eup %5043  ;;  %v2704_v33 = vadd.f32 %v7937_v52, %v2703_v50 }
 0x43f   : > { %v4181_v17 = vadd.f32 -1.0, %v5044_v18 }
 0x440   : > { %v2756_v25 = vmin.f32 %v2704_v33, 0.0  ;;  %3671 = vmatmul.mubr.f32.vlgmr.msra.gmra.mrb[104].mxu0 %v3600_v32  ;;  %vm2743_vm8 = vcmp.gt.f32.partialorder %v2704_v33, 0.0 }
 0x441   : > { %v2807_v55 = vsel %vm2742_vm7, %v2699_v58, %v4181_v17 }
 0x442   : > { %v4814_v3 = vpack.c.bf16 %v2807_v55, %v2806_v48  ;;  %v2775_v13 = vmul.f32 1.442695, %v2756_v25  ;;  %v2815_v48 = vld [vmem:[%s8101_s3] sm:$0xff]  ;;  %v2972_v25 = vld [vmem:[%s8012_s22 + $0x10] sm:$0xff] }
 0x444   : > { %4815 = vmatpush3.bf16.msra.mxu1 %v4814_v3  ;;  %5045 = vpow2.f32 %v2775_v13  ;;  %v2973_v13 = vld [vmem:[%s8012_s22 + $0x18] sm:$0xff] }
 0x445   : > { %4816 = vmatprep.subr.bf16.mxu1 %v8408_v10 }
 0x44e   : > { %v2708_v54 = vpop.f32.mrb[74].mxu1  ;;  %v5046_v12 = vpop.eup %5045 }
 0x44f   : > { %v2709_v16 = vadd.f32 %v7937_v52, %v2708_v54  ;;  %v4522_v1 = vpop.f32.mrb[75].mxu1  ;;  %v4182_v6 = vadd.f32 -1.0, %v5046_v12  ;;  %v4829_v54 = vpack.c.bf16 %v2973_v13, %v2972_v25 }
 0x451   : > { %v2757_v24 = vmin.f32 %v2709_v16, 0.0  ;;  %vm2744_vm9 = vcmp.gt.f32.partialorder %v2709_v16, 0.0  ;;  %v2808_v4 = vsel %vm2743_vm8, %v2704_v33, %v4182_v6  ;;  %v3124_v6 = vld [vmem:[%s8012_s22 + $0x30] sm:$0xff] }
 0x453   : > { %v2777_v0 = vmul.f32 1.442695, %v2757_v24  ;;  %v3048_v24 = vld [vmem:[%s8012_s22 + $0x20] sm:$0xff] }
 0x455   : > { %5047 = vpow2.f32 %v2777_v0  ;;  %v3049_v0 = vld [vmem:[%s8012_s22 + $0x28] sm:$0xff] }
 0x456   : > { %v4832_v12 = vpack.c.bf16 %v3049_v0, %v3048_v24 }
 0x45f   : > { %v5048_v36 = vpop.eup %5047 }
 0x460   : > { %v2713_v62 = vpop.f32.mrb[76].mxu1  ;;  %v4183_v5 = vadd.f32 -1.0, %v5048_v36 }
 0x461   : > { %v4525_v8 = vpop.f32.mrb[77].mxu1  ;;  %v2714_v26 = vadd.f32 %v7937_v52, %v2713_v62 }
 0x462   : > { %v2809_v15 = vsel %vm2744_vm9, %v2709_v16, %v4183_v5  ;;  %v3125_v8 = vld [vmem:[%s8012_s22 + $0x38] sm:$0xff] }
 0x463   : > { %v4817_v38 = vpack.c.bf16 %v2809_v15, %v2808_v4  ;;  %v2758_v2 = vmin.f32 %v2714_v26, 0.0  ;;  %vm2745_vm10 = vcmp.gt.f32.partialorder %v2714_v26, 0.0  ;;  %v4835_v5 = vpack.c.bf16 %v3125_v8, %v3124_v6  ;;  %v3685_v15 = vld [vmem:[%s8012_s22 + $0x40] sm:$0xff] }
 0x465   : > { %4818 = vmatpush3.bf16.msra.mxu1 %v4817_v38  ;;  %v2779_v61 = vmul.f32 1.442695, %v2758_v2  ;;  %v3686_v38 = vld [vmem:[%s8012_s22 + $0x48] sm:$0xff] }
 0x466   : > { %4819 = vmatprep.subr.bf16.mxu1 %v8408_v10 }
 0x467   : > { %5049 = vpow2.f32 %v2779_v61  ;;  %v3687_v61 = vld [vmem:[%s8012_s22 + $0x50] sm:$0xff] }
 0x471   : > { %v5050_v35 = vpop.eup %5049 }
 0x472   : > { %v2718_v20 = vpop.f32.mrb[78].mxu1  ;;  %v4184_v14 = vadd.f32 -1.0, %v5050_v35 }
 0x473   : > { %v2719_v37 = vadd.f32 %v7937_v52, %v2718_v20  ;;  %v4528_v56 = vpop.f32.mrb[79].mxu1  ;;  %v3688_v20 = vld [vmem:[%s8012_s22 + $0x58] sm:$0xff] }
 0x474   : > { %v2810_v9 = vsel %vm2745_vm10, %v2714_v26, %v4184_v14  ;;  %v4907_v26 = vpack.c.bf16 %v3686_v38, %v3685_v15  ;;  %v3767_v14 = vld [vmem:[%s8012_s22 + $0x78] sm:$0xff] }
 0x475   : > { %v2759_v59 = vmin.f32 %v2719_v37, 0.0  ;;  %vm2746_vm11 = vcmp.gt.f32.partialorder %v2719_v37, 0.0 }
 0x477   : > { %v2781_v11 = vmul.f32 1.442695, %v2759_v59  ;;  %v3765_v59 = vld [vmem:[%s8012_s22 + $0x68] sm:$0xff] }
 0x479   : > { %5051 = vpow2.f32 %v2781_v11  ;;  %v3766_v11 = vld [vmem:[%s8012_s22 + $0x70] sm:$0xff] }
 0x481   : > { %v2723_v58 = vpop.f32.mrb[80].mxu1 }
 0x482   : > { %v4531_v7 = vpop.f32.mrb[81].mxu1  ;;  %v2724_v27 = vadd.f32 %v7937_v52, %v2723_v58  ;;  %v3689_v58 = vld [vmem:[%s8012_s22 + $0x60] sm:$0xff] }
 0x483   : > { %v5052_v28 = vpop.eup %5051  ;;  %v4913_v7 = vpack.c.bf16 %v3766_v11, %v3765_v59 }
 0x484   : > { %v4185_v51 = vadd.f32 -1.0, %v5052_v28  ;;  %v2760_v30 = vmin.f32 %v2724_v27, 0.0  ;;  %vm2747_vm12 = vcmp.gt.f32.partialorder %v2724_v27, 0.0  ;;  %v3768_v28 = vld [vmem:[%s8012_s22 + $0x80] sm:$0xff] }
 0x486   : > { %v2811_v46 = vsel %vm2746_vm11, %v2719_v37, %v4185_v51  ;;  %v2783_v41 = vmul.f32 1.442695, %v2760_v30  ;;  %v4910_v37 = vpack.c.bf16 %v3688_v20, %v3687_v61  ;;  %v4916_v51 = vpack.c.bf16 %v3768_v28, %v3767_v14 }
 0x487   : > { %v4820_v60 = vpack.c.bf16 %v2811_v46, %v2810_v9  ;;  %v3844_v9 = vld [vmem:[%s8012_s22 + $0x90] sm:$0xff]  ;;  %v3845_v46 = vld [vmem:[%s8012_s22 + $0x98] sm:$0xff] }
 0x488   : > { %5053 = vpow2.f32 %v2783_v41  ;;  %v3846_v41 = vld [vmem:[%s8012_s22 + $0xa0] sm:$0xff] }
 0x489   : > { %4821 = vmatpush3.bf16.msra.mxu1 %v4820_v60  ;;  %v4919_v60 = vpack.c.bf16 %v3845_v46, %v3844_v9 }
 0x48a   : > { %4822 = vmatprep.subr.bf16.mxu1 %v8408_v10 }
 0x491   : > { %v2728_v31 = vpop.f32.mrb[82].mxu1 }
 0x492   : > { %v2729_v63 = vadd.f32 %v7937_v52, %v2728_v31  ;;  %v4534_v34 = vpop.f32.mrb[83].mxu1  ;;  %v5054_v22 = vpop.eup %5053  ;;  %v3847_v31 = vld [vmem:[%s8012_s22 + $0xa8] sm:$0xff] }
 0x493   : > { %v4186_v29 = vadd.f32 -1.0, %v5054_v22  ;;  %v3923_v34 = vld [vmem:[%s8012_s22 + $0xb8] sm:$0xff] }
 0x494   : > { %v2761_v23 = vmin.f32 %v2729_v63, 0.0  ;;  %vm2748_vm13 = vcmp.gt.f32.partialorder %v2729_v63, 0.0 }
 0x495   : > { %v2812_v40 = vsel %vm2747_vm12, %v2724_v27, %v4186_v29  ;;  %v3769_v27 = vld [vmem:[%s8012_s22 + $0x88] sm:$0xff] }
 0x496   : > { %v2785_v57 = vmul.f32 1.442695, %v2761_v23  ;;  %v3924_v23 = vld [vmem:[%s8012_s22 + $0xc0] sm:$0xff]  ;;  %v3925_v29 = vld [vmem:[%s8012_s22 + $0xc8] sm:$0xff] }
 0x497   : > { %v4925_v22 = vpack.c.bf16 %v3924_v23, %v3923_v34 }
 0x498   : > { %5055 = vpow2.f32 %v2785_v57  ;;  %v3848_v57 = vld [vmem:[%s8012_s22 + $0xb0] sm:$0xff] }
 0x4a0   : > { %v2733_v43 = vpop.f32.mrb[84].mxu1 }
 0x4a1   : > { %v2734_v21 = vadd.f32 %v7937_v52, %v2733_v43  ;;  %v4537_v47 = vpop.f32.mrb[85].mxu1  ;;  %v2896_v52 = vld [vmem:[%s8012_s22] sm:$0xff] }
 0x4a2   : > { %v5056_v19 = vpop.eup %5055  ;;  %v4826_v55 = vpack.c.bf16 %v2897_v45, %v2896_v52 }
 0x4a3   : > { %v4187_v44 = vadd.f32 -1.0, %v5056_v19  ;;  %v2762_v42 = vmin.f32 %v2734_v21, 0.0  ;;  %vm2749_vm14 = vcmp.gt.f32.partialorder %v2734_v21, 0.0  ;;  %v3927_v19 = vld [vmem:[%s8012_s22 + $0xd8] sm:$0xff] }
 0x4a5   : > { %v2813_v50 = vsel %vm2748_vm13, %v2729_v63, %v4187_v44  ;;  %v2787_v39 = vmul.f32 1.442695, %v2762_v42  ;;  %v4922_v63 = vpack.c.bf16 %v3847_v31, %v3846_v41 }
 0x4a6   : > { %v4823_v53 = vpack.c.bf16 %v2813_v50, %v2812_v40  ;;  %v4228_v50 = vld [vmem:[%s8012_s22 + $0xe1] ss:$0 sm:$0xff] }
 0x4a7   : > { %5057 = vpow2.f32 %v2787_v39  ;;  %v4190_v39 = vld [vmem:[%s8012_s22 + $0xe0] ss:$0 sm:$0xff] }
 0x4a8   : > { %4824 = vmatpush3.bf16.msra.mxu1 %v4823_v53 }
 0x4a9   : > { %4562 = vmatprep.subr.mxu1 %v8272_v49 }
 0x4b1   : > { %v5058_v18 = vpop.eup %5057 }
 0x4b2   : > { %v4188_v17 = vadd.f32 -1.0, %v5058_v18 }
 0x4b4   : > { %v2814_v33 = vsel %vm2749_vm14, %v2734_v21, %v4188_v17  ;;  %v3926_v21 = vld [vmem:[%s8012_s22 + $0xd0] sm:$0xff] }
 0x4b5   : > { %4563 = vmatpush3.msra.mxu1 %v2814_v33  ;;  %v4928_v47 = vpack.c.bf16 %v3926_v21, %v3925_v29 }
 0x4b6   : > { %4565 = vmatmul.mubr.msk.f32.vlgmr.msra.gmra.mrb[86].mxu1 %vm2816_vm0, %v2815_v48  ;;  %4825 = vmatprep.subr.bf16.mxu1 %v8408_v10 }
 0x4b7   : > { %4827 = vmatpush3.bf16.msra.mxu1 %v4826_v55  ;;  %4571 = vmatprep.mubr.msk.f32.mxu1 %vm5079_vm6, %v8272_v49 }
 0x4b8   : > { %4828 = vmatprep.subr.bf16.mxu1 %v8408_v10 }
 0x513   : > { %v3672_v3 = vpop.f32.mrb[104].mxu0 }
 0x514   : > { %v3674_v32 = vpop.f32.mrb[105].mxu0  ;;  %v3676_v36 = vmax.f32 %v3672_v3, 1e-06 }
 0x516   : > { %5059 = vlog2.f32 %v3676_v36 }
 0x520   : > { %v5060_v56 = vpop.eup %5059 }
 0x521   : > { %v3678_v35 = vmul.f32 0.6931472, %v5060_v56 }
 0x523   : > { %v3770_v30 = vrot.slane %v3678_v35, 2  ;;  %v3849_v43 = vrot.slane %v3678_v35, 4  ;;  %v3928_v44 = vrot.slane %v3678_v35, 6 }
 0x589   : > { %v2886_v16 = vpop.f32.mrb[86].mxu1 }
 0x58a   : > { %4572 = vmatmul.mubr.msk.f32.vlgmr.msra.gmra.mrb[88].mxu1 %vm2567_vm15, %v2886_v16  ;;  %v4566_v1 = vpop.f32.mrb[87].mxu1  ;;  %v2974_v62 = vrot.slane %v2886_v16, 2  ;;  %v3050_v4 = vrot.slane %v2886_v16, 4  ;;  %v3126_v2 = vrot.slane %v2886_v16, 6 }
 0x58b   : > { %4830 = vmatpush3.bf16.msra.mxu1 %v4829_v54  ;;  %4578 = vmatprep.mubr.msk.f32.mxu1 %vm5079_vm6, %v8272_v49 }
 0x58c   : > { %4831 = vmatprep.subr.bf16.mxu1 %v8408_v10 }
 0x592   : > { %4579 = vmatmul.mubr.msk.f32.vlgmr.msra.gmra.mrb[88].mxu1 %vm2567_vm15, %v2974_v62 }
 0x593   : > { %4833 = vmatpush3.bf16.msra.mxu1 %v4832_v12  ;;  %4585 = vmatprep.mubr.msk.f32.mxu1 %vm5079_vm6, %v8272_v49 }
 0x594   : > { %4834 = vmatprep.subr.bf16.mxu1 %v8408_v10 }
 0x59a   : > { %4586 = vmatmul.mubr.msk.f32.vlgmr.msra.gmra.mrb[88].mxu1 %vm2567_vm15, %v3050_v4 }
 0x59b   : > { %4836 = vmatpush3.bf16.msra.mxu1 %v4835_v5  ;;  %4592 = vmatprep.mubr.msk.f32.mxu1 %vm5079_vm6, %v8272_v49 }
 0x59c   : > { %4906 = vmatprep.subr.bf16.mxu1 %v8408_v10 }
 0x5a2   : > { %4593 = vmatmul.mubr.msk.f32.vlgmr.msra.gmra.mrb[88].mxu1 %vm2567_vm15, %v3126_v2  ;;  %vm3200_vm15 = vcmask 25600  }
 0x5a3   : > { %4908 = vmatpush3.bf16.msra.mxu1 %v4907_v26  ;;  %4676 = vmatprep.mubr.msk.f32.mxu1 %vm5079_vm6, %v8272_v49 }
 0x5a4   : > { %4909 = vmatprep.subr.bf16.mxu1 %v8408_v10 }
 0x5a7   : > { %4911 = vmatpush3.bf16.msra.mxu1 %v4910_v37 }
 0x5a8   : > { %4674 = vmatprep.subr.mxu1 %v8272_v49 }
 0x5ab   : > { %4675 = vmatpush3.msra.mxu1 %v3689_v58 }
 0x5ac   : > { %4912 = vmatprep.subr.bf16.mxu1 %v8408_v10  ;;  %4677 = vmatmul.mubr.msk.f32.vlgmr.msra.gmra.mrb[90].mxu1 %vm3690_vm1, %v3678_v35 }
 0x5ad   : > { %4914 = vmatpush3.bf16.msra.mxu1 %v4913_v7  ;;  %4689 = vmatprep.mubr.msk.f32.mxu1 %vm5079_vm6, %v8272_v49 }
 0x5ae   : > { %4915 = vmatprep.subr.bf16.mxu1 %v8408_v10 }
 0x5b1   : > { %4917 = vmatpush3.bf16.msra.mxu1 %v4916_v51 }
 0x5b2   : > { %4687 = vmatprep.subr.mxu1 %v8272_v49 }
 0x5b5   : > { %4688 = vmatpush3.msra.mxu1 %v3769_v27 }
 0x5b6   : > { %4918 = vmatprep.subr.bf16.mxu1 %v8408_v10  ;;  %4690 = vmatmul.mubr.msk.f32.vlgmr.msra.gmra.mrb[90].mxu1 %vm3690_vm1, %v3770_v30 }
 0x5b7   : > { %4920 = vmatpush3.bf16.msra.mxu1 %v4919_v60  ;;  %4702 = vmatprep.mubr.msk.f32.mxu1 %vm5079_vm6, %v8272_v49 }
 0x5b8   : > { %4921 = vmatprep.subr.bf16.mxu1 %v8408_v10 }
 0x5bb   : > { %4923 = vmatpush3.bf16.msra.mxu1 %v4922_v63 }
 0x5bc   : > { %4700 = vmatprep.subr.mxu1 %v8272_v49 }
 0x5bf   : > { %4701 = vmatpush3.msra.mxu1 %v3848_v57 }
 0x5c0   : > { %4703 = vmatmul.mubr.msk.f32.vlgmr.msra.gmra.mrb[90].mxu1 %vm3690_vm1, %v3849_v43  ;;  %4924 = vmatprep.subr.bf16.mxu1 %v8408_v10 }
 0x5c1   : > { %4926 = vmatpush3.bf16.msra.mxu1 %v4925_v22  ;;  %4715 = vmatprep.mubr.msk.f32.mxu1 %vm5079_vm6, %v8272_v49  ;;  %vm4018_vm6 = vcmask 31744  }
 0x5c2   : > { %4927 = vmatprep.subr.bf16.mxu1 %v8408_v10 }
 0x5c5   : > { %4929 = vmatpush3.bf16.msra.mxu1 %v4928_v47 }
 0x5c6   : > { %4713 = vmatprep.subr.mxu1 %v8272_v49 }
 0x5c9   : > { %4714 = vmatpush3.msra.mxu1 %v3927_v19 }
 0x5ca   : > { %4716 = vmatmul.mubr.msk.f32.vlgmr.msra.gmra.mrb[90].mxu1 %vm3690_vm1, %v3928_v44 }
 0x675   : > { %v3195_v42 = vpop.f32.mrb[88].mxu1 }
 0x676   : > { %v4594_v40 = vpop.f32.mrb[89].mxu1  ;;  %v4930_v18 = vadd.f32 %v4190_v39, %v3195_v42 }
 0x678   : > { %v3201_v10 = vsel %vm3200_vm15, %v4930_v18, -inf }
 0x69d   : > { %v3997_v53 = vpop.f32.mrb[90].mxu1 }
 0x69e   : > { %v4931_v52 = vadd.f32 %v4228_v50, %v3997_v53  ;;  %v4717_v45 = vpop.f32.mrb[91].mxu1 }
 0x6a0   : > { %v4002_v17 = vsel %vm3200_vm15, %v4931_v52, -inf }
 0x6a1   : > { %4003 = vmax.xlane.f32.xlu0 %v4002_v17 }
 0x6a5   : > { %3202 = vmax.xlane.f32.xlu0 %v3201_v10 }
 0x72e   : > { %v4004_v49 = vpop.xlane.xlu0 %4003 }
 0x72f   : > { %v4005_v48 = vsub.f32 %v4931_v52, %v4004_v49 }
 0x731   : > { %v4006_v55 = vmul.f32 1.442695, %v4005_v48 }
 0x732   : > { %v3203_v33 = vpop.xlane.xlu0 %3202 }
 0x733   : > { %5061 = vpow2.f32 %v4006_v55  ;;  %v3204_v3 = vsub.f32 %v4930_v18, %v3203_v33 }
 0x735   : > { %v3205_v32 = vmul.f32 1.442695, %v3204_v3 }
 0x737   : > { %5063 = vpow2.f32 %v3205_v32 }
 0x73d   : > { %v5062_v25 = vpop.eup %5061 }
 0x73e   : > { %v4008_v13 = vsel %vm3200_vm15, %v5062_v25, 0.0 }
 0x73f   : > { %4009 = vadd.xlane.f32.xlu1 %v4008_v13 }
 0x741   : > { %v5064_v54 = vpop.eup %5063 }
 0x742   : > { %v3207_v16 = vsel %vm3200_vm15, %v5064_v54, 0.0 }
 0x743   : > { %3208 = vadd.xlane.f32.xlu1 %v3207_v16 }
 0x7cc   : > { %v4010_v1 = vpop.xlane.xlu1 %4009 }
 0x7cd   : > { %5065 = vlog2.f32 %v4010_v1 }
 0x7d0   : > { %v3209_v62 = vpop.xlane.xlu1 %3208 }
 0x7d1   : > { %5067 = vlog2.f32 %v3209_v62 }
 0x7d7   : > { %v5066_v24 = vpop.eup %5065 }
 0x7d8   : > { %v4012_v0 = vmul.f32 0.6931472, %v5066_v24 }
 0x7da   : > { %v4013_v12 = vsub.f32 %v4005_v48, %v4012_v0 }
 0x7db   : > { %v5068_v6 = vpop.eup %5067 }
 0x7dc   : > { %4015 = vrot.lane.b32.xlu0 %v4013_v12, %s5080_s25  ;;  %v3211_v8 = vmul.f32 0.6931472, %v5068_v6 }
 0x7de   : > { %v3212_v36 = vsub.f32 %v3204_v3, %v3211_v8 }
 0x84e   : > { %v4016_v5 = vpop.permute.xlu0 %4015 }
 0x84f   : > { %v4019_v4 = vsel %vm4018_vm6, %v3212_v36, %v4016_v5 }
 0x850   : > { %4021 = vst.msk [vmem:[%s343_s9] sm:$0x3] %vm4020_vm2, %v4019_v4 }
 0x851 PF: > { %s18_s27 = sadd.s32 1, %s5075_s27  }
 0x852   : > { %p15_p4 = scmp.ge.s32.totalorder %s18_s27, 4  }
 0x854   :  { %17 = sbr.rel (!%p15_p4) target bundleno = 1 (0x1), region = 88 }

</bundles_post_ra>
